<compile_context>
chip_gen: v7x
topology: tpu7x:2x2x1
jax: 0.10.0
libtpu: 0.0.40
codegen_flags: <defaults>
</compile_context>

<pallas_src>
import functools

import jax
import jax.numpy as jnp
from jax.experimental import pallas as pl
from jax.experimental.pallas import tpu as pltpu


def _round_up(x, m):
    return (x + m - 1) // m * m


_PAR1 = pltpu.CompilerParams(dimension_semantics=("parallel",))


# ----------------------------------------------------------------------------
# Pallas kernel bodies
# ----------------------------------------------------------------------------
def _conv_core(x_ref, w_ref, b_ref, mask_ref, y_ref, st_ref, col_ref, *, hpwp, wp):
    """Shared conv body.

    x_ref:   (Cin, L_in)    bf16  padded, lane-flattened volume (zero tail).
    w_ref:   (Cout, 27*Cin) bf16  column index = t*Cin + ci, t = kd*9+kh*3+kw.
    b_ref:   (Cout, 1)      f32   conv bias.
    mask_ref:(1, Lout)      f32   1.0 on valid output lanes, 0.0 elsewhere.
    y_ref:   (Cout, Lout)         conv output (lanes in padded-stride space).
    st_ref:  (Cout, 2)      f32   per-batch partial [sum, sum_sq] over valid lanes.
    col_ref: (27*Cin, Lout) bf16  VMEM im2col scratch.
    """
    cin = x_ref.shape[0]
    lout = y_ref.shape[-1]
    # Build the im2col matrix once in VMEM: 27 statically lane-shifted copies.
    for kd in range(3):
        for kh in range(3):
            for kw in range(3):
                t = kd * 9 + kh * 3 + kw
                off = kd * hpwp + kh * wp + kw
                col_ref[t * cin:(t + 1) * cin, :] = x_ref[:, off:off + lout]
    # One K = 27*Cin MXU matmul with f32 accumulation.
    y = jnp.dot(w_ref[...], col_ref[...], preferred_element_type=jnp.float32)
    y = y + b_ref[...]
    y_ref[...] = y.astype(y_ref.dtype)            # bf16 store (stats stay f32)
    ym = y * mask_ref[...]                        # exclude garbage lanes
    st_ref[:, 0:1] = jnp.sum(ym, axis=1, keepdims=True)
    st_ref[:, 1:2] = jnp.sum(ym * y, axis=1, keepdims=True)


def _conv_slab_kernel(x_ref, w_ref, b_ref, mask_ref, y_ref, st_ref, col_ref,
                      *, hpwp, wp):
    """Conv over an already-staged padded slab (first conv)."""
    _conv_core(x_ref, w_ref, b_ref, mask_ref, y_ref, st_ref, col_ref,
               hpwp=hpwp, wp=wp)


def _conv_fused_bn_kernel(yprev_ref, s_ref, t_ref, w_ref, b_ref, mask_ref,
                          y_ref, st_ref, slab_ref, col_ref, *, hpwp, wp, off0):
    """BN+ReLU of the previous conv's output fused into the next conv.

    yprev_ref: (Cin, Lout) bf16   previous conv pre-BN output.
    s_ref/t_ref: (Cin, 1)  f32    folded BN scale / shift.
    slab_ref: (Cin, L_in)  bf16   VMEM scratch — next conv's padded slab layout.
    """
    slab_ref[...] = jnp.zeros(slab_ref.shape, slab_ref.dtype)
    act = jnp.maximum(yprev_ref[...].astype(jnp.float32) * s_ref[...] + t_ref[...], 0.0)
    act = act * mask_ref[...]                     # zero garbage -> slab border stays 0
    lout = act.shape[1]
    slab_ref[:, off0:off0 + lout] = act.astype(slab_ref.dtype)
    _conv_core(slab_ref, w_ref, b_ref, mask_ref, y_ref, st_ref, col_ref,
               hpwp=hpwp, wp=wp)


def _bn_relu_kernel(y_ref, s_ref, t_ref, o_ref):
    """Final BN + ReLU, lane-dense tiles."""
    o_ref[...] = jnp.maximum(
        y_ref[...].astype(jnp.float32) * s_ref[...] + t_ref[...], 0.0
    ).astype(o_ref.dtype)


# ----------------------------------------------------------------------------
# Host-side helpers (tiny XLA glue)
# ----------------------------------------------------------------------------
def _fold_weights(w):
    """(Cout, Cin, 3, 3, 3) -> (Cout, 27*Cin) bf16 with column = t*Cin + ci."""
    cout, cin = w.shape[0], w.shape[1]
    return jnp.transpose(w, (0, 2, 3, 4, 1)).reshape(cout, 27 * cin).astype(jnp.bfloat16)


def _to_slab(a, l_in):
    """(N, C, D, H, W) -> (N, C, L_in) bf16: zero-pad 1 on D/H/W, flatten, pad lanes."""
    n, c, d, h, w = a.shape
    ap = jnp.pad(a.astype(jnp.bfloat16), ((0, 0), (0, 0), (1, 1), (1, 1), (1, 1)))
    ap = ap.reshape(n, c, (d + 2) * (h + 2) * (w + 2))
    return jnp.pad(ap, ((0, 0), (0, 0), (0, l_in - ap.shape[-1])))


def _bn_fold(st, gamma, beta, count):
    """Finalize BN batch stats (biased variance) into folded scale/shift."""
    s = jnp.sum(st.astype(jnp.float32), axis=0)           # (Cout, 2)
    mean = s[:, 0] / count
    var = jnp.maximum(s[:, 1] / count - mean * mean, 0.0)
    inv = jax.lax.rsqrt(var + 1e-5)
    scale = gamma.astype(jnp.float32) * inv
    shift = beta.astype(jnp.float32) - mean * scale
    return scale.reshape(-1, 1), shift.reshape(-1, 1)


# ----------------------------------------------------------------------------
# Forward pass
# ----------------------------------------------------------------------------
def encoder_conv3d_block(x, params, first_level=False):
    """Forward matching the PyTorch module (training-mode BN). NCDHW in/out."""
    if not first_level:
        # TODO(synk): MaxPool3d(2,2) kept in XLA (lax.reduce_window) per perf
        # review — a Pallas pool at these tile sizes is permute/DMA bound.
        x = jax.lax.reduce_window(x, -jnp.inf, jax.lax.max,
                                  (1, 1, 2, 2, 2), (1, 1, 2, 2, 2), "VALID")

    n, cin, d, h, w_sp = x.shape
    mid = params["w1"].shape[0]
    cout = params["w2"].shape[0]
    hp, wpd = h + 2, w_sp + 2
    hpwp = hp * wpd
    lout = _round_up(d * hpwp, 128)                  # output lanes (padded-stride space)
    max_off = 2 * hpwp + 2 * wpd + 2                 # largest tap shift
    l_in = _round_up(lout + max_off, 128)            # input slab lanes
    off0 = hpwp + wpd + 1                            # shift: output lane -> next slab pos
    count = float(n * d * h * w_sp)

    lane = jnp.arange(lout, dtype=jnp.int32)
    r = lane % hpwp
    mask = ((lane < d * hpwp) & (r < h * wpd) & (r % wpd < w_sp))
    mask = mask.astype(jnp.float32).reshape(1, lout)

    xslab = _to_slab(x, l_in)                        # (N, Cin, L_in) bf16
    w1 = _fold_weights(params["w1"])
    b1 = params["b1"].reshape(mid, 1).astype(jnp.float32)
    w2 = _fold_weights(params["w2"])
    b2 = params["b2"].reshape(cout, 1).astype(jnp.float32)

    # ---- Pass 1: conv1 + partial BN stats (one big-K matmul per batch) ------
    y1, st1 = pl.pallas_call(
        functools.partial(_conv_slab_kernel, hpwp=hpwp, wp=wpd),
        grid=(n,),
        in_specs=[
            pl.BlockSpec((None, cin, l_in), lambda i: (i, 0, 0)),
            pl.BlockSpec((mid, 27 * cin), lambda i: (0, 0)),
            pl.BlockSpec((mid, 1), lambda i: (0, 0)),
            pl.BlockSpec((1, lout), lambda i: (0, 0)),
        ],
        out_specs=[
            pl.BlockSpec((None, mid, lout), lambda i: (i, 0, 0)),
            pl.BlockSpec((None, mid, 2), lambda i: (i, 0, 0)),
        ],
        out_shape=[
            jax.ShapeDtypeStruct((n, mid, lout), jnp.bfloat16),
            jax.ShapeDtypeStruct((n, mid, 2), jnp.float32),
        ],
        scratch_shapes=[pltpu.VMEM((27 * cin, lout), jnp.bfloat16)],
        compiler_params=_PAR1,
    )(xslab, w1, b1, mask)

    s1, t1 = _bn_fold(st1, params["g1"], params["be1"], count)

    # ---- Pass 2: BN1+ReLU1 fused into conv2 (+ partial BN stats) ------------
    y2, st2 = pl.pallas_call(
        functools.partial(_conv_fused_bn_kernel, hpwp=hpwp, wp=wpd, off0=off0),
        grid=(n,),
        in_specs=[
            pl.BlockSpec((None, mid, lout), lambda i: (i, 0, 0)),
            pl.BlockSpec((mid, 1), lambda i: (0, 0)),
            pl.BlockSpec((mid, 1), lambda i: (0, 0)),
            pl.BlockSpec((cout, 27 * mid), lambda i: (0, 0)),
            pl.BlockSpec((cout, 1), lambda i: (0, 0)),
            pl.BlockSpec((1, lout), lambda i: (0, 0)),
        ],
        out_specs=[
            pl.BlockSpec((None, cout, lout), lambda i: (i, 0, 0)),
            pl.BlockSpec((None, cout, 2), lambda i: (i, 0, 0)),
        ],
        out_shape=[
            jax.ShapeDtypeStruct((n, cout, lout), jnp.bfloat16),
            jax.ShapeDtypeStruct((n, cout, 2), jnp.float32),
        ],
        scratch_shapes=[pltpu.VMEM((mid, l_in), jnp.bfloat16),
                        pltpu.VMEM((27 * mid, lout), jnp.bfloat16)],
        compiler_params=_PAR1,
    )(y1, s1, t1, w2, b2, mask)

    s2, t2 = _bn_fold(st2, params["g2"], params["be2"], count)

    # ---- Pass 3: final BN2 + ReLU (lane-dense) -------------------------------
    yo = pl.pallas_call(
        _bn_relu_kernel,
        grid=(n,),
        in_specs=[
            pl.BlockSpec((None, cout, lout), lambda i: (i, 0, 0)),
            pl.BlockSpec((cout, 1), lambda i: (0, 0)),
            pl.BlockSpec((cout, 1), lambda i: (0, 0)),
        ],
        out_specs=pl.BlockSpec((None, cout, lout), lambda i: (i, 0, 0)),
        out_shape=jax.ShapeDtypeStruct((n, cout, lout), jnp.float32),
        compiler_params=_PAR1,
    )(y2, s2, t2)

    # Crop valid spatial positions -> (N, Cout, D, H, W).
    out = yo[..., : d * hpwp].reshape(n, cout, d, hp, wpd)[..., :h, :w_sp]
    return out


# ----------------------------------------------------------------------------
# Deterministic parameter init (mirrors module __init__ shapes; torch BN defaults)
# ----------------------------------------------------------------------------
def init_params(key, in_channels, out_channels):
    mid = out_channels // 2
    k1, k2, k3, k4 = jax.random.split(key, 4)
    fan1 = float(in_channels * 27)
    fan2 = float(mid * 27)
    return {
        "w1": jax.random.normal(k1, (mid, in_channels, 3, 3, 3), jnp.float32) * (1.0 / fan1) ** 0.5,
        "b1": jax.random.normal(k2, (mid,), jnp.float32) * 0.1,
        "g1": jnp.ones((mid,), jnp.float32),
        "be1": jnp.zeros((mid,), jnp.float32),
        "w2": jax.random.normal(k3, (out_channels, mid, 3, 3, 3), jnp.float32) * (1.0 / fan2) ** 0.5,
        "b2": jax.random.normal(k4, (out_channels,), jnp.float32) * 0.1,
        "g2": jnp.ones((out_channels,), jnp.float32),
        "be2": jnp.zeros((out_channels,), jnp.float32),
    }


# ----------------------------------------------------------------------------
# Pure-JAX reference (same semantics as the torch module in training mode)
# ----------------------------------------------------------------------------
def reference_forward(x, params, first_level=False):
    if not first_level:
        x = jax.lax.reduce_window(x, -jnp.inf, jax.lax.max,
                                  (1, 1, 2, 2, 2), (1, 1, 2, 2, 2), "VALID")

    def cbr(x, w, b, g, be):
        y = jax.lax.conv_general_dilated(
            x, w, window_strides=(1, 1, 1), padding="SAME",
            dimension_numbers=("NCDHW", "OIDHW", "NCDHW"),
            precision=jax.lax.Precision.HIGHEST)
        y = y + b.reshape(1, -1, 1, 1, 1)
        mean = jnp.mean(y, axis=(0, 2, 3, 4), keepdims=True)
        var = jnp.mean((y - mean) ** 2, axis=(0, 2, 3, 4), keepdims=True)
        y = (y - mean) * jax.lax.rsqrt(var + 1e-5)
        y = y * g.reshape(1, -1, 1, 1, 1) + be.reshape(1, -1, 1, 1, 1)
        return jnp.maximum(y, 0.0)

    x = cbr(x, params["w1"], params["b1"], params["g1"], params["be1"])
    x = cbr(x, params["w2"], params["b2"], params["g2"], params["be2"])
    return x


if __name__ == "__main__":
    key = jax.random.PRNGKey(0)
    kx, kp = jax.random.split(key)

    # batch=2, in_channels=4, spatial=16^3, out_channels=16, non-first level
    N, Cin, S, Cout = 2, 4, 16, 16
    first_level = False

    x = jax.random.normal(kx, (N, Cin, S, S, S), jnp.float32)
    params = init_params(kp, Cin, Cout)

    fwd = jax.jit(functools.partial(encoder_conv3d_block, first_level=first_level))
    out = jax.block_until_ready(fwd(x, params))
    assert out.shape == (N, Cout, S // 2, S // 2, S // 2), out.shape

    ref = jax.jit(functools.partial(reference_forward, first_level=first_level))(x, params)
    err = jnp.abs(out - ref)
    max_err = float(jnp.max(err))
    mean_err = float(jnp.mean(err))
    # bf16 matmul operands / bf16 intermediates (f32 accumulation) -> abs tolerance.
    assert max_err < 1e-1 and mean_err < 2e-2, (max_err, mean_err)

    print("KERNEL_OK")
</pallas_src>

<mosaic_0001>
module attributes {stable_mosaic.version = 11 : i64} {
  func.func @_conv_slab_kernel(%arg0: i32, %arg1: memref<1x4x1152xbf16, #tpu.memory_space<vmem>>, %arg2: memref<8x108xbf16, #tpu.memory_space<vmem>>, %arg3: memref<8x1xf32, #tpu.memory_space<vmem>>, %arg4: memref<1x896xf32, #tpu.memory_space<vmem>>, %arg5: memref<1x8x896xbf16, #tpu.memory_space<vmem>>, %arg6: memref<1x8x2xf32, #tpu.memory_space<vmem>>, %arg7: memref<108x896xbf16, #tpu.memory_space<vmem>>) attributes {dimension_semantics = [#tpu.dimension_semantics<parallel>], iteration_bounds = array<i64: 2>, scalar_prefetch = 0 : i64, scratch_operands = 1 : i64, tpu.core_type = #tpu.core_type<tc>, window_params = [{transform_indices = @transform_0, window_bounds = array<i64: 1, 4, 1152>}, {pipeline_mode = #tpu.pipeline_mode<synchronous>, transform_indices = @transform_1, window_bounds = array<i64: 8, 108>}, {pipeline_mode = #tpu.pipeline_mode<synchronous>, transform_indices = @transform_2, window_bounds = array<i64: 8, 1>}, {pipeline_mode = #tpu.pipeline_mode<synchronous>, transform_indices = @transform_3, window_bounds = array<i64: 1, 896>}, {transform_indices = @transform_4, window_bounds = array<i64: 1, 8, 896>}, {transform_indices = @transform_5, window_bounds = array<i64: 1, 8, 2>}]} {
    %c0 = arith.constant 0 : index
    %c0_0 = arith.constant 0 : index
    %c0_1 = arith.constant 0 : index
    %0 = vector.load %arg1[%c0, %c0_0, %c0_1] : memref<1x4x1152xbf16, #tpu.memory_space<vmem>>, vector<1x4x896xbf16>
    %1 = vector.shape_cast %0 : vector<1x4x896xbf16> to vector<4x896xbf16>
    %c0_2 = arith.constant 0 : index
    %c0_3 = arith.constant 0 : index
    %2 = vector.load %arg7[%c0_2, %c0_3] : memref<108x896xbf16, #tpu.memory_space<vmem>>, vector<4x896xbf16>
    tpu.vector_store %arg7[%c0_2, %c0_3], %1 {strides = array<i32>} : memref<108x896xbf16, #tpu.memory_space<vmem>>, vector<4x896xbf16>,
    %c0_4 = arith.constant 0 : index
    %c0_5 = arith.constant 0 : index
    %c1 = arith.constant 1 : index
    %3 = vector.load %arg1[%c0_4, %c0_5, %c1] : memref<1x4x1152xbf16, #tpu.memory_space<vmem>>, vector<1x4x896xbf16>
    %4 = vector.shape_cast %3 : vector<1x4x896xbf16> to vector<4x896xbf16>
    %c4 = arith.constant 4 : index
    %c0_6 = arith.constant 0 : index
    %5 = vector.load %arg7[%c4, %c0_6] : memref<108x896xbf16, #tpu.memory_space<vmem>>, vector<4x896xbf16>
    tpu.vector_store %arg7[%c4, %c0_6], %4 {strides = array<i32>} : memref<108x896xbf16, #tpu.memory_space<vmem>>, vector<4x896xbf16>,
    %c0_7 = arith.constant 0 : index
    %c0_8 = arith.constant 0 : index
    %c2 = arith.constant 2 : index
    %6 = vector.load %arg1[%c0_7, %c0_8, %c2] : memref<1x4x1152xbf16, #tpu.memory_space<vmem>>, vector<1x4x896xbf16>
    %7 = vector.shape_cast %6 : vector<1x4x896xbf16> to vector<4x896xbf16>
    %c8 = arith.constant 8 : index
    %c0_9 = arith.constant 0 : index
    %8 = vector.load %arg7[%c8, %c0_9] : memref<108x896xbf16, #tpu.memory_space<vmem>>, vector<4x896xbf16>
    tpu.vector_store %arg7[%c8, %c0_9], %7 {strides = array<i32>} : memref<108x896xbf16, #tpu.memory_space<vmem>>, vector<4x896xbf16>,
    %c0_10 = arith.constant 0 : index
    %c0_11 = arith.constant 0 : index
    %c10 = arith.constant 10 : index
    %9 = vector.load %arg1[%c0_10, %c0_11, %c10] : memref<1x4x1152xbf16, #tpu.memory_space<vmem>>, vector<1x4x896xbf16>
    %10 = vector.shape_cast %9 : vector<1x4x896xbf16> to vector<4x896xbf16>
    %c12 = arith.constant 12 : index
    %c0_12 = arith.constant 0 : index
    %11 = vector.load %arg7[%c12, %c0_12] : memref<108x896xbf16, #tpu.memory_space<vmem>>, vector<4x896xbf16>
    tpu.vector_store %arg7[%c12, %c0_12], %10 {strides = array<i32>} : memref<108x896xbf16, #tpu.memory_space<vmem>>, vector<4x896xbf16>,
    %c0_13 = arith.constant 0 : index
    %c0_14 = arith.constant 0 : index
    %c11 = arith.constant 11 : index
    %12 = vector.load %arg1[%c0_13, %c0_14, %c11] : memref<1x4x1152xbf16, #tpu.memory_space<vmem>>, vector<1x4x896xbf16>
    %13 = vector.shape_cast %12 : vector<1x4x896xbf16> to vector<4x896xbf16>
    %c16 = arith.constant 16 : index
    %c0_15 = arith.constant 0 : index
    %14 = vector.load %arg7[%c16, %c0_15] : memref<108x896xbf16, #tpu.memory_space<vmem>>, vector<4x896xbf16>
    tpu.vector_store %arg7[%c16, %c0_15], %13 {strides = array<i32>} : memref<108x896xbf16, #tpu.memory_space<vmem>>, vector<4x896xbf16>,
    %c0_16 = arith.constant 0 : index
    %c0_17 = arith.constant 0 : index
    %c12_18 = arith.constant 12 : index
    %15 = vector.load %arg1[%c0_16, %c0_17, %c12_18] : memref<1x4x1152xbf16, #tpu.memory_space<vmem>>, vector<1x4x896xbf16>
    %16 = vector.shape_cast %15 : vector<1x4x896xbf16> to vector<4x896xbf16>
    %c20 = arith.constant 20 : index
    %c0_19 = arith.constant 0 : index
    %17 = vector.load %arg7[%c20, %c0_19] : memref<108x896xbf16, #tpu.memory_space<vmem>>, vector<4x896xbf16>
    tpu.vector_store %arg7[%c20, %c0_19], %16 {strides = array<i32>} : memref<108x896xbf16, #tpu.memory_space<vmem>>, vector<4x896xbf16>,
    %c0_20 = arith.constant 0 : index
    %c0_21 = arith.constant 0 : index
    %c20_22 = arith.constant 20 : index
    %18 = vector.load %arg1[%c0_20, %c0_21, %c20_22] : memref<1x4x1152xbf16, #tpu.memory_space<vmem>>, vector<1x4x896xbf16>
    %19 = vector.shape_cast %18 : vector<1x4x896xbf16> to vector<4x896xbf16>
    %c24 = arith.constant 24 : index
    %c0_23 = arith.constant 0 : index
    %20 = vector.load %arg7[%c24, %c0_23] : memref<108x896xbf16, #tpu.memory_space<vmem>>, vector<4x896xbf16>
    tpu.vector_store %arg7[%c24, %c0_23], %19 {strides = array<i32>} : memref<108x896xbf16, #tpu.memory_space<vmem>>, vector<4x896xbf16>,
    %c0_24 = arith.constant 0 : index
    %c0_25 = arith.constant 0 : index
    %c21 = arith.constant 21 : index
    %21 = vector.load %arg1[%c0_24, %c0_25, %c21] : memref<1x4x1152xbf16, #tpu.memory_space<vmem>>, vector<1x4x896xbf16>
    %22 = vector.shape_cast %21 : vector<1x4x896xbf16> to vector<4x896xbf16>
    %c28 = arith.constant 28 : index
    %c0_26 = arith.constant 0 : index
    %23 = vector.load %arg7[%c28, %c0_26] : memref<108x896xbf16, #tpu.memory_space<vmem>>, vector<4x896xbf16>
    tpu.vector_store %arg7[%c28, %c0_26], %22 {strides = array<i32>} : memref<108x896xbf16, #tpu.memory_space<vmem>>, vector<4x896xbf16>,
    %c0_27 = arith.constant 0 : index
    %c0_28 = arith.constant 0 : index
    %c22 = arith.constant 22 : index
    %24 = vector.load %arg1[%c0_27, %c0_28, %c22] : memref<1x4x1152xbf16, #tpu.memory_space<vmem>>, vector<1x4x896xbf16>
    %25 = vector.shape_cast %24 : vector<1x4x896xbf16> to vector<4x896xbf16>
    %c32 = arith.constant 32 : index
    %c0_29 = arith.constant 0 : index
    %26 = vector.load %arg7[%c32, %c0_29] : memref<108x896xbf16, #tpu.memory_space<vmem>>, vector<4x896xbf16>
    tpu.vector_store %arg7[%c32, %c0_29], %25 {strides = array<i32>} : memref<108x896xbf16, #tpu.memory_space<vmem>>, vector<4x896xbf16>,
    %c0_30 = arith.constant 0 : index
    %c0_31 = arith.constant 0 : index
    %c100 = arith.constant 100 : index
    %27 = vector.load %arg1[%c0_30, %c0_31, %c100] : memref<1x4x1152xbf16, #tpu.memory_space<vmem>>, vector<1x4x896xbf16>
    %28 = vector.shape_cast %27 : vector<1x4x896xbf16> to vector<4x896xbf16>
    %c36 = arith.constant 36 : index
    %c0_32 = arith.constant 0 : index
    %29 = vector.load %arg7[%c36, %c0_32] : memref<108x896xbf16, #tpu.memory_space<vmem>>, vector<4x896xbf16>
    tpu.vector_store %arg7[%c36, %c0_32], %28 {strides = array<i32>} : memref<108x896xbf16, #tpu.memory_space<vmem>>, vector<4x896xbf16>,
    %c0_33 = arith.constant 0 : index
    %c0_34 = arith.constant 0 : index
    %c101 = arith.constant 101 : index
    %30 = vector.load %arg1[%c0_33, %c0_34, %c101] : memref<1x4x1152xbf16, #tpu.memory_space<vmem>>, vector<1x4x896xbf16>
    %31 = vector.shape_cast %30 : vector<1x4x896xbf16> to vector<4x896xbf16>
    %c40 = arith.constant 40 : index
    %c0_35 = arith.constant 0 : index
    %32 = vector.load %arg7[%c40, %c0_35] : memref<108x896xbf16, #tpu.memory_space<vmem>>, vector<4x896xbf16>
    tpu.vector_store %arg7[%c40, %c0_35], %31 {strides = array<i32>} : memref<108x896xbf16, #tpu.memory_space<vmem>>, vector<4x896xbf16>,
    %c0_36 = arith.constant 0 : index
    %c0_37 = arith.constant 0 : index
    %c102 = arith.constant 102 : index
    %33 = vector.load %arg1[%c0_36, %c0_37, %c102] : memref<1x4x1152xbf16, #tpu.memory_space<vmem>>, vector<1x4x896xbf16>
    %34 = vector.shape_cast %33 : vector<1x4x896xbf16> to vector<4x896xbf16>
    %c44 = arith.constant 44 : index
    %c0_38 = arith.constant 0 : index
    %35 = vector.load %arg7[%c44, %c0_38] : memref<108x896xbf16, #tpu.memory_space<vmem>>, vector<4x896xbf16>
    tpu.vector_store %arg7[%c44, %c0_38], %34 {strides = array<i32>} : memref<108x896xbf16, #tpu.memory_space<vmem>>, vector<4x896xbf16>,
    %c0_39 = arith.constant 0 : index
    %c0_40 = arith.constant 0 : index
    %c110 = arith.constant 110 : index
    %36 = vector.load %arg1[%c0_39, %c0_40, %c110] : memref<1x4x1152xbf16, #tpu.memory_space<vmem>>, vector<1x4x896xbf16>
    %37 = vector.shape_cast %36 : vector<1x4x896xbf16> to vector<4x896xbf16>
    %c48 = arith.constant 48 : index
    %c0_41 = arith.constant 0 : index
    %38 = vector.load %arg7[%c48, %c0_41] : memref<108x896xbf16, #tpu.memory_space<vmem>>, vector<4x896xbf16>
    tpu.vector_store %arg7[%c48, %c0_41], %37 {strides = array<i32>} : memref<108x896xbf16, #tpu.memory_space<vmem>>, vector<4x896xbf16>,
    %c0_42 = arith.constant 0 : index
    %c0_43 = arith.constant 0 : index
    %c111 = arith.constant 111 : index
    %39 = vector.load %arg1[%c0_42, %c0_43, %c111] : memref<1x4x1152xbf16, #tpu.memory_space<vmem>>, vector<1x4x896xbf16>
    %40 = vector.shape_cast %39 : vector<1x4x896xbf16> to vector<4x896xbf16>
    %c52 = arith.constant 52 : index
    %c0_44 = arith.constant 0 : index
    %41 = vector.load %arg7[%c52, %c0_44] : memref<108x896xbf16, #tpu.memory_space<vmem>>, vector<4x896xbf16>
    tpu.vector_store %arg7[%c52, %c0_44], %40 {strides = array<i32>} : memref<108x896xbf16, #tpu.memory_space<vmem>>, vector<4x896xbf16>,
    %c0_45 = arith.constant 0 : index
    %c0_46 = arith.constant 0 : index
    %c112 = arith.constant 112 : index
    %42 = vector.load %arg1[%c0_45, %c0_46, %c112] : memref<1x4x1152xbf16, #tpu.memory_space<vmem>>, vector<1x4x896xbf16>
    %43 = vector.shape_cast %42 : vector<1x4x896xbf16> to vector<4x896xbf16>
    %c56 = arith.constant 56 : index
    %c0_47 = arith.constant 0 : index
    %44 = vector.load %arg7[%c56, %c0_47] : memref<108x896xbf16, #tpu.memory_space<vmem>>, vector<4x896xbf16>
    tpu.vector_store %arg7[%c56, %c0_47], %43 {strides = array<i32>} : memref<108x896xbf16, #tpu.memory_space<vmem>>, vector<4x896xbf16>,
    %c0_48 = arith.constant 0 : index
    %c0_49 = arith.constant 0 : index
    %c120 = arith.constant 120 : index
    %45 = vector.load %arg1[%c0_48, %c0_49, %c120] : memref<1x4x1152xbf16, #tpu.memory_space<vmem>>, vector<1x4x896xbf16>
    %46 = vector.shape_cast %45 : vector<1x4x896xbf16> to vector<4x896xbf16>
    %c60 = arith.constant 60 : index
    %c0_50 = arith.constant 0 : index
    %47 = vector.load %arg7[%c60, %c0_50] : memref<108x896xbf16, #tpu.memory_space<vmem>>, vector<4x896xbf16>
    tpu.vector_store %arg7[%c60, %c0_50], %46 {strides = array<i32>} : memref<108x896xbf16, #tpu.memory_space<vmem>>, vector<4x896xbf16>,
    %c0_51 = arith.constant 0 : index
    %c0_52 = arith.constant 0 : index
    %c121 = arith.constant 121 : index
    %48 = vector.load %arg1[%c0_51, %c0_52, %c121] : memref<1x4x1152xbf16, #tpu.memory_space<vmem>>, vector<1x4x896xbf16>
    %49 = vector.shape_cast %48 : vector<1x4x896xbf16> to vector<4x896xbf16>
    %c64 = arith.constant 64 : index
    %c0_53 = arith.constant 0 : index
    %50 = vector.load %arg7[%c64, %c0_53] : memref<108x896xbf16, #tpu.memory_space<vmem>>, vector<4x896xbf16>
    tpu.vector_store %arg7[%c64, %c0_53], %49 {strides = array<i32>} : memref<108x896xbf16, #tpu.memory_space<vmem>>, vector<4x896xbf16>,
    %c0_54 = arith.constant 0 : index
    %c0_55 = arith.constant 0 : index
    %c122 = arith.constant 122 : index
    %51 = vector.load %arg1[%c0_54, %c0_55, %c122] : memref<1x4x1152xbf16, #tpu.memory_space<vmem>>, vector<1x4x896xbf16>
    %52 = vector.shape_cast %51 : vector<1x4x896xbf16> to vector<4x896xbf16>
    %c68 = arith.constant 68 : index
    %c0_56 = arith.constant 0 : index
    %53 = vector.load %arg7[%c68, %c0_56] : memref<108x896xbf16, #tpu.memory_space<vmem>>, vector<4x896xbf16>
    tpu.vector_store %arg7[%c68, %c0_56], %52 {strides = array<i32>} : memref<108x896xbf16, #tpu.memory_space<vmem>>, vector<4x896xbf16>,
    %c0_57 = arith.constant 0 : index
    %c0_58 = arith.constant 0 : index
    %c200 = arith.constant 200 : index
    %54 = vector.load %arg1[%c0_57, %c0_58, %c200] : memref<1x4x1152xbf16, #tpu.memory_space<vmem>>, vector<1x4x896xbf16>
    %55 = vector.shape_cast %54 : vector<1x4x896xbf16> to vector<4x896xbf16>
    %c72 = arith.constant 72 : index
    %c0_59 = arith.constant 0 : index
    %56 = vector.load %arg7[%c72, %c0_59] : memref<108x896xbf16, #tpu.memory_space<vmem>>, vector<4x896xbf16>
    tpu.vector_store %arg7[%c72, %c0_59], %55 {strides = array<i32>} : memref<108x896xbf16, #tpu.memory_space<vmem>>, vector<4x896xbf16>,
    %c0_60 = arith.constant 0 : index
    %c0_61 = arith.constant 0 : index
    %c201 = arith.constant 201 : index
    %57 = vector.load %arg1[%c0_60, %c0_61, %c201] : memref<1x4x1152xbf16, #tpu.memory_space<vmem>>, vector<1x4x896xbf16>
    %58 = vector.shape_cast %57 : vector<1x4x896xbf16> to vector<4x896xbf16>
    %c76 = arith.constant 76 : index
    %c0_62 = arith.constant 0 : index
    %59 = vector.load %arg7[%c76, %c0_62] : memref<108x896xbf16, #tpu.memory_space<vmem>>, vector<4x896xbf16>
    tpu.vector_store %arg7[%c76, %c0_62], %58 {strides = array<i32>} : memref<108x896xbf16, #tpu.memory_space<vmem>>, vector<4x896xbf16>,
    %c0_63 = arith.constant 0 : index
    %c0_64 = arith.constant 0 : index
    %c202 = arith.constant 202 : index
    %60 = vector.load %arg1[%c0_63, %c0_64, %c202] : memref<1x4x1152xbf16, #tpu.memory_space<vmem>>, vector<1x4x896xbf16>
    %61 = vector.shape_cast %60 : vector<1x4x896xbf16> to vector<4x896xbf16>
    %c80 = arith.constant 80 : index
    %c0_65 = arith.constant 0 : index
    %62 = vector.load %arg7[%c80, %c0_65] : memref<108x896xbf16, #tpu.memory_space<vmem>>, vector<4x896xbf16>
    tpu.vector_store %arg7[%c80, %c0_65], %61 {strides = array<i32>} : memref<108x896xbf16, #tpu.memory_space<vmem>>, vector<4x896xbf16>,
    %c0_66 = arith.constant 0 : index
    %c0_67 = arith.constant 0 : index
    %c210 = arith.constant 210 : index
    %63 = vector.load %arg1[%c0_66, %c0_67, %c210] : memref<1x4x1152xbf16, #tpu.memory_space<vmem>>, vector<1x4x896xbf16>
    %64 = vector.shape_cast %63 : vector<1x4x896xbf16> to vector<4x896xbf16>
    %c84 = arith.constant 84 : index
    %c0_68 = arith.constant 0 : index
    %65 = vector.load %arg7[%c84, %c0_68] : memref<108x896xbf16, #tpu.memory_space<vmem>>, vector<4x896xbf16>
    tpu.vector_store %arg7[%c84, %c0_68], %64 {strides = array<i32>} : memref<108x896xbf16, #tpu.memory_space<vmem>>, vector<4x896xbf16>,
    %c0_69 = arith.constant 0 : index
    %c0_70 = arith.constant 0 : index
    %c211 = arith.constant 211 : index
    %66 = vector.load %arg1[%c0_69, %c0_70, %c211] : memref<1x4x1152xbf16, #tpu.memory_space<vmem>>, vector<1x4x896xbf16>
    %67 = vector.shape_cast %66 : vector<1x4x896xbf16> to vector<4x896xbf16>
    %c88 = arith.constant 88 : index
    %c0_71 = arith.constant 0 : index
    %68 = vector.load %arg7[%c88, %c0_71] : memref<108x896xbf16, #tpu.memory_space<vmem>>, vector<4x896xbf16>
    tpu.vector_store %arg7[%c88, %c0_71], %67 {strides = array<i32>} : memref<108x896xbf16, #tpu.memory_space<vmem>>, vector<4x896xbf16>,
    %c0_72 = arith.constant 0 : index
    %c0_73 = arith.constant 0 : index
    %c212 = arith.constant 212 : index
    %69 = vector.load %arg1[%c0_72, %c0_73, %c212] : memref<1x4x1152xbf16, #tpu.memory_space<vmem>>, vector<1x4x896xbf16>
    %70 = vector.shape_cast %69 : vector<1x4x896xbf16> to vector<4x896xbf16>
    %c92 = arith.constant 92 : index
    %c0_74 = arith.constant 0 : index
    %71 = vector.load %arg7[%c92, %c0_74] : memref<108x896xbf16, #tpu.memory_space<vmem>>, vector<4x896xbf16>
    tpu.vector_store %arg7[%c92, %c0_74], %70 {strides = array<i32>} : memref<108x896xbf16, #tpu.memory_space<vmem>>, vector<4x896xbf16>,
    %c0_75 = arith.constant 0 : index
    %c0_76 = arith.constant 0 : index
    %c220 = arith.constant 220 : index
    %72 = vector.load %arg1[%c0_75, %c0_76, %c220] : memref<1x4x1152xbf16, #tpu.memory_space<vmem>>, vector<1x4x896xbf16>
    %73 = vector.shape_cast %72 : vector<1x4x896xbf16> to vector<4x896xbf16>
    %c96 = arith.constant 96 : index
    %c0_77 = arith.constant 0 : index
    %74 = vector.load %arg7[%c96, %c0_77] : memref<108x896xbf16, #tpu.memory_space<vmem>>, vector<4x896xbf16>
    tpu.vector_store %arg7[%c96, %c0_77], %73 {strides = array<i32>} : memref<108x896xbf16, #tpu.memory_space<vmem>>, vector<4x896xbf16>,
    %c0_78 = arith.constant 0 : index
    %c0_79 = arith.constant 0 : index
    %c221 = arith.constant 221 : index
    %75 = vector.load %arg1[%c0_78, %c0_79, %c221] : memref<1x4x1152xbf16, #tpu.memory_space<vmem>>, vector<1x4x896xbf16>
    %76 = vector.shape_cast %75 : vector<1x4x896xbf16> to vector<4x896xbf16>
    %c100_80 = arith.constant 100 : index
    %c0_81 = arith.constant 0 : index
    %77 = vector.load %arg7[%c100_80, %c0_81] : memref<108x896xbf16, #tpu.memory_space<vmem>>, vector<4x896xbf16>
    tpu.vector_store %arg7[%c100_80, %c0_81], %76 {strides = array<i32>} : memref<108x896xbf16, #tpu.memory_space<vmem>>, vector<4x896xbf16>,
    %c0_82 = arith.constant 0 : index
    %c0_83 = arith.constant 0 : index
    %c222 = arith.constant 222 : index
    %78 = vector.load %arg1[%c0_82, %c0_83, %c222] : memref<1x4x1152xbf16, #tpu.memory_space<vmem>>, vector<1x4x896xbf16>
    %79 = vector.shape_cast %78 : vector<1x4x896xbf16> to vector<4x896xbf16>
    %c104 = arith.constant 104 : index
    %c0_84 = arith.constant 0 : index
    %80 = vector.load %arg7[%c104, %c0_84] : memref<108x896xbf16, #tpu.memory_space<vmem>>, vector<4x896xbf16>
    tpu.vector_store %arg7[%c104, %c0_84], %79 {strides = array<i32>} : memref<108x896xbf16, #tpu.memory_space<vmem>>, vector<4x896xbf16>,
    %c0_85 = arith.constant 0 : index
    %c0_86 = arith.constant 0 : index
    %81 = vector.load %arg2[%c0_85, %c0_86] : memref<8x108xbf16, #tpu.memory_space<vmem>>, vector<8x108xbf16>
    %c0_87 = arith.constant 0 : index
    %c0_88 = arith.constant 0 : index
    %82 = vector.load %arg7[%c0_87, %c0_88] : memref<108x896xbf16, #tpu.memory_space<vmem>>, vector<108x896xbf16>
    %cst = arith.constant dense<0.000000e+00> : vector<8x896xf32>
    %83 = tpu.matmul %81, %82, %cst {dimension_numbers = #tpu.dot_dimension_numbers<[1], [0], [0], [1], [0, 0, 1, 1], [], []>} : vector<8x108xbf16>, vector<108x896xbf16>, vector<8x896xf32> -> vector<8x896xf32>
    %c0_89 = arith.constant 0 : index
    %c0_90 = arith.constant 0 : index
    %84 = vector.load %arg3[%c0_89, %c0_90] : memref<8x1xf32, #tpu.memory_space<vmem>>, vector<8x1xf32>
    %85 = vector.broadcast %84 : vector<8x1xf32> to vector<8x896xf32>
    %86 = arith.addf %83, %85 : vector<8x896xf32>
    %87 = arith.truncf %86 : vector<8x896xf32> to vector<8x896xbf16>
    %c0_91 = arith.constant 0 : index
    %c0_92 = arith.constant 0 : index
    %c0_93 = arith.constant 0 : index
    %88 = vector.load %arg5[%c0_91, %c0_92, %c0_93] : memref<1x8x896xbf16, #tpu.memory_space<vmem>>, vector<1x8x896xbf16>
    %89 = vector.shape_cast %88 : vector<1x8x896xbf16> to vector<8x896xbf16>
    %90 = vector.shape_cast %87 : vector<8x896xbf16> to vector<1x8x896xbf16>
    tpu.vector_store %arg5[%c0_91, %c0_92, %c0_93], %90 {strides = array<i32>} : memref<1x8x896xbf16, #tpu.memory_space<vmem>>, vector<1x8x896xbf16>,
    %c0_94 = arith.constant 0 : index
    %c0_95 = arith.constant 0 : index
    %91 = vector.load %arg4[%c0_94, %c0_95] : memref<1x896xf32, #tpu.memory_space<vmem>>, vector<1x896xf32>
    %92 = vector.broadcast %91 : vector<1x896xf32> to vector<8x896xf32>
    %93 = arith.mulf %86, %92 : vector<8x896xf32>
    %cst_96 = arith.constant dense<0.000000e+00> : vector<8xf32>
    %94 = vector.multi_reduction <add>, %93, %cst_96 [1] : vector<8x896xf32> to vector<8xf32>
    %95 = vector.shape_cast %94 : vector<8xf32> to vector<8x1xf32>
    %c0_97 = arith.constant 0 : index
    %c0_98 = arith.constant 0 : index
    %c0_99 = arith.constant 0 : index
    %96 = vector.load %arg6[%c0_97, %c0_98, %c0_99] : memref<1x8x2xf32, #tpu.memory_space<vmem>>, vector<1x8x1xf32>
    %97 = vector.shape_cast %96 : vector<1x8x1xf32> to vector<8x1xf32>
    %98 = vector.shape_cast %95 : vector<8x1xf32> to vector<1x8x1xf32>
    tpu.vector_store %arg6[%c0_97, %c0_98, %c0_99], %98 {strides = array<i32>} : memref<1x8x2xf32, #tpu.memory_space<vmem>>, vector<1x8x1xf32>,
    %99 = arith.mulf %93, %86 : vector<8x896xf32>
    %cst_100 = arith.constant dense<0.000000e+00> : vector<8xf32>
    %100 = vector.multi_reduction <add>, %99, %cst_100 [1] : vector<8x896xf32> to vector<8xf32>
    %101 = vector.shape_cast %100 : vector<8xf32> to vector<8x1xf32>
    %c0_101 = arith.constant 0 : index
    %c0_102 = arith.constant 0 : index
    %c1_103 = arith.constant 1 : index
    %102 = vector.load %arg6[%c0_101, %c0_102, %c1_103] : memref<1x8x2xf32, #tpu.memory_space<vmem>>, vector<1x8x1xf32>
    %103 = vector.shape_cast %102 : vector<1x8x1xf32> to vector<8x1xf32>
    %104 = vector.shape_cast %101 : vector<8x1xf32> to vector<1x8x1xf32>
    tpu.vector_store %arg6[%c0_101, %c0_102, %c1_103], %104 {strides = array<i32>} : memref<1x8x2xf32, #tpu.memory_space<vmem>>, vector<1x8x1xf32>,
    return
  }
  func.func @transform_0(%arg0: i32) -> (i32, i32, i32) {
    %c0_i32 = arith.constant 0 : i32
    %c0_i32_0 = arith.constant 0 : i32
    %c0_i32_1 = arith.constant 0 : i32
    return %arg0, %c0_i32, %c0_i32_0 : i32, i32, i32
  }
  func.func @transform_1(%arg0: i32) -> (i32, i32) {
    %c0_i32 = arith.constant 0 : i32
    %c0_i32_0 = arith.constant 0 : i32
    %c0_i32_1 = arith.constant 0 : i32
    return %c0_i32, %c0_i32_0 : i32, i32
  }
  func.func @transform_2(%arg0: i32) -> (i32, i32) {
    %c0_i32 = arith.constant 0 : i32
    %c0_i32_0 = arith.constant 0 : i32
    %c0_i32_1 = arith.constant 0 : i32
    return %c0_i32, %c0_i32_0 : i32, i32
  }
  func.func @transform_3(%arg0: i32) -> (i32, i32) {
    %c0_i32 = arith.constant 0 : i32
    %c0_i32_0 = arith.constant 0 : i32
    %c0_i32_1 = arith.constant 0 : i32
    return %c0_i32, %c0_i32_0 : i32, i32
  }
  func.func @transform_4(%arg0: i32) -> (i32, i32, i32) {
    %c0_i32 = arith.constant 0 : i32
    %c0_i32_0 = arith.constant 0 : i32
    %c0_i32_1 = arith.constant 0 : i32
    return %arg0, %c0_i32, %c0_i32_0 : i32, i32, i32
  }
  func.func @transform_5(%arg0: i32) -> (i32, i32, i32) {
    %c0_i32 = arith.constant 0 : i32
    %c0_i32_0 = arith.constant 0 : i32
    %c0_i32_1 = arith.constant 0 : i32
    return %arg0, %c0_i32, %c0_i32_0 : i32, i32, i32
  }
}

module attributes {stable_mosaic.version = 11 : i64} {
  func.func @_conv_fused_bn_kernel(%arg0: i32, %arg1: memref<1x8x896xbf16, #tpu.memory_space<vmem>>, %arg2: memref<8x1xf32, #tpu.memory_space<vmem>>, %arg3: memref<8x1xf32, #tpu.memory_space<vmem>>, %arg4: memref<16x216xbf16, #tpu.memory_space<vmem>>, %arg5: memref<16x1xf32, #tpu.memory_space<vmem>>, %arg6: memref<1x896xf32, #tpu.memory_space<vmem>>, %arg7: memref<1x16x896xbf16, #tpu.memory_space<vmem>>, %arg8: memref<1x16x2xf32, #tpu.memory_space<vmem>>, %arg9: memref<8x1152xbf16, #tpu.memory_space<vmem>>, %arg10: memref<216x896xbf16, #tpu.memory_space<vmem>>) attributes {dimension_semantics = [#tpu.dimension_semantics<parallel>], iteration_bounds = array<i64: 2>, scalar_prefetch = 0 : i64, scratch_operands = 2 : i64, tpu.core_type = #tpu.core_type<tc>, window_params = [{transform_indices = @transform_0, window_bounds = array<i64: 1, 8, 896>}, {pipeline_mode = #tpu.pipeline_mode<synchronous>, transform_indices = @transform_1, window_bounds = array<i64: 8, 1>}, {pipeline_mode = #tpu.pipeline_mode<synchronous>, transform_indices = @transform_2, window_bounds = array<i64: 8, 1>}, {pipeline_mode = #tpu.pipeline_mode<synchronous>, transform_indices = @transform_3, window_bounds = array<i64: 16, 216>}, {pipeline_mode = #tpu.pipeline_mode<synchronous>, transform_indices = @transform_4, window_bounds = array<i64: 16, 1>}, {pipeline_mode = #tpu.pipeline_mode<synchronous>, transform_indices = @transform_5, window_bounds = array<i64: 1, 896>}, {transform_indices = @transform_6, window_bounds = array<i64: 1, 16, 896>}, {transform_indices = @transform_7, window_bounds = array<i64: 1, 16, 2>}]} {
    %cst = arith.constant 0.000000e+00 : bf16
    %0 = vector.broadcast %cst : bf16 to vector<8x1152xbf16>
    %c0 = arith.constant 0 : index
    %c0_0 = arith.constant 0 : index
    %1 = vector.load %arg9[%c0, %c0_0] : memref<8x1152xbf16, #tpu.memory_space<vmem>>, vector<8x1152xbf16>
    tpu.vector_store %arg9[%c0, %c0_0], %0 {strides = array<i32>} : memref<8x1152xbf16, #tpu.memory_space<vmem>>, vector<8x1152xbf16>,
    %c0_1 = arith.constant 0 : index
    %c0_2 = arith.constant 0 : index
    %c0_3 = arith.constant 0 : index
    %2 = vector.load %arg1[%c0_1, %c0_2, %c0_3] : memref<1x8x896xbf16, #tpu.memory_space<vmem>>, vector<1x8x896xbf16>
    %3 = vector.shape_cast %2 : vector<1x8x896xbf16> to vector<8x896xbf16>
    %4 = arith.extf %3 : vector<8x896xbf16> to vector<8x896xf32>
    %c0_4 = arith.constant 0 : index
    %c0_5 = arith.constant 0 : index
    %5 = vector.load %arg2[%c0_4, %c0_5] : memref<8x1xf32, #tpu.memory_space<vmem>>, vector<8x1xf32>
    %6 = vector.broadcast %5 : vector<8x1xf32> to vector<8x896xf32>
    %7 = arith.mulf %4, %6 : vector<8x896xf32>
    %c0_6 = arith.constant 0 : index
    %c0_7 = arith.constant 0 : index
    %8 = vector.load %arg3[%c0_6, %c0_7] : memref<8x1xf32, #tpu.memory_space<vmem>>, vector<8x1xf32>
    %9 = vector.broadcast %8 : vector<8x1xf32> to vector<8x896xf32>
    %10 = arith.addf %7, %9 : vector<8x896xf32>
    %cst_8 = arith.constant 0.000000e+00 : f32
    %11 = vector.broadcast %cst_8 : f32 to vector<8x896xf32>
    %12 = arith.maximumf %10, %11 : vector<8x896xf32>
    %c0_9 = arith.constant 0 : index
    %c0_10 = arith.constant 0 : index
    %13 = vector.load %arg6[%c0_9, %c0_10] : memref<1x896xf32, #tpu.memory_space<vmem>>, vector<1x896xf32>
    %14 = vector.broadcast %13 : vector<1x896xf32> to vector<8x896xf32>
    %15 = arith.mulf %12, %14 : vector<8x896xf32>
    %16 = arith.truncf %15 : vector<8x896xf32> to vector<8x896xbf16>
    %c0_11 = arith.constant 0 : index
    %c111 = arith.constant 111 : index
    %17 = vector.load %arg9[%c0_11, %c111] : memref<8x1152xbf16, #tpu.memory_space<vmem>>, vector<8x896xbf16>
    tpu.vector_store %arg9[%c0_11, %c111], %16 {strides = array<i32>} : memref<8x1152xbf16, #tpu.memory_space<vmem>>, vector<8x896xbf16>,
    %c0_12 = arith.constant 0 : index
    %c0_13 = arith.constant 0 : index
    %18 = vector.load %arg9[%c0_12, %c0_13] : memref<8x1152xbf16, #tpu.memory_space<vmem>>, vector<8x896xbf16>
    %c0_14 = arith.constant 0 : index
    %c0_15 = arith.constant 0 : index
    %19 = vector.load %arg10[%c0_14, %c0_15] : memref<216x896xbf16, #tpu.memory_space<vmem>>, vector<8x896xbf16>
    tpu.vector_store %arg10[%c0_14, %c0_15], %18 {strides = array<i32>} : memref<216x896xbf16, #tpu.memory_space<vmem>>, vector<8x896xbf16>,
    %c0_16 = arith.constant 0 : index
    %c1 = arith.constant 1 : index
    %20 = vector.load %arg9[%c0_16, %c1] : memref<8x1152xbf16, #tpu.memory_space<vmem>>, vector<8x896xbf16>
    %c8 = arith.constant 8 : index
    %c0_17 = arith.constant 0 : index
    %21 = vector.load %arg10[%c8, %c0_17] : memref<216x896xbf16, #tpu.memory_space<vmem>>, vector<8x896xbf16>
    tpu.vector_store %arg10[%c8, %c0_17], %20 {strides = array<i32>} : memref<216x896xbf16, #tpu.memory_space<vmem>>, vector<8x896xbf16>,
    %c0_18 = arith.constant 0 : index
    %c2 = arith.constant 2 : index
    %22 = vector.load %arg9[%c0_18, %c2] : memref<8x1152xbf16, #tpu.memory_space<vmem>>, vector<8x896xbf16>
    %c16 = arith.constant 16 : index
    %c0_19 = arith.constant 0 : index
    %23 = vector.load %arg10[%c16, %c0_19] : memref<216x896xbf16, #tpu.memory_space<vmem>>, vector<8x896xbf16>
    tpu.vector_store %arg10[%c16, %c0_19], %22 {strides = array<i32>} : memref<216x896xbf16, #tpu.memory_space<vmem>>, vector<8x896xbf16>,
    %c0_20 = arith.constant 0 : index
    %c10 = arith.constant 10 : index
    %24 = vector.load %arg9[%c0_20, %c10] : memref<8x1152xbf16, #tpu.memory_space<vmem>>, vector<8x896xbf16>
    %c24 = arith.constant 24 : index
    %c0_21 = arith.constant 0 : index
    %25 = vector.load %arg10[%c24, %c0_21] : memref<216x896xbf16, #tpu.memory_space<vmem>>, vector<8x896xbf16>
    tpu.vector_store %arg10[%c24, %c0_21], %24 {strides = array<i32>} : memref<216x896xbf16, #tpu.memory_space<vmem>>, vector<8x896xbf16>,
    %c0_22 = arith.constant 0 : index
    %c11 = arith.constant 11 : index
    %26 = vector.load %arg9[%c0_22, %c11] : memref<8x1152xbf16, #tpu.memory_space<vmem>>, vector<8x896xbf16>
    %c32 = arith.constant 32 : index
    %c0_23 = arith.constant 0 : index
    %27 = vector.load %arg10[%c32, %c0_23] : memref<216x896xbf16, #tpu.memory_space<vmem>>, vector<8x896xbf16>
    tpu.vector_store %arg10[%c32, %c0_23], %26 {strides = array<i32>} : memref<216x896xbf16, #tpu.memory_space<vmem>>, vector<8x896xbf16>,
    %c0_24 = arith.constant 0 : index
    %c12 = arith.constant 12 : index
    %28 = vector.load %arg9[%c0_24, %c12] : memref<8x1152xbf16, #tpu.memory_space<vmem>>, vector<8x896xbf16>
    %c40 = arith.constant 40 : index
    %c0_25 = arith.constant 0 : index
    %29 = vector.load %arg10[%c40, %c0_25] : memref<216x896xbf16, #tpu.memory_space<vmem>>, vector<8x896xbf16>
    tpu.vector_store %arg10[%c40, %c0_25], %28 {strides = array<i32>} : memref<216x896xbf16, #tpu.memory_space<vmem>>, vector<8x896xbf16>,
    %c0_26 = arith.constant 0 : index
    %c20 = arith.constant 20 : index
    %30 = vector.load %arg9[%c0_26, %c20] : memref<8x1152xbf16, #tpu.memory_space<vmem>>, vector<8x896xbf16>
    %c48 = arith.constant 48 : index
    %c0_27 = arith.constant 0 : index
    %31 = vector.load %arg10[%c48, %c0_27] : memref<216x896xbf16, #tpu.memory_space<vmem>>, vector<8x896xbf16>
    tpu.vector_store %arg10[%c48, %c0_27], %30 {strides = array<i32>} : memref<216x896xbf16, #tpu.memory_space<vmem>>, vector<8x896xbf16>,
    %c0_28 = arith.constant 0 : index
    %c21 = arith.constant 21 : index
    %32 = vector.load %arg9[%c0_28, %c21] : memref<8x1152xbf16, #tpu.memory_space<vmem>>, vector<8x896xbf16>
    %c56 = arith.constant 56 : index
    %c0_29 = arith.constant 0 : index
    %33 = vector.load %arg10[%c56, %c0_29] : memref<216x896xbf16, #tpu.memory_space<vmem>>, vector<8x896xbf16>
    tpu.vector_store %arg10[%c56, %c0_29], %32 {strides = array<i32>} : memref<216x896xbf16, #tpu.memory_space<vmem>>, vector<8x896xbf16>,
    %c0_30 = arith.constant 0 : index
    %c22 = arith.constant 22 : index
    %34 = vector.load %arg9[%c0_30, %c22] : memref<8x1152xbf16, #tpu.memory_space<vmem>>, vector<8x896xbf16>
    %c64 = arith.constant 64 : index
    %c0_31 = arith.constant 0 : index
    %35 = vector.load %arg10[%c64, %c0_31] : memref<216x896xbf16, #tpu.memory_space<vmem>>, vector<8x896xbf16>
    tpu.vector_store %arg10[%c64, %c0_31], %34 {strides = array<i32>} : memref<216x896xbf16, #tpu.memory_space<vmem>>, vector<8x896xbf16>,
    %c0_32 = arith.constant 0 : index
    %c100 = arith.constant 100 : index
    %36 = vector.load %arg9[%c0_32, %c100] : memref<8x1152xbf16, #tpu.memory_space<vmem>>, vector<8x896xbf16>
    %c72 = arith.constant 72 : index
    %c0_33 = arith.constant 0 : index
    %37 = vector.load %arg10[%c72, %c0_33] : memref<216x896xbf16, #tpu.memory_space<vmem>>, vector<8x896xbf16>
    tpu.vector_store %arg10[%c72, %c0_33], %36 {strides = array<i32>} : memref<216x896xbf16, #tpu.memory_space<vmem>>, vector<8x896xbf16>,
    %c0_34 = arith.constant 0 : index
    %c101 = arith.constant 101 : index
    %38 = vector.load %arg9[%c0_34, %c101] : memref<8x1152xbf16, #tpu.memory_space<vmem>>, vector<8x896xbf16>
    %c80 = arith.constant 80 : index
    %c0_35 = arith.constant 0 : index
    %39 = vector.load %arg10[%c80, %c0_35] : memref<216x896xbf16, #tpu.memory_space<vmem>>, vector<8x896xbf16>
    tpu.vector_store %arg10[%c80, %c0_35], %38 {strides = array<i32>} : memref<216x896xbf16, #tpu.memory_space<vmem>>, vector<8x896xbf16>,
    %c0_36 = arith.constant 0 : index
    %c102 = arith.constant 102 : index
    %40 = vector.load %arg9[%c0_36, %c102] : memref<8x1152xbf16, #tpu.memory_space<vmem>>, vector<8x896xbf16>
    %c88 = arith.constant 88 : index
    %c0_37 = arith.constant 0 : index
    %41 = vector.load %arg10[%c88, %c0_37] : memref<216x896xbf16, #tpu.memory_space<vmem>>, vector<8x896xbf16>
    tpu.vector_store %arg10[%c88, %c0_37], %40 {strides = array<i32>} : memref<216x896xbf16, #tpu.memory_space<vmem>>, vector<8x896xbf16>,
    %c0_38 = arith.constant 0 : index
    %c110 = arith.constant 110 : index
    %42 = vector.load %arg9[%c0_38, %c110] : memref<8x1152xbf16, #tpu.memory_space<vmem>>, vector<8x896xbf16>
    %c96 = arith.constant 96 : index
    %c0_39 = arith.constant 0 : index
    %43 = vector.load %arg10[%c96, %c0_39] : memref<216x896xbf16, #tpu.memory_space<vmem>>, vector<8x896xbf16>
    tpu.vector_store %arg10[%c96, %c0_39], %42 {strides = array<i32>} : memref<216x896xbf16, #tpu.memory_space<vmem>>, vector<8x896xbf16>,
    %c0_40 = arith.constant 0 : index
    %c111_41 = arith.constant 111 : index
    %44 = vector.load %arg9[%c0_40, %c111_41] : memref<8x1152xbf16, #tpu.memory_space<vmem>>, vector<8x896xbf16>
    %c104 = arith.constant 104 : index
    %c0_42 = arith.constant 0 : index
    %45 = vector.load %arg10[%c104, %c0_42] : memref<216x896xbf16, #tpu.memory_space<vmem>>, vector<8x896xbf16>
    tpu.vector_store %arg10[%c104, %c0_42], %44 {strides = array<i32>} : memref<216x896xbf16, #tpu.memory_space<vmem>>, vector<8x896xbf16>,
    %c0_43 = arith.constant 0 : index
    %c112 = arith.constant 112 : index
    %46 = vector.load %arg9[%c0_43, %c112] : memref<8x1152xbf16, #tpu.memory_space<vmem>>, vector<8x896xbf16>
    %c112_44 = arith.constant 112 : index
    %c0_45 = arith.constant 0 : index
    %47 = vector.load %arg10[%c112_44, %c0_45] : memref<216x896xbf16, #tpu.memory_space<vmem>>, vector<8x896xbf16>
    tpu.vector_store %arg10[%c112_44, %c0_45], %46 {strides = array<i32>} : memref<216x896xbf16, #tpu.memory_space<vmem>>, vector<8x896xbf16>,
    %c0_46 = arith.constant 0 : index
    %c120 = arith.constant 120 : index
    %48 = vector.load %arg9[%c0_46, %c120] : memref<8x1152xbf16, #tpu.memory_space<vmem>>, vector<8x896xbf16>
    %c120_47 = arith.constant 120 : index
    %c0_48 = arith.constant 0 : index
    %49 = vector.load %arg10[%c120_47, %c0_48] : memref<216x896xbf16, #tpu.memory_space<vmem>>, vector<8x896xbf16>
    tpu.vector_store %arg10[%c120_47, %c0_48], %48 {strides = array<i32>} : memref<216x896xbf16, #tpu.memory_space<vmem>>, vector<8x896xbf16>,
    %c0_49 = arith.constant 0 : index
    %c121 = arith.constant 121 : index
    %50 = vector.load %arg9[%c0_49, %c121] : memref<8x1152xbf16, #tpu.memory_space<vmem>>, vector<8x896xbf16>
    %c128 = arith.constant 128 : index
    %c0_50 = arith.constant 0 : index
    %51 = vector.load %arg10[%c128, %c0_50] : memref<216x896xbf16, #tpu.memory_space<vmem>>, vector<8x896xbf16>
    tpu.vector_store %arg10[%c128, %c0_50], %50 {strides = array<i32>} : memref<216x896xbf16, #tpu.memory_space<vmem>>, vector<8x896xbf16>,
    %c0_51 = arith.constant 0 : index
    %c122 = arith.constant 122 : index
    %52 = vector.load %arg9[%c0_51, %c122] : memref<8x1152xbf16, #tpu.memory_space<vmem>>, vector<8x896xbf16>
    %c136 = arith.constant 136 : index
    %c0_52 = arith.constant 0 : index
    %53 = vector.load %arg10[%c136, %c0_52] : memref<216x896xbf16, #tpu.memory_space<vmem>>, vector<8x896xbf16>
    tpu.vector_store %arg10[%c136, %c0_52], %52 {strides = array<i32>} : memref<216x896xbf16, #tpu.memory_space<vmem>>, vector<8x896xbf16>,
    %c0_53 = arith.constant 0 : index
    %c200 = arith.constant 200 : index
    %54 = vector.load %arg9[%c0_53, %c200] : memref<8x1152xbf16, #tpu.memory_space<vmem>>, vector<8x896xbf16>
    %c144 = arith.constant 144 : index
    %c0_54 = arith.constant 0 : index
    %55 = vector.load %arg10[%c144, %c0_54] : memref<216x896xbf16, #tpu.memory_space<vmem>>, vector<8x896xbf16>
    tpu.vector_store %arg10[%c144, %c0_54], %54 {strides = array<i32>} : memref<216x896xbf16, #tpu.memory_space<vmem>>, vector<8x896xbf16>,
    %c0_55 = arith.constant 0 : index
    %c201 = arith.constant 201 : index
    %56 = vector.load %arg9[%c0_55, %c201] : memref<8x1152xbf16, #tpu.memory_space<vmem>>, vector<8x896xbf16>
    %c152 = arith.constant 152 : index
    %c0_56 = arith.constant 0 : index
    %57 = vector.load %arg10[%c152, %c0_56] : memref<216x896xbf16, #tpu.memory_space<vmem>>, vector<8x896xbf16>
    tpu.vector_store %arg10[%c152, %c0_56], %56 {strides = array<i32>} : memref<216x896xbf16, #tpu.memory_space<vmem>>, vector<8x896xbf16>,
    %c0_57 = arith.constant 0 : index
    %c202 = arith.constant 202 : index
    %58 = vector.load %arg9[%c0_57, %c202] : memref<8x1152xbf16, #tpu.memory_space<vmem>>, vector<8x896xbf16>
    %c160 = arith.constant 160 : index
    %c0_58 = arith.constant 0 : index
    %59 = vector.load %arg10[%c160, %c0_58] : memref<216x896xbf16, #tpu.memory_space<vmem>>, vector<8x896xbf16>
    tpu.vector_store %arg10[%c160, %c0_58], %58 {strides = array<i32>} : memref<216x896xbf16, #tpu.memory_space<vmem>>, vector<8x896xbf16>,
    %c0_59 = arith.constant 0 : index
    %c210 = arith.constant 210 : index
    %60 = vector.load %arg9[%c0_59, %c210] : memref<8x1152xbf16, #tpu.memory_space<vmem>>, vector<8x896xbf16>
    %c168 = arith.constant 168 : index
    %c0_60 = arith.constant 0 : index
    %61 = vector.load %arg10[%c168, %c0_60] : memref<216x896xbf16, #tpu.memory_space<vmem>>, vector<8x896xbf16>
    tpu.vector_store %arg10[%c168, %c0_60], %60 {strides = array<i32>} : memref<216x896xbf16, #tpu.memory_space<vmem>>, vector<8x896xbf16>,
    %c0_61 = arith.constant 0 : index
    %c211 = arith.constant 211 : index
    %62 = vector.load %arg9[%c0_61, %c211] : memref<8x1152xbf16, #tpu.memory_space<vmem>>, vector<8x896xbf16>
    %c176 = arith.constant 176 : index
    %c0_62 = arith.constant 0 : index
    %63 = vector.load %arg10[%c176, %c0_62] : memref<216x896xbf16, #tpu.memory_space<vmem>>, vector<8x896xbf16>
    tpu.vector_store %arg10[%c176, %c0_62], %62 {strides = array<i32>} : memref<216x896xbf16, #tpu.memory_space<vmem>>, vector<8x896xbf16>,
    %c0_63 = arith.constant 0 : index
    %c212 = arith.constant 212 : index
    %64 = vector.load %arg9[%c0_63, %c212] : memref<8x1152xbf16, #tpu.memory_space<vmem>>, vector<8x896xbf16>
    %c184 = arith.constant 184 : index
    %c0_64 = arith.constant 0 : index
    %65 = vector.load %arg10[%c184, %c0_64] : memref<216x896xbf16, #tpu.memory_space<vmem>>, vector<8x896xbf16>
    tpu.vector_store %arg10[%c184, %c0_64], %64 {strides = array<i32>} : memref<216x896xbf16, #tpu.memory_space<vmem>>, vector<8x896xbf16>,
    %c0_65 = arith.constant 0 : index
    %c220 = arith.constant 220 : index
    %66 = vector.load %arg9[%c0_65, %c220] : memref<8x1152xbf16, #tpu.memory_space<vmem>>, vector<8x896xbf16>
    %c192 = arith.constant 192 : index
    %c0_66 = arith.constant 0 : index
    %67 = vector.load %arg10[%c192, %c0_66] : memref<216x896xbf16, #tpu.memory_space<vmem>>, vector<8x896xbf16>
    tpu.vector_store %arg10[%c192, %c0_66], %66 {strides = array<i32>} : memref<216x896xbf16, #tpu.memory_space<vmem>>, vector<8x896xbf16>,
    %c0_67 = arith.constant 0 : index
    %c221 = arith.constant 221 : index
    %68 = vector.load %arg9[%c0_67, %c221] : memref<8x1152xbf16, #tpu.memory_space<vmem>>, vector<8x896xbf16>
    %c200_68 = arith.constant 200 : index
    %c0_69 = arith.constant 0 : index
    %69 = vector.load %arg10[%c200_68, %c0_69] : memref<216x896xbf16, #tpu.memory_space<vmem>>, vector<8x896xbf16>
    tpu.vector_store %arg10[%c200_68, %c0_69], %68 {strides = array<i32>} : memref<216x896xbf16, #tpu.memory_space<vmem>>, vector<8x896xbf16>,
    %c0_70 = arith.constant 0 : index
    %c222 = arith.constant 222 : index
    %70 = vector.load %arg9[%c0_70, %c222] : memref<8x1152xbf16, #tpu.memory_space<vmem>>, vector<8x896xbf16>
    %c208 = arith.constant 208 : index
    %c0_71 = arith.constant 0 : index
    %71 = vector.load %arg10[%c208, %c0_71] : memref<216x896xbf16, #tpu.memory_space<vmem>>, vector<8x896xbf16>
    tpu.vector_store %arg10[%c208, %c0_71], %70 {strides = array<i32>} : memref<216x896xbf16, #tpu.memory_space<vmem>>, vector<8x896xbf16>,
    %c0_72 = arith.constant 0 : index
    %c0_73 = arith.constant 0 : index
    %72 = vector.load %arg4[%c0_72, %c0_73] : memref<16x216xbf16, #tpu.memory_space<vmem>>, vector<16x216xbf16>
    %c0_74 = arith.constant 0 : index
    %c0_75 = arith.constant 0 : index
    %73 = vector.load %arg10[%c0_74, %c0_75] : memref<216x896xbf16, #tpu.memory_space<vmem>>, vector<216x896xbf16>
    %cst_76 = arith.constant dense<0.000000e+00> : vector<16x896xf32>
    %74 = tpu.matmul %72, %73, %cst_76 {dimension_numbers = #tpu.dot_dimension_numbers<[1], [0], [0], [1], [0, 0, 1, 1], [], []>} : vector<16x216xbf16>, vector<216x896xbf16>, vector<16x896xf32> -> vector<16x896xf32>
    %c0_77 = arith.constant 0 : index
    %c0_78 = arith.constant 0 : index
    %75 = vector.load %arg5[%c0_77, %c0_78] : memref<16x1xf32, #tpu.memory_space<vmem>>, vector<16x1xf32>
    %76 = vector.broadcast %75 : vector<16x1xf32> to vector<16x896xf32>
    %77 = arith.addf %74, %76 : vector<16x896xf32>
    %78 = arith.truncf %77 : vector<16x896xf32> to vector<16x896xbf16>
    %c0_79 = arith.constant 0 : index
    %c0_80 = arith.constant 0 : index
    %c0_81 = arith.constant 0 : index
    %79 = vector.load %arg7[%c0_79, %c0_80, %c0_81] : memref<1x16x896xbf16, #tpu.memory_space<vmem>>, vector<1x16x896xbf16>
    %80 = vector.shape_cast %79 : vector<1x16x896xbf16> to vector<16x896xbf16>
    %81 = vector.shape_cast %78 : vector<16x896xbf16> to vector<1x16x896xbf16>
    tpu.vector_store %arg7[%c0_79, %c0_80, %c0_81], %81 {strides = array<i32>} : memref<1x16x896xbf16, #tpu.memory_space<vmem>>, vector<1x16x896xbf16>,
    %c0_82 = arith.constant 0 : index
    %c0_83 = arith.constant 0 : index
    %82 = vector.load %arg6[%c0_82, %c0_83] : memref<1x896xf32, #tpu.memory_space<vmem>>, vector<1x896xf32>
    %83 = vector.broadcast %82 : vector<1x896xf32> to vector<16x896xf32>
    %84 = arith.mulf %77, %83 : vector<16x896xf32>
    %cst_84 = arith.constant dense<0.000000e+00> : vector<16xf32>
    %85 = vector.multi_reduction <add>, %84, %cst_84 [1] : vector<16x896xf32> to vector<16xf32>
    %86 = vector.shape_cast %85 : vector<16xf32> to vector<16x1xf32>
    %c0_85 = arith.constant 0 : index
    %c0_86 = arith.constant 0 : index
    %c0_87 = arith.constant 0 : index
    %87 = vector.load %arg8[%c0_85, %c0_86, %c0_87] : memref<1x16x2xf32, #tpu.memory_space<vmem>>, vector<1x16x1xf32>
    %88 = vector.shape_cast %87 : vector<1x16x1xf32> to vector<16x1xf32>
    %89 = vector.shape_cast %86 : vector<16x1xf32> to vector<1x16x1xf32>
    tpu.vector_store %arg8[%c0_85, %c0_86, %c0_87], %89 {strides = array<i32>} : memref<1x16x2xf32, #tpu.memory_space<vmem>>, vector<1x16x1xf32>,
    %90 = arith.mulf %84, %77 : vector<16x896xf32>
    %cst_88 = arith.constant dense<0.000000e+00> : vector<16xf32>
    %91 = vector.multi_reduction <add>, %90, %cst_88 [1] : vector<16x896xf32> to vector<16xf32>
    %92 = vector.shape_cast %91 : vector<16xf32> to vector<16x1xf32>
    %c0_89 = arith.constant 0 : index
    %c0_90 = arith.constant 0 : index
    %c1_91 = arith.constant 1 : index
    %93 = vector.load %arg8[%c0_89, %c0_90, %c1_91] : memref<1x16x2xf32, #tpu.memory_space<vmem>>, vector<1x16x1xf32>
    %94 = vector.shape_cast %93 : vector<1x16x1xf32> to vector<16x1xf32>
    %95 = vector.shape_cast %92 : vector<16x1xf32> to vector<1x16x1xf32>
    tpu.vector_store %arg8[%c0_89, %c0_90, %c1_91], %95 {strides = array<i32>} : memref<1x16x2xf32, #tpu.memory_space<vmem>>, vector<1x16x1xf32>,
    return
  }
  func.func @transform_0(%arg0: i32) -> (i32, i32, i32) {
    %c0_i32 = arith.constant 0 : i32
    %c0_i32_0 = arith.constant 0 : i32
    %c0_i32_1 = arith.constant 0 : i32
    return %arg0, %c0_i32, %c0_i32_0 : i32, i32, i32
  }
  func.func @transform_1(%arg0: i32) -> (i32, i32) {
    %c0_i32 = arith.constant 0 : i32
    %c0_i32_0 = arith.constant 0 : i32
    %c0_i32_1 = arith.constant 0 : i32
    return %c0_i32, %c0_i32_0 : i32, i32
  }
  func.func @transform_2(%arg0: i32) -> (i32, i32) {
    %c0_i32 = arith.constant 0 : i32
    %c0_i32_0 = arith.constant 0 : i32
    %c0_i32_1 = arith.constant 0 : i32
    return %c0_i32, %c0_i32_0 : i32, i32
  }
  func.func @transform_3(%arg0: i32) -> (i32, i32) {
    %c0_i32 = arith.constant 0 : i32
    %c0_i32_0 = arith.constant 0 : i32
    %c0_i32_1 = arith.constant 0 : i32
    return %c0_i32, %c0_i32_0 : i32, i32
  }
  func.func @transform_4(%arg0: i32) -> (i32, i32) {
    %c0_i32 = arith.constant 0 : i32
    %c0_i32_0 = arith.constant 0 : i32
    %c0_i32_1 = arith.constant 0 : i32
    return %c0_i32, %c0_i32_0 : i32, i32
  }
  func.func @transform_5(%arg0: i32) -> (i32, i32) {
    %c0_i32 = arith.constant 0 : i32
    %c0_i32_0 = arith.constant 0 : i32
    %c0_i32_1 = arith.constant 0 : i32
    return %c0_i32, %c0_i32_0 : i32, i32
  }
  func.func @transform_6(%arg0: i32) -> (i32, i32, i32) {
    %c0_i32 = arith.constant 0 : i32
    %c0_i32_0 = arith.constant 0 : i32
    %c0_i32_1 = arith.constant 0 : i32
    return %arg0, %c0_i32, %c0_i32_0 : i32, i32, i32
  }
  func.func @transform_7(%arg0: i32) -> (i32, i32, i32) {
    %c0_i32 = arith.constant 0 : i32
    %c0_i32_0 = arith.constant 0 : i32
    %c0_i32_1 = arith.constant 0 : i32
    return %arg0, %c0_i32, %c0_i32_0 : i32, i32, i32
  }
}

module attributes {stable_mosaic.version = 11 : i64} {
  func.func @_bn_relu_kernel(%arg0: i32, %arg1: memref<1x16x896xbf16, #tpu.memory_space<vmem>>, %arg2: memref<16x1xf32, #tpu.memory_space<vmem>>, %arg3: memref<16x1xf32, #tpu.memory_space<vmem>>, %arg4: memref<1x16x896xf32, #tpu.memory_space<vmem>>) attributes {dimension_semantics = [#tpu.dimension_semantics<parallel>], iteration_bounds = array<i64: 2>, scalar_prefetch = 0 : i64, scratch_operands = 0 : i64, tpu.core_type = #tpu.core_type<tc>, window_params = [{transform_indices = @transform_0, window_bounds = array<i64: 1, 16, 896>}, {pipeline_mode = #tpu.pipeline_mode<synchronous>, transform_indices = @transform_1, window_bounds = array<i64: 16, 1>}, {pipeline_mode = #tpu.pipeline_mode<synchronous>, transform_indices = @transform_2, window_bounds = array<i64: 16, 1>}, {transform_indices = @transform_3, window_bounds = array<i64: 1, 16, 896>}]} {
    %c0 = arith.constant 0 : index
    %c0_0 = arith.constant 0 : index
    %c0_1 = arith.constant 0 : index
    %0 = vector.load %arg1[%c0, %c0_0, %c0_1] : memref<1x16x896xbf16, #tpu.memory_space<vmem>>, vector<1x16x896xbf16>
    %1 = vector.shape_cast %0 : vector<1x16x896xbf16> to vector<16x896xbf16>
    %2 = arith.extf %1 : vector<16x896xbf16> to vector<16x896xf32>
    %c0_2 = arith.constant 0 : index
    %c0_3 = arith.constant 0 : index
    %3 = vector.load %arg2[%c0_2, %c0_3] : memref<16x1xf32, #tpu.memory_space<vmem>>, vector<16x1xf32>
    %4 = vector.broadcast %3 : vector<16x1xf32> to vector<16x896xf32>
    %5 = arith.mulf %2, %4 : vector<16x896xf32>
    %c0_4 = arith.constant 0 : index
    %c0_5 = arith.constant 0 : index
    %6 = vector.load %arg3[%c0_4, %c0_5] : memref<16x1xf32, #tpu.memory_space<vmem>>, vector<16x1xf32>
    %7 = vector.broadcast %6 : vector<16x1xf32> to vector<16x896xf32>
    %8 = arith.addf %5, %7 : vector<16x896xf32>
    %cst = arith.constant 0.000000e+00 : f32
    %9 = vector.broadcast %cst : f32 to vector<16x896xf32>
    %10 = arith.maximumf %8, %9 : vector<16x896xf32>
    %c0_6 = arith.constant 0 : index
    %c0_7 = arith.constant 0 : index
    %c0_8 = arith.constant 0 : index
    %11 = vector.load %arg4[%c0_6, %c0_7, %c0_8] : memref<1x16x896xf32, #tpu.memory_space<vmem>>, vector<1x16x896xf32>
    %12 = vector.shape_cast %11 : vector<1x16x896xf32> to vector<16x896xf32>
    %13 = vector.shape_cast %10 : vector<16x896xf32> to vector<1x16x896xf32>
    tpu.vector_store %arg4[%c0_6, %c0_7, %c0_8], %13 {strides = array<i32>} : memref<1x16x896xf32, #tpu.memory_space<vmem>>, vector<1x16x896xf32>,
    return
  }
  func.func @transform_0(%arg0: i32) -> (i32, i32, i32) {
    %c0_i32 = arith.constant 0 : i32
    %c0_i32_0 = arith.constant 0 : i32
    %c0_i32_1 = arith.constant 0 : i32
    return %arg0, %c0_i32, %c0_i32_0 : i32, i32, i32
  }
  func.func @transform_1(%arg0: i32) -> (i32, i32) {
    %c0_i32 = arith.constant 0 : i32
    %c0_i32_0 = arith.constant 0 : i32
    %c0_i32_1 = arith.constant 0 : i32
    return %c0_i32, %c0_i32_0 : i32, i32
  }
  func.func @transform_2(%arg0: i32) -> (i32, i32) {
    %c0_i32 = arith.constant 0 : i32
    %c0_i32_0 = arith.constant 0 : i32
    %c0_i32_1 = arith.constant 0 : i32
    return %c0_i32, %c0_i32_0 : i32, i32
  }
  func.func @transform_3(%arg0: i32) -> (i32, i32, i32) {
    %c0_i32 = arith.constant 0 : i32
    %c0_i32_0 = arith.constant 0 : i32
    %c0_i32_1 = arith.constant 0 : i32
    return %arg0, %c0_i32, %c0_i32_0 : i32, i32, i32
  }
}

</mosaic_0001>

<bundles_post_ra>
// kernel: encoder_conv3d_block.5
= control target key start
LH: loop header
LB: loop body
LE: loop exit
PB: predicated region body
PF: predicated region fallthrough
CT: control target
= control target key end

     0   :  { %s379_s12 = smov 0   ;;  %s428_s0 = inlined_call_operand.vmem [shape: bf16[2,16,896], index: 0, kind: input, shape index: {}]   ;;  %s429_s1 = inlined_call_operand.vmem [shape: f32[16,1], index: 1, kind: input, shape index: {}]   ;;  %s430_s2 = inlined_call_operand.vmem [shape: f32[16,1], index: 2, kind: input, shape index: {}]   ;;  %s431_s3 = inlined_call_operand.vmem [shape: f32[2,16,896], index: 3, kind: output, shape index: {}]  }
   0x1 LB: > { %s328_s13 = sadd.s32 4294967295, %s356_s12   ;;  %p332_p0 = scmp.ge.s32.totalorder %s356_s12, 1  ;;  %s356_s12 = sphi %s379_s12, %s13_s12  }
   0x2   : > { %p137_p1 = scmp.lt.s32.totalorder %s356_s12, 3 }
   0x4   : > { %p138_p2 = pnand %p332_p0, %p137_p1 }
   0x5   : > { %v219_v0 = vld [vmem:[%s430_s2] sm:$0xff] (!%p138_p2)  ;;  %v358_v2 = vmov (!%p138_p2), 0   ;;  %v220_v3 = vld [vmem:[%s430_s2 + $0x8] sm:$0xff] (!%p138_p2)  ;;  %p161_p3 = scmp.lt.s32.totalorder (!%p138_p2), %s328_s13, 1 }
   0x6   : > { %141 = sbr.rel (%p138_p2) target bundleno = 151 (0x97), region = 32  ;;  %v193_v1 = vld [vmem:[%s429_s1] sm:$0xff] (!%p138_p2)  ;;  %349 = vset.pattern.permute.xlu1 (!%p138_p2), %v358_v2  ;;  %348 = vset.pattern.permute.xlu0 (!%p138_p2), %v358_v2  ;;  %v194_v4 = vld [vmem:[%s429_s1 + $0x8] sm:$0xff] (!%p138_p2) }
   0x7   : > { %223 = vperm.xlu1 (!%p138_p2), %349, %v219_v0   ;;  %197 = vperm.xlu0 (!%p138_p2), %348, %v193_v1  }
   0xb   : > { %228 = vperm.xlu1 (!%p138_p2), %349, %v220_v3   ;;  %202 = vperm.xlu0 (!%p138_p2), %348, %v194_v4  }
   0xd   : > { %s433_s13 = smov (!%p161_p3, %s328_s13), 1 }
   0xe   : > { %s337_s22 = smul.u32 56, %s433_s13 }
   0xf   : > { %s338_s26 = smul.u32 112, %s433_s13 }
  0x10   : > { %s165_s25 = scalar_lea.vmem %s428_s0, %s337_s22 }
  0x11   : > { %v171_v5 = vld [vmem:[%s165_s25] sm:$0xff]  ;;  %v172_v6 = vld [vmem:[%s165_s25 + $0x8] sm:$0xff]  ;;  %v173_v7 = vld [vmem:[%s165_s25 + $0x10] sm:$0xff]  ;;  %s409_s29 = scalar_lea.vmem %s431_s3, %s338_s26 }
  0x12   : > { %v174_v8 = vld [vmem:[%s165_s25 + $0x18] ss:$28 sps:$4 sm:$0xff]   ;;  %v175_v9 = vld [vmem:[%s165_s25 + $0x1c] sm:$0xff]  ;;  %v179_v10 = vunpack.c.l.bf16 %v171_v5  ;;  %v180_v11 = vunpack.c.h.bf16 %v171_v5  ;;  %v181_v12 = vunpack.c.l.bf16 %v172_v6  ;;  %v182_v13 = vunpack.c.h.bf16 %v172_v6  ;;  %v176_v14 = vld [vmem:[%s165_s25 + $0x24] sm:$0xff] }
  0x13   : > { %v177_v15 = vld [vmem:[%s165_s25 + $0x2c] sm:$0xff]  ;;  %v183_v16 = vunpack.c.l.bf16 %v173_v7  ;;  %v184_v17 = vunpack.c.h.bf16 %v173_v7  ;;  %v185_v18 = vunpack.c.l.bf16 %v174_v8  ;;  %v186_v19 = vunpack.c.l.bf16 %v175_v9 }
  0x14   : > { %v187_v21 = vunpack.c.h.bf16 %v175_v9  ;;  %v188_v22 = vunpack.c.l.bf16 %v176_v14  ;;  %v189_v23 = vunpack.c.h.bf16 %v176_v14  ;;  %v190_v24 = vunpack.c.l.bf16 %v177_v15 }
  0x15   : > { %v191_v33 = vunpack.c.h.bf16 %v177_v15  ;;  %v192_v42 = vunpack.c.h.bf16 %v174_v8 }
  0x86   : > { %v198_v20 = vpop.permute.xlu0 %197  ;;  %v224_v25 = vpop.permute.xlu1 %223 }
  0x87   : > { %v205_v26 = vmul.f32 %v198_v20, %v179_v10  ;;  %v206_v27 = vmul.f32 %v198_v20, %v180_v11  ;;  %v207_v28 = vmul.f32 %v198_v20, %v181_v12  ;;  %v208_v29 = vmul.f32 %v198_v20, %v182_v13 }
  0x88   : > { %v209_v30 = vmul.f32 %v198_v20, %v183_v16  ;;  %v210_v31 = vmul.f32 %v198_v20, %v184_v17  ;;  %v211_v32 = vmul.f32 %v198_v20, %v185_v18 }
  0x89   : > { %v231_v34 = vadd.f32 %v224_v25, %v205_v26  ;;  %v232_v35 = vadd.f32 %v224_v25, %v206_v27  ;;  %v233_v36 = vadd.f32 %v224_v25, %v207_v28  ;;  %v234_v37 = vadd.f32 %v224_v25, %v208_v29 }
  0x8a   : > { %v235_v38 = vadd.f32 %v224_v25, %v209_v30  ;;  %v236_v39 = vadd.f32 %v224_v25, %v210_v31  ;;  %v237_v40 = vadd.f32 %v224_v25, %v211_v32  ;;  %v203_v41 = vpop.permute.xlu0 %202  ;;  %v229_v51 = vpop.permute.xlu1 %228 }
  0x8b   : > { %v245_v43 = vmax.f32 %v231_v34, 0.0  ;;  %v246_v44 = vmax.f32 %v232_v35, 0.0  ;;  %v247_v45 = vmax.f32 %v233_v36, 0.0  ;;  %v248_v46 = vmax.f32 %v234_v37, 0.0 }
  0x8c   : > { %v249_v47 = vmax.f32 %v235_v38, 0.0  ;;  %v250_v48 = vmax.f32 %v236_v39, 0.0  ;;  %v251_v49 = vmax.f32 %v237_v40, 0.0  ;;  %v212_v50 = vmul.f32 %v203_v41, %v186_v19 }
  0x8d   : > { %259 = vst [vmem:[%s409_s29] sm:$0xff] %v245_v43  ;;  %260 = vst [vmem:[%s409_s29 + $0x8] sm:$0xff] %v246_v44  ;;  %v213_v52 = vmul.f32 %v203_v41, %v187_v21  ;;  %v214_v53 = vmul.f32 %v203_v41, %v188_v22  ;;  %v215_v54 = vmul.f32 %v203_v41, %v189_v23 }
  0x8e   : > { %261 = vst [vmem:[%s409_s29 + $0x10] sm:$0xff] %v247_v45  ;;  %262 = vst [vmem:[%s409_s29 + $0x18] sm:$0xff] %v248_v46  ;;  %v216_v55 = vmul.f32 %v203_v41, %v190_v24  ;;  %v217_v56 = vmul.f32 %v203_v41, %v191_v33  ;;  %v218_v57 = vmul.f32 %v203_v41, %v192_v42 }
  0x8f   : > { %263 = vst [vmem:[%s409_s29 + $0x20] sm:$0xff] %v249_v47  ;;  %264 = vst [vmem:[%s409_s29 + $0x28] sm:$0xff] %v250_v48  ;;  %v238_v58 = vadd.f32 %v229_v51, %v212_v50  ;;  %v239_v59 = vadd.f32 %v229_v51, %v213_v52  ;;  %v240_v60 = vadd.f32 %v229_v51, %v214_v53 }
  0x90   : > { %265 = vst [vmem:[%s409_s29 + $0x30] sm:$0xff] %v251_v49  ;;  %v241_v61 = vadd.f32 %v229_v51, %v215_v54  ;;  %v242_v62 = vadd.f32 %v229_v51, %v216_v55  ;;  %v243_v63 = vadd.f32 %v229_v51, %v217_v56  ;;  %v244_v0 = vadd.f32 %v229_v51, %v218_v57 }
  0x91   : > { %v252_v1 = vmax.f32 %v238_v58, 0.0  ;;  %v253_v2 = vmax.f32 %v239_v59, 0.0  ;;  %v254_v3 = vmax.f32 %v240_v60, 0.0 }
  0x92   : > { %v255_v4 = vmax.f32 %v241_v61, 0.0  ;;  %v256_v5 = vmax.f32 %v242_v62, 0.0  ;;  %v257_v6 = vmax.f32 %v243_v63, 0.0  ;;  %v258_v7 = vmax.f32 %v244_v0, 0.0 }
  0x93   : > { %266 = vst [vmem:[%s409_s29 + $0x38] sm:$0xff] %v252_v1  ;;  %267 = vst [vmem:[%s409_s29 + $0x40] sm:$0xff] %v253_v2 }
  0x94   : > { %268 = vst [vmem:[%s409_s29 + $0x48] sm:$0xff] %v254_v3  ;;  %269 = vst [vmem:[%s409_s29 + $0x50] sm:$0xff] %v255_v4 }
  0x95   : > { %270 = vst [vmem:[%s409_s29 + $0x58] sm:$0xff] %v256_v5  ;;  %271 = vst [vmem:[%s409_s29 + $0x60] sm:$0xff] %v257_v6 }
  0x96   : > { %272 = vst [vmem:[%s409_s29 + $0x68] sm:$0xff] %v258_v7 }
  0x97 PF: > { %s13_s12 = sadd.s32 1, %s356_s12  }
  0x98   : > { %p10_p4 = scmp.ge.s32.totalorder %s13_s12, 4  }
  0x9a   :  { %12 = sbr.rel (!%p10_p4) target bundleno = 1 (0x1), region = 62 }

// kernel: encoder_conv3d_block.3
= control target key start
LH: loop header
LB: loop body
LE: loop exit
PB: predicated region body
PF: predicated region fallthrough
CT: control target
= control target key end

     0   :  { %s2870_s18 = smov 0   ;;  %s3589_s0 = inlined_call_operand.vmem [shape: bf16[2,4,1152], index: 0, kind: input, shape index: {}]   ;;  %s3590_s1 = inlined_call_operand.vmem [shape: bf16[8,108], index: 1, kind: input, shape index: {}]   ;;  %s3591_s2 = inlined_call_operand.vmem [shape: f32[8,1], index: 2, kind: input, shape index: {}]   ;;  %s3592_s3 = inlined_call_operand.vmem [shape: f32[1,896], index: 3, kind: input, shape index: {}]   ;;  %s3593_s4 = inlined_call_operand.vmem [shape: bf16[2,8,896], index: 4, kind: output, shape index: {0}]   ;;  %s3594_s5 = inlined_call_operand.vmem [shape: f32[2,8,2], index: 5, kind: output, shape index: {1}]  }
   0x1 LB: > { %s2579_s19 = sadd.s32 4294967295, %s2808_s18   ;;  %p2583_p0 = scmp.ge.s32.totalorder %s2808_s18, 1  ;;  %s2808_s18 = sphi %s2870_s18, %s16_s18  }
   0x2   : > { %p190_p1 = scmp.lt.s32.totalorder %s2808_s18, 3 }
   0x4   : > { %p191_p2 = pnand %p2583_p0, %p190_p1 }
   0x5   : > { %p222_p3 = scmp.lt.s32.totalorder (!%p191_p2), %s2579_s19, 1  ;;  %v287_v0 = vlaneseq (!%p191_p2)  ;;  %v2810_v1 = vmov (!%p191_p2), 1983009808   ;;  %s2811_s24 = smov (!%p191_p2), 126   ;;  %vm325_vm0 = vcmask (!%p191_p2), 1043456   ;;  %vm327_vm1 = vcmask (!%p191_p2), 1039360  }
   0x6   : > { %194 = sbr.rel (%p191_p2) target bundleno = 724 (0x2d4), region = 36  ;;  %v285_v2 = vunpack.c.l.s4 (!%p191_p2), %v2810_v1  ;;  %s2812_s25 = smov (!%p191_p2), 127   ;;  %vm451_vm2 = vcmask (!%p191_p2), 965632   ;;  %vm389_vm3 = vcmask (!%p191_p2), 1031168   ;;  %vm513_vm4 = vcmask (!%p191_p2), 957440  }
   0x7   : > { %v2880_v3 = vshrl.u32 (!%p191_p2), %v287_v0, 7  ;;  %s2813_s26 = smov (!%p191_p2), 118   ;;  %s2814_s27 = smov (!%p191_p2), 117   ;;  %vm575_vm5 = vcmask (!%p191_p2), 949248   ;;  %vm637_vm6 = vcmask (!%p191_p2), 883712   ;;  %vm699_vm7 = vcmask (!%p191_p2), 875520  }
   0x8   : > { %v286_v4 = vunpack.c.0.s8 (!%p191_p2), %v285_v2  ;;  %s2815_s28 = smov (!%p191_p2), 116   ;;  %s2816_s29 = smov (!%p191_p2), 108   ;;  %vm761_vm8 = vcmask (!%p191_p2), 867328   ;;  %vm823_vm9 = vcmask (!%p191_p2), 228352   ;;  %vm885_vm10 = vcmask (!%p191_p2), 220160  }
   0x9   : > { %s2817_s30 = smov (!%p191_p2), 107   ;;  %s2818_s6 = smov (!%p191_p2), 106   ;;  %vm3601_vm11 = vcmask (!%p191_p2), 211968   ;;  %vm1009_vm12 = vcmask (!%p191_p2), 146432   ;;  %vm3598_vm13 = vcmask (!%p191_p2), 138240   ;;  %vm3600_vm14 = vcmask (!%p191_p2), 130048  }
   0xa   : > { %v2884_v5 = vsub.s32 (!%p191_p2), %v286_v4, %v2880_v3  ;;  %s2819_s7 = smov (!%p191_p2), 28   ;;  %s2820_s8 = smov (!%p191_p2), 27   ;;  %vm3599_vm15 = vcmask (!%p191_p2), 64512  }
   0xb   : > { %s2821_s9 = smov (!%p191_p2), 26   ;;  %s2822_s10 = smov (!%p191_p2), 18  }
   0xc   : > { %s2823_s11 = smov (!%p191_p2), 17   ;;  %s2824_s12 = smov (!%p191_p2), 16  }
   0xd   : > { %s3643_s19 = smov (!%p222_p3, %s2579_s19), 1  ;;  %s2825_s13 = smov 8  }
   0xe   : > { %s2683_s20 = smul.u32 18, %s3643_s19  ;;  %s2826_s14 = smov 7  }
   0xf   : > { %s2827_s15 = smov 6   ;;  %s2828_s16 = smov 56  }
  0x10   : > { %s2889_s23 = scalar_lea.vmem %s3589_s0, %s2683_s20  ;;  %s3595_s17 = smov 55  }
  0x11   : > { %v342_v6 = vld [vmem:[%s2889_s23] sm:$0xff]  ;;  %v2903_v11 = vld [vmem:[%s2889_s23 + $0x8] sm:$0xff]  ;;  %s3596_s20 = smov 54   ;;  %s3597_s21 = smov 46  }
  0x12   : > { %v2893_v7 = vrot.slane %v342_v6, %v2884_v5  ;;  %v346_v8 = vcombine.high %v342_v6, %v342_v6  ;;  %v283_v9 = vcombine.low %v342_v6, %v342_v6  ;;  %2587 = vst.sshfl [vmem:[#allocation2] sm:$0xf pattern:$0x76325410] %v342_v6  ;;  %v2911_v12 = vrot.slane %v2903_v11, %v2884_v5  ;;  %v1334_v16 = vld [vmem:[%s2889_s23 + $0x2] sm:$0xff]  ;;  %v3018_v22 = vld [vmem:[%s2889_s23 + $0xa] sm:$0xff] }
  0x13   : > { %v298_v13 = vcombine.low %v2903_v11, %v2903_v11  ;;  %v3001_v17 = vrot.slane %v1334_v16, %v2884_v5  ;;  %v1400_v18 = vcombine.low %v1334_v16, %v1334_v16  ;;  %v1338_v19 = vcombine.high %v1334_v16, %v1334_v16  ;;  %s2832_s22 = smov 45   ;;  %v238_v61 = vld [vmem:[%s2889_s23 + $0x8] sm:$0x3f]  ;;  %s2836_s23 = smov 34  }
  0x14   : > { %376 = vrot.lane.b32.xlu1 %v2893_v7, %s2811_s24  ;;  %315 = vrot.lane.b32.xlu0 %v2893_v7, %s2812_s25  ;;  %v2900_v10 = vrot.slane %v283_v9, %v2884_v5  ;;  %2588 = vst.sshfl [vmem:[#allocation2 + $0x8] sm:$0xf pattern:$0x76325410] %v346_v8  ;;  %v360_v14 = vrot.slane %v346_v8, %v2884_v5 }
  0x15   : > { %v2921_v15 = vrot.slane %v298_v13, %v2884_v5  ;;  %v3008_v20 = vrot.slane %v1400_v18, %v2884_v5  ;;  %v3011_v21 = vrot.slane %v1338_v19, %v2884_v5  ;;  %v3026_v23 = vrot.slane %v3018_v22, %v2884_v5  ;;  %2589 = vst.sshfl [vmem:[#allocation2 + $0x10] sm:$0xf pattern:$0x76325410] %v238_v61 }
  0x16   : > { %v1415_v24 = vcombine.low %v3018_v22, %v3018_v22  ;;  %v256_v63 = vcombine.high %v238_v61, %v238_v61 }
  0x18   : > { %440 = vrot.lane.b32.xlu1 %v2893_v7, %s2813_s26  ;;  %313 = vrot.lane.b32.xlu0 %v2900_v10, %s2812_s25  ;;  %v3035_v25 = vrot.slane %v1415_v24, %v2884_v5  ;;  %2590 = vst.sshfl [vmem:[#allocation2 + $0x18] sm:$0x3 pattern:$0x76325410] %v256_v63 }
  0x1c   : > { %380 = vrot.lane.b32.xlu1 %v2911_v12, %s2811_s24  ;;  %438 = vrot.lane.b32.xlu0 %v2900_v10, %s2813_s26 }
  0x20   : > { %378 = vrot.lane.b32.xlu1 %v360_v14, %s2811_s24  ;;  %317 = vrot.lane.b32.xlu0 %v2921_v15, %s2812_s25 }
  0x24   : > { %500 = vrot.lane.b32.xlu1 %v2893_v7, %s2814_s27  ;;  %442 = vrot.lane.b32.xlu0 %v2921_v15, %s2813_s26 }
  0x28   : > { %562 = vrot.lane.b32.xlu1 %v2900_v10, %s2815_s28  ;;  %502 = vrot.lane.b32.xlu0 %v360_v14, %s2814_s27 }
  0x2c   : > { %624 = vrot.lane.b32.xlu1 %v2893_v7, %s2816_s29  ;;  %564 = vrot.lane.b32.xlu0 %v2893_v7, %s2815_s28 }
  0x30   : > { %686 = vrot.lane.b32.xlu1 %v2900_v10, %s2817_s30  ;;  %626 = vrot.lane.b32.xlu0 %v360_v14, %s2816_s29 }
  0x34   : > { %504 = vrot.lane.b32.xlu1 %v2911_v12, %s2814_s27  ;;  %688 = vrot.lane.b32.xlu0 %v2893_v7, %s2817_s30 }
  0x38   : > { %628 = vrot.lane.b32.xlu1 %v2911_v12, %s2816_s29  ;;  %566 = vrot.lane.b32.xlu0 %v2921_v15, %s2815_s28 }
  0x3c   : > { %748 = vrot.lane.b32.xlu1 %v2893_v7, %s2818_s6  ;;  %690 = vrot.lane.b32.xlu0 %v2921_v15, %s2817_s30 }
  0x40   : > { %810 = vrot.lane.b32.xlu1 %v2900_v10, %s2819_s7  ;;  %750 = vrot.lane.b32.xlu0 %v360_v14, %s2818_s6 }
  0x44   : > { %872 = vrot.lane.b32.xlu1 %v2893_v7, %s2820_s8  ;;  %812 = vrot.lane.b32.xlu0 %v2893_v7, %s2819_s7 }
  0x48   : > { %934 = vrot.lane.b32.xlu1 %v2900_v10, %s2821_s9  ;;  %874 = vrot.lane.b32.xlu0 %v360_v14, %s2820_s8 }
  0x4c   : > { %752 = vrot.lane.b32.xlu1 %v2911_v12, %s2818_s6  ;;  %936 = vrot.lane.b32.xlu0 %v2893_v7, %s2821_s9 }
  0x50   : > { %876 = vrot.lane.b32.xlu1 %v2911_v12, %s2820_s8  ;;  %814 = vrot.lane.b32.xlu0 %v2921_v15, %s2819_s7 }
  0x54   : > { %996 = vrot.lane.b32.xlu1 %v2893_v7, %s2822_s10  ;;  %938 = vrot.lane.b32.xlu0 %v2921_v15, %s2821_s9 }
  0x58   : > { %1058 = vrot.lane.b32.xlu1 %v2900_v10, %s2823_s11  ;;  %998 = vrot.lane.b32.xlu0 %v360_v14, %s2822_s10 }
  0x5c   : > { %1120 = vrot.lane.b32.xlu1 %v2893_v7, %s2824_s12  ;;  %1060 = vrot.lane.b32.xlu0 %v2893_v7, %s2823_s11 }
  0x60   : > { %1182 = vrot.lane.b32.xlu1 %v2900_v10, %s2825_s13  ;;  %1122 = vrot.lane.b32.xlu0 %v360_v14, %s2824_s12 }
  0x64   : > { %1000 = vrot.lane.b32.xlu1 %v2911_v12, %s2822_s10  ;;  %1184 = vrot.lane.b32.xlu0 %v2893_v7, %s2825_s13 }
  0x68   : > { %1124 = vrot.lane.b32.xlu1 %v2911_v12, %s2824_s12  ;;  %1062 = vrot.lane.b32.xlu0 %v2921_v15, %s2823_s11 }
  0x6c   : > { %1244 = vrot.lane.b32.xlu1 %v2893_v7, %s2826_s14  ;;  %1186 = vrot.lane.b32.xlu0 %v2921_v15, %s2825_s13 }
  0x70   : > { %1306 = vrot.lane.b32.xlu1 %v2900_v10, %s2827_s15  ;;  %1246 = vrot.lane.b32.xlu0 %v360_v14, %s2826_s14 }
  0x74   : > { %1368 = vrot.lane.b32.xlu1 %v3001_v17, %s2828_s16  ;;  %1308 = vrot.lane.b32.xlu0 %v2893_v7, %s2827_s15 }
  0x78   : > { %1430 = vrot.lane.b32.xlu1 %v3008_v20, %s3595_s17  ;;  %1370 = vrot.lane.b32.xlu0 %v3011_v21, %s2828_s16 }
  0x7c   : > { %1248 = vrot.lane.b32.xlu1 %v2911_v12, %s2826_s14  ;;  %1432 = vrot.lane.b32.xlu0 %v3001_v17, %s3595_s17 }
  0x80   : > { %1372 = vrot.lane.b32.xlu1 %v3026_v23, %s2828_s16  ;;  %1310 = vrot.lane.b32.xlu0 %v2921_v15, %s2827_s15 }
  0x84   : > { %1492 = vrot.lane.b32.xlu1 %v3001_v17, %s3596_s20  ;;  %1434 = vrot.lane.b32.xlu0 %v3035_v25, %s3595_s17  ;;  %s2833_s17 = smov 44  }
  0x86   : > { %v377_v26 = vpop.permute.xlu1 %376  ;;  %v316_v27 = vpop.permute.xlu0 %315 }
  0x87   : > { %v322_v30 = vrot.slane %v316_v27, 4  ;;  %v384_v42 = vrot.slane %v377_v26, 4 }
  0x88   : > { %1554 = vrot.lane.b32.xlu1 %v3008_v20, %s3597_s21  ;;  %1494 = vrot.lane.b32.xlu0 %v3011_v21, %s3596_s20 }
  0x8a   : > { %v441_v28 = vpop.permute.xlu1 %440  ;;  %v314_v29 = vpop.permute.xlu0 %313 }
  0x8b   : > { %v321_v31 = vrot.slane %v314_v29, 4  ;;  %v447_v36 = vrot.slane %v441_v28, 4 }
  0x8c   : > { %1616 = vrot.lane.b32.xlu1 %v3001_v17, %s2832_s22  ;;  %1556 = vrot.lane.b32.xlu0 %v3001_v17, %s3597_s21 }
  0x8d   : > { %v326_v32 = vsel %vm325_vm0, %v321_v31, %v322_v30 }
  0x8e   : > { %v328_v33 = vsel %vm327_vm1, %v314_v29, %v326_v32  ;;  %v3051_v34 = vpop.permute.xlu1 %380  ;;  %v439_v35 = vpop.permute.xlu0 %438 }
  0x8f   : > { %338 = vst [vmem:[#allocation2] sm:$0xcc] %v328_v33  ;;  %v446_v37 = vrot.slane %v439_v35, 4  ;;  %v386_v43 = vrot.slane %v3051_v34, 4 }
  0x90   : > { %1678 = vrot.lane.b32.xlu1 %v3008_v20, %s2833_s17  ;;  %1618 = vrot.lane.b32.xlu0 %v3011_v21, %s2832_s22 }
  0x91   : > { %v450_v38 = vsel %vm325_vm0, %v446_v37, %v447_v36 }
  0x92   : > { %v452_v39 = vsel %vm451_vm2, %v439_v35, %v450_v38  ;;  %v379_v40 = vpop.permute.xlu1 %378  ;;  %v3059_v41 = vpop.permute.xlu0 %317 }
  0x93   : > { %462 = vst [vmem:[#allocation2 + $0x1c] sm:$0xcc] %v452_v39  ;;  %v385_v44 = vrot.slane %v379_v40, 4  ;;  %v323_v45 = vrot.slane %v3059_v41, 4 }
  0x94   : > { %1496 = vrot.lane.b32.xlu1 %v3026_v23, %s3596_s20  ;;  %1680 = vrot.lane.b32.xlu0 %v3001_v17, %s2833_s17  ;;  %s2834_s20 = smov 36  }
  0x95   : > { %v388_v46 = vsel %vm325_vm0, %v384_v42, %v385_v44  ;;  %v391_v47 = vsel %vm325_vm0, %v385_v44, %v386_v43  ;;  %v329_v48 = vsel %vm325_vm0, %v322_v30, %v323_v45  ;;  %v2837_v42 = vmov 0  }
  0x96   : > { %v390_v49 = vsel %vm389_vm3, %v377_v26, %v388_v46  ;;  %v392_v50 = vsel %vm389_vm3, %v379_v40, %v391_v47  ;;  %v330_v51 = vsel %vm327_vm1, %v316_v27, %v329_v48  ;;  %v501_v52 = vpop.permute.xlu1 %500  ;;  %v3077_v53 = vpop.permute.xlu0 %442  ;;  %2258 = vmatprep.mubr.bf16.mxu0 %v2837_v42  ;;  %2299 = vmatprep.mubr.bf16.mxu1 %v2837_v42 }
  0x97   : > { %400 = vst [vmem:[#allocation2 + $0x1c] sm:$0x33] %v390_v49  ;;  %401 = vst [vmem:[#allocation2 + $0x24] sm:$0x33] %v392_v50  ;;  %v448_v54 = vrot.slane %v3077_v53, 4  ;;  %v508_v59 = vrot.slane %v501_v52, 4  ;;  %2723 = vset.pattern.permute.xlu0 %v2837_v42 }
  0x98   : > { %339 = vst [vmem:[#allocation2 + $0x8] sm:$0xcc] %v330_v51  ;;  %1620 = vrot.lane.b32.xlu1 %v3026_v23, %s2832_s22  ;;  %1558 = vrot.lane.b32.xlu0 %v3035_v25, %s3597_s21  ;;  %s2835_s21 = smov 35  }
  0x99   : > { %v453_v55 = vsel %vm325_vm0, %v447_v36, %v448_v54 }
  0x9a   : > { %v454_v56 = vsel %vm451_vm2, %v441_v28, %v453_v55  ;;  %v563_v57 = vpop.permute.xlu1 %562  ;;  %v503_v58 = vpop.permute.xlu0 %502 }
  0x9b   : > { %463 = vst [vmem:[#allocation2 + $0x24] sm:$0xcc] %v454_v56  ;;  %v509_v60 = vrot.slane %v503_v58, 4  ;;  %v570_v7 = vrot.slane %v563_v57, 4 }
  0x9c   : > { %1740 = vrot.lane.b32.xlu1 %v3001_v17, %s2834_s20  ;;  %1682 = vrot.lane.b32.xlu0 %v3035_v25, %s2833_s17 }
  0x9d   : > { %v512_v62 = vsel %vm325_vm0, %v508_v59, %v509_v60 }
  0x9e   : > { %v514_v0 = vsel %vm513_vm4, %v501_v52, %v512_v62  ;;  %v625_v1 = vpop.permute.xlu1 %624  ;;  %v565_v2 = vpop.permute.xlu0 %564  ;;  %v2731_v4 = vld [vmem:[#allocation2 + $0x4] ss:$28 sps:$4 sm:$0xff]  }
  0x9f   : > { %v2733_v6 = vld [vmem:[#allocation2] ss:$28 sps:$4 sm:$0xff]   ;;  %524 = vst [vmem:[#allocation2 + $0x38] sm:$0x33] %v514_v0  ;;  %v571_v8 = vrot.slane %v565_v2, 4  ;;  %2226 = vmatprep.subr.bf16.mxu0 %v2731_v4  ;;  %v632_v18 = vrot.slane %v625_v1, 4 }
  0xa0   : > { %1802 = vrot.lane.b32.xlu1 %v3008_v20, %s2835_s21  ;;  %1742 = vrot.lane.b32.xlu0 %v3011_v21, %s2834_s20  ;;  %v361_v20 = vcombine.high %v2903_v11, %v2903_v11 }
  0xa1   : > { %v574_v9 = vsel %vm325_vm0, %v570_v7, %v571_v8  ;;  %2227 = vmatpush1.bf16.msra.mxu0 %v2733_v6 }
  0xa2   : > { %v576_v10 = vsel %vm575_vm5, %v563_v57, %v574_v9  ;;  %v687_v13 = vpop.permute.xlu1 %686  ;;  %v627_v14 = vpop.permute.xlu0 %626  ;;  %v2734_v15 = vld [vmem:[#allocation2 + $0xc] ss:$28 sps:$4 sm:$0xff]   ;;  %v3117_v11 = vrot.slane %v361_v20, %v2884_v5 }
  0xa3   : > { %v2736_v16 = vld [vmem:[#allocation2 + $0x8] ss:$28 sps:$4 sm:$0xff]   ;;  %586 = vst [vmem:[#allocation2 + $0x38] sm:$0xcc] %v576_v10  ;;  %v633_v19 = vrot.slane %v627_v14, 4  ;;  %2267 = vmatprep.subr.bf16.mxu1 %v2734_v15  ;;  %v694_v29 = vrot.slane %v687_v13, 4 }
  0xa4   : > { %1864 = vrot.lane.b32.xlu1 %v3001_v17, %s2836_s23  ;;  %1804 = vrot.lane.b32.xlu0 %v3001_v17, %s2835_s21 }
  0xa5   : > { %v636_v24 = vsel %vm325_vm0, %v632_v18, %v633_v19  ;;  %2268 = vmatpush1.bf16.msra.mxu1 %v2736_v16 }
  0xa6   : > { %v638_v26 = vsel %vm637_vm6, %v625_v1, %v636_v24  ;;  %v3109_v27 = vpop.permute.xlu1 %504  ;;  %v689_v28 = vpop.permute.xlu0 %688 }
  0xa7   : > { %648 = vst [vmem:[#allocation2 + $0x54] sm:$0x33] %v638_v26  ;;  %v510_v30 = vrot.slane %v3109_v27, 4  ;;  %v695_v31 = vrot.slane %v689_v28, 4 }
  0xa8   : > { %319 = vrot.lane.b32.xlu1 %v2911_v12, %s2812_s25  ;;  %1866 = vrot.lane.b32.xlu0 %v3011_v21, %s2836_s23  ;;  %s3614_s25 = smov 55  }
  0xa9   : > { %v515_v17 = vsel %vm325_vm0, %v509_v60, %v510_v30  ;;  %v698_v32 = vsel %vm325_vm0, %v694_v29, %v695_v31 }
  0xaa   : > { %v516_v33 = vsel %vm513_vm4, %v503_v58, %v515_v17  ;;  %v700_v35 = vsel %vm699_vm7, %v687_v13, %v698_v32  ;;  %v3125_v36 = vpop.permute.xlu1 %628  ;;  %v3127_v37 = vpop.permute.xlu0 %566 }
  0xab   : > { %525 = vst [vmem:[#allocation2 + $0x40] sm:$0x33] %v516_v33  ;;  %710 = vst [vmem:[#allocation2 + $0x54] sm:$0xcc] %v700_v35  ;;  %v634_v21 = vrot.slane %v3125_v36, 4  ;;  %v572_v38 = vrot.slane %v3127_v37, 4 }
  0xac   : > { %444 = vrot.lane.b32.xlu1 %v2911_v12, %s2813_s26  ;;  %382 = vrot.lane.b32.xlu0 %v3117_v11, %s2811_s24  ;;  %s3613_s24 = smov 54   ;;  %s3615_s26 = smov 46  }
  0xad   : > { %v639_v39 = vsel %vm325_vm0, %v633_v19, %v634_v21  ;;  %v577_v40 = vsel %vm325_vm0, %v571_v8, %v572_v38 }
  0xae   : > { %v640_v44 = vsel %vm637_vm6, %v627_v14, %v639_v39  ;;  %v578_v46 = vsel %vm575_vm5, %v565_v2, %v577_v40  ;;  %v749_v47 = vpop.permute.xlu1 %748  ;;  %v3145_v48 = vpop.permute.xlu0 %690 }
  0xaf   : > { %649 = vst [vmem:[#allocation2 + $0x5c] sm:$0x33] %v640_v44  ;;  %587 = vst [vmem:[#allocation2 + $0x40] sm:$0xcc] %v578_v46  ;;  %v696_v49 = vrot.slane %v3145_v48, 4  ;;  %v756_v58 = vrot.slane %v749_v47, 4 }
  0xb0   : > { %1806 = vrot.lane.b32.xlu1 %v3035_v25, %s2835_s21  ;;  %1744 = vrot.lane.b32.xlu0 %v3026_v23, %s2834_s20 }
  0xb1   : > { %v701_v50 = vsel %vm325_vm0, %v695_v31, %v696_v49 }
  0xb2   : > { %v702_v51 = vsel %vm699_vm7, %v689_v28, %v701_v50  ;;  %v811_v52 = vpop.permute.xlu1 %810  ;;  %v751_v55 = vpop.permute.xlu0 %750  ;;  %v2737_v56 = vld [vmem:[#allocation2 + $0x3c] ss:$28 sps:$4 sm:$0xff]  }
  0xb3   : > { %v2739_v57 = vld [vmem:[#allocation2 + $0x38] ss:$28 sps:$4 sm:$0xff]   ;;  %711 = vst [vmem:[#allocation2 + $0x5c] sm:$0xcc] %v702_v51  ;;  %v757_v59 = vrot.slane %v751_v55, 4  ;;  %2228 = vmatprep.subr.bf16.mxu0 %v2737_v56  ;;  %v818_v63 = vrot.slane %v811_v52, 4  ;;  %v1601_v51 = vcombine.high %v3018_v22, %v3018_v22 }
  0xb4   : > { %506 = vrot.lane.b32.xlu1 %v3117_v11, %s2814_s27  ;;  %1868 = vrot.lane.b32.xlu0 %v3026_v23, %s2836_s23 }
  0xb5   : > { %v760_v25 = vsel %vm325_vm0, %v756_v58, %v757_v59  ;;  %2229 = vmatpush1.bf16.msra.mxu0 %v2739_v57 }
  0xb6   : > { %v762_v60 = vsel %vm761_vm8, %v749_v47, %v760_v25  ;;  %v873_v61 = vpop.permute.xlu1 %872  ;;  %v813_v62 = vpop.permute.xlu0 %812 }
  0xb7   : > { %772 = vst [vmem:[#allocation2 + $0x70] sm:$0x33] %v762_v60  ;;  %v819_v0 = vrot.slane %v813_v62, 4  ;;  %v880_v9 = vrot.slane %v873_v61, 4  ;;  %v1367_v60 = vrot.slane %v1601_v51, %v2884_v5 }
  0xb8   : > { %630 = vrot.lane.b32.xlu1 %v3117_v11, %s2816_s29  ;;  %568 = vrot.lane.b32.xlu0 %v2911_v12, %s2815_s28 }
  0xb9   : > { %v822_v1 = vsel %vm325_vm0, %v818_v63, %v819_v0 }
  0xba   : > { %v824_v2 = vsel %vm823_vm9, %v811_v52, %v822_v1  ;;  %v935_v4 = vpop.permute.xlu1 %934  ;;  %v875_v6 = vpop.permute.xlu0 %874  ;;  %v2740_v7 = vld [vmem:[#allocation2 + $0x44] ss:$28 sps:$4 sm:$0xff]  }
  0xbb   : > { %v2742_v8 = vld [vmem:[#allocation2 + $0x40] ss:$28 sps:$4 sm:$0xff]   ;;  %834 = vst [vmem:[#allocation2 + $0x70] sm:$0xcc] %v824_v2  ;;  %v881_v10 = vrot.slane %v875_v6, 4  ;;  %2269 = vmatprep.subr.bf16.mxu1 %v2740_v7  ;;  %v942_v18 = vrot.slane %v935_v4, 4 }
  0xbc   : > { %754 = vrot.lane.b32.xlu1 %v3117_v11, %s2818_s6  ;;  %692 = vrot.lane.b32.xlu0 %v2911_v12, %s2817_s30 }
  0xbd   : > { %v884_v13 = vsel %vm325_vm0, %v880_v9, %v881_v10  ;;  %2270 = vmatpush1.bf16.msra.mxu1 %v2742_v8 }
  0xbe   : > { %v886_v14 = vsel %vm885_vm10, %v873_v61, %v884_v13  ;;  %v3175_v15 = vpop.permute.xlu1 %752  ;;  %v937_v16 = vpop.permute.xlu0 %936 }
  0xbf   : > { %896 = vst [vmem:[#allocation2 + $0x8c] sm:$0x33] %v886_v14  ;;  %v758_v19 = vrot.slane %v3175_v15, 4  ;;  %v943_v20 = vrot.slane %v937_v16, 4 }
  0xc0   : > { %878 = vrot.lane.b32.xlu1 %v3117_v11, %s2820_s8  ;;  %816 = vrot.lane.b32.xlu0 %v2911_v12, %s2819_s7  ;;  %s2684_s8 = smul.u32 28, %s3643_s19 }
  0xc1   : > { %v763_v24 = vsel %vm325_vm0, %v757_v59, %v758_v19  ;;  %v946_v26 = vsel %vm325_vm0, %v942_v18, %v943_v20 }
  0xc2   : > { %v764_v28 = vsel %vm761_vm8, %v751_v55, %v763_v24  ;;  %v948_v29 = vsel %vm3601_vm11, %v935_v4, %v946_v26  ;;  %v3188_v31 = vpop.permute.xlu1 %876  ;;  %v3190_v17 = vpop.permute.xlu0 %814 }
  0xc3   : > { %773 = vst [vmem:[#allocation2 + $0x78] sm:$0x33] %v764_v28  ;;  %958 = vst [vmem:[#allocation2 + $0x8c] sm:$0xcc] %v948_v29  ;;  %v882_v32 = vrot.slane %v3188_v31, 4  ;;  %v820_v33 = vrot.slane %v3190_v17, 4 }
  0xc4   : > { %1002 = vrot.lane.b32.xlu1 %v3117_v11, %s2822_s10  ;;  %940 = vrot.lane.b32.xlu0 %v2911_v12, %s2821_s9 }
  0xc5   : > { %v887_v35 = vsel %vm325_vm0, %v881_v10, %v882_v32  ;;  %v825_v39 = vsel %vm325_vm0, %v819_v0, %v820_v33 }
  0xc6   : > { %v888_v40 = vsel %vm885_vm10, %v875_v6, %v887_v35  ;;  %v826_v44 = vsel %vm823_vm9, %v813_v62, %v825_v39  ;;  %v997_v46 = vpop.permute.xlu1 %996  ;;  %v3206_v47 = vpop.permute.xlu0 %938 }
  0xc7   : > { %897 = vst [vmem:[#allocation2 + $0x94] sm:$0x33] %v888_v40  ;;  %835 = vst [vmem:[#allocation2 + $0x78] sm:$0xcc] %v826_v44  ;;  %v944_v50 = vrot.slane %v3206_v47, 4  ;;  %v1004_v25 = vrot.slane %v997_v46, 4 }
  0xc8   : > { %1126 = vrot.lane.b32.xlu1 %v3117_v11, %s2824_s12  ;;  %1064 = vrot.lane.b32.xlu0 %v2911_v12, %s2823_s11  ;;  %s3571_s11 = scalar_lea.vmem %s3593_s4, %s2684_s8  ;;  %s2586_s12 = sshll.u32 %s3643_s19, 3 }
  0xc9   : > { %v949_v52 = vsel %vm325_vm0, %v943_v20, %v944_v50 }
  0xca   : > { %v950_v55 = vsel %vm3601_vm11, %v937_v16, %v949_v52  ;;  %v1059_v56 = vpop.permute.xlu1 %1058  ;;  %v999_v57 = vpop.permute.xlu0 %998  ;;  %v2743_v58 = vld [vmem:[#allocation2 + $0x74] ss:$28 sps:$4 sm:$0xff]   ;;  %vm3604_vm11 = vcmask 449536  }
  0xcb   : > { %v2745_v59 = vld [vmem:[#allocation2 + $0x70] ss:$28 sps:$4 sm:$0xff]   ;;  %959 = vst [vmem:[#allocation2 + $0x94] sm:$0xcc] %v950_v55  ;;  %v1005_v22 = vrot.slane %v999_v57, 4  ;;  %2230 = vmatprep.subr.bf16.mxu0 %v2743_v58  ;;  %v1066_v1 = vrot.slane %v1059_v56, 4 }
  0xcc   : > { %1250 = vrot.lane.b32.xlu1 %v3117_v11, %s2826_s14  ;;  %1188 = vrot.lane.b32.xlu0 %v2911_v12, %s2825_s13 }
  0xcd   : > { %v1008_v61 = vsel %vm325_vm0, %v1004_v25, %v1005_v22  ;;  %2231 = vmatpush1.bf16.msra.mxu0 %v2745_v59 }
  0xce   : > { %v1010_v62 = vsel %vm1009_vm12, %v997_v46, %v1008_v61  ;;  %v1121_v63 = vpop.permute.xlu1 %1120  ;;  %v1061_v0 = vpop.permute.xlu0 %1060 }
  0xcf   : > { %1020 = vst [vmem:[#allocation2 + $0xa8] sm:$0x33] %v1010_v62  ;;  %v1067_v2 = vrot.slane %v1061_v0, 4  ;;  %v1128_v9 = vrot.slane %v1121_v63, 4 }
  0xd0   : > { %1374 = vrot.lane.b32.xlu1 %v1367_v60, %s2828_s16  ;;  %1312 = vrot.lane.b32.xlu0 %v2911_v12, %s2827_s15  ;;  %s235_s15 = scalar_lea.vmem %s3594_s5, %s2586_s12 }
  0xd1   : > { %v1070_v11 = vsel %vm325_vm0, %v1066_v1, %v1067_v2 }
  0xd2   : > { %v1072_v5 = vsel %vm3598_vm13, %v1059_v56, %v1070_v11  ;;  %v1183_v4 = vpop.permute.xlu1 %1182  ;;  %v1123_v6 = vpop.permute.xlu0 %1122  ;;  %v2746_v7 = vld [vmem:[#allocation2 + $0x7c] ss:$28 sps:$4 sm:$0xff]  }
  0xd3   : > { %v2748_v8 = vld [vmem:[#allocation2 + $0x78] ss:$28 sps:$4 sm:$0xff]   ;;  %1082 = vst [vmem:[#allocation2 + $0xa8] sm:$0xcc] %v1072_v5  ;;  %v1129_v10 = vrot.slane %v1123_v6, 4  ;;  %2271 = vmatprep.subr.bf16.mxu1 %v2746_v7  ;;  %v1190_v18 = vrot.slane %v1183_v4, 4 }
  0xd4   : > { %1498 = vrot.lane.b32.xlu1 %v1367_v60, %s3613_s24  ;;  %1436 = vrot.lane.b32.xlu0 %v3026_v23, %s3614_s25 }
  0xd5   : > { %v1132_v13 = vsel %vm325_vm0, %v1128_v9, %v1129_v10  ;;  %2272 = vmatpush1.bf16.msra.mxu1 %v2748_v8 }
  0xd6   : > { %v1134_v12 = vsel %vm3600_vm14, %v1121_v63, %v1132_v13  ;;  %v3236_v14 = vpop.permute.xlu1 %1000  ;;  %v1185_v16 = vpop.permute.xlu0 %1184 }
  0xd7   : > { %1144 = vst [vmem:[#allocation2 + $0xc4] sm:$0x33] %v1134_v12  ;;  %v1006_v20 = vrot.slane %v3236_v14, 4  ;;  %v1191_v24 = vrot.slane %v1185_v16, 4 }
  0xd8   : > { %1622 = vrot.lane.b32.xlu1 %v1367_v60, %s2832_s22  ;;  %1560 = vrot.lane.b32.xlu0 %v3026_v23, %s3615_s26 }
  0xd9   : > { %v1011_v26 = vsel %vm325_vm0, %v1005_v22, %v1006_v20  ;;  %v1194_v28 = vsel %vm325_vm0, %v1190_v18, %v1191_v24 }
  0xda   : > { %v1012_v29 = vsel %vm1009_vm12, %v999_v57, %v1011_v26  ;;  %v1196_v35 = vsel %vm3599_vm15, %v1183_v4, %v1194_v28  ;;  %v3248_v39 = vpop.permute.xlu1 %1124  ;;  %v3250_v40 = vpop.permute.xlu0 %1062 }
  0xdb   : > { %1021 = vst [vmem:[#allocation2 + $0xb0] sm:$0x33] %v1012_v29  ;;  %1206 = vst [vmem:[#allocation2 + $0xc4] sm:$0xcc] %v1196_v35  ;;  %v1130_v44 = vrot.slane %v3248_v39, 4  ;;  %v1068_v46 = vrot.slane %v3250_v40, 4 }
  0xdc   : > { %1746 = vrot.lane.b32.xlu1 %v1367_v60, %s2834_s20  ;;  %1684 = vrot.lane.b32.xlu0 %v3026_v23, %s2833_s17 }
  0xdd   : > { %v1135_v51 = vsel %vm325_vm0, %v1129_v10, %v1130_v44  ;;  %v1073_v52 = vsel %vm325_vm0, %v1067_v2, %v1068_v46 }
  0xde   : > { %v1136_v55 = vsel %vm3600_vm14, %v1123_v6, %v1135_v51  ;;  %v1074_v56 = vsel %vm3598_vm13, %v1061_v0, %v1073_v52  ;;  %v1245_v57 = vpop.permute.xlu1 %1244  ;;  %v3265_v58 = vpop.permute.xlu0 %1186  ;;  %vm3605_vm13 = vcmask 56320   ;;  %vm3603_vm14 = vcmask 457728  }
  0xdf   : > { %1145 = vst [vmem:[#allocation2 + $0xcc] sm:$0x33] %v1136_v55  ;;  %1083 = vst [vmem:[#allocation2 + $0xb0] sm:$0xcc] %v1074_v56  ;;  %v1192_v59 = vrot.slane %v3265_v58, 4  ;;  %v1252_v1 = vrot.slane %v1245_v57, 4 }
  0xe0   : > { %1870 = vrot.lane.b32.xlu1 %v1367_v60, %s2836_s23  ;;  %1808 = vrot.lane.b32.xlu0 %v3026_v23, %s2835_s21  ;;  %v1949_v23 = vld [vmem:[%s3591_s2] sm:$0xff] }
  0xe1   : > { %v1197_v25 = vsel %vm325_vm0, %v1191_v24, %v1192_v59 }
  0xe2   : > { %v1198_v22 = vsel %vm3599_vm15, %v1185_v16, %v1197_v25  ;;  %v1307_v61 = vpop.permute.xlu1 %1306  ;;  %v1247_v62 = vpop.permute.xlu0 %1246  ;;  %v2749_v63 = vld [vmem:[#allocation2 + $0xac] ss:$28 sps:$4 sm:$0xff]   ;;  %vm3602_vm15 = vcmask 48128  }
  0xe3   : > { %v2751_v0 = vld [vmem:[#allocation2 + $0xa8] ss:$28 sps:$4 sm:$0xff]   ;;  %1207 = vst [vmem:[#allocation2 + $0xcc] sm:$0xcc] %v1198_v22  ;;  %v1253_v2 = vrot.slane %v1247_v62, 4  ;;  %2232 = vmatprep.subr.bf16.mxu0 %v2749_v63  ;;  %v1314_v6 = vrot.slane %v1307_v61, 4 }
  0xe4   : > { %2233 = vmatpush1.bf16.msra.mxu0 %v2751_v0  ;;  %1952 = vperm.xlu0 %2723, %v1949_v23  }
  0xe5   : > { %v1256_v60 = vsel %vm325_vm0, %v1252_v1, %v1253_v2 }
  0xe6   : > { %v1258_v11 = vsel %vm3605_vm13, %v1245_v57, %v1256_v60  ;;  %v1369_v5 = vpop.permute.xlu1 %1368  ;;  %v1309_v4 = vpop.permute.xlu0 %1308 }
  0xe7   : > { %1268 = vst [vmem:[#allocation2 + $0xe0] sm:$0x33] %v1258_v11  ;;  %v1315_v7 = vrot.slane %v1309_v4, 4  ;;  %v1376_v18 = vrot.slane %v1369_v5, 4 }
  0xe9   : > { %v1318_v8 = vsel %vm325_vm0, %v1314_v6, %v1315_v7 }
  0xea   : > { %v1320_v9 = vsel %vm3602_vm15, %v1307_v61, %v1318_v8  ;;  %v1431_v10 = vpop.permute.xlu1 %1430  ;;  %v1371_v13 = vpop.permute.xlu0 %1370  ;;  %v2752_v12 = vld [vmem:[#allocation2 + $0xb4] ss:$28 sps:$4 sm:$0xff]  }
  0xeb   : > { %v2754_v16 = vld [vmem:[#allocation2 + $0xb0] ss:$28 sps:$4 sm:$0xff]   ;;  %1330 = vst [vmem:[#allocation2 + $0xe0] sm:$0xcc] %v1320_v9  ;;  %v1377_v24 = vrot.slane %v1371_v13, 4  ;;  %2273 = vmatprep.subr.bf16.mxu1 %v2752_v12  ;;  %v1438_v51 = vrot.slane %v1431_v10, 4 }
  0xec   : > { %2274 = vmatpush1.bf16.msra.mxu1 %v2754_v16 }
  0xed   : > { %v1380_v26 = vsel %vm325_vm0, %v1376_v18, %v1377_v24 }
  0xee   : > { %v1382_v28 = vsel %vm3603_vm14, %v1369_v5, %v1380_v26  ;;  %v3284_v29 = vpop.permute.xlu1 %1248  ;;  %v1433_v35 = vpop.permute.xlu0 %1432 }
  0xef   : > { %1392 = vst [vmem:[#allocation2 + $0xfc] sm:$0x33] %v1382_v28  ;;  %v1254_v52 = vrot.slane %v3284_v29, 4  ;;  %v1439_v55 = vrot.slane %v1433_v35, 4 }
  0xf1   : > { %v1259_v56 = vsel %vm325_vm0, %v1253_v2, %v1254_v52  ;;  %v1442_v57 = vsel %vm325_vm0, %v1438_v51, %v1439_v55 }
  0xf2   : > { %v1260_v25 = vsel %vm3605_vm13, %v1247_v62, %v1259_v56  ;;  %v1444_v22 = vsel %vm3604_vm11, %v1431_v10, %v1442_v57  ;;  %v3293_v61 = vpop.permute.xlu1 %1372  ;;  %v3295_v63 = vpop.permute.xlu0 %1310  ;;  %vm3611_vm13 = vcmask 359424  }
  0xf3   : > { %1269 = vst [vmem:[#allocation2 + $0xe8] sm:$0x33] %v1260_v25  ;;  %1454 = vst [vmem:[#allocation2 + $0xfc] sm:$0xcc] %v1444_v22  ;;  %v1378_v0 = vrot.slane %v3293_v61, 4  ;;  %v1316_v1 = vrot.slane %v3295_v63, 4 }
  0xf5   : > { %v1383_v2 = vsel %vm325_vm0, %v1377_v24, %v1378_v0  ;;  %v1321_v62 = vsel %vm325_vm0, %v1315_v7, %v1316_v1 }
  0xf6   : > { %v1384_v60 = vsel %vm3603_vm14, %v1371_v13, %v1383_v2  ;;  %v1322_v23 = vsel %vm3602_vm15, %v1309_v4, %v1321_v62  ;;  %v1493_v11 = vpop.permute.xlu1 %1492  ;;  %v3307_v5 = vpop.permute.xlu0 %1434  ;;  %vm1505_vm15 = vcmask 441344   ;;  %vm3606_vm14 = vcmask 375808  }
  0xf7   : > { %1393 = vst [vmem:[#allocation2 + $0x104] sm:$0x33] %v1384_v60  ;;  %1331 = vst [vmem:[#allocation2 + $0xe8] sm:$0xcc] %v1322_v23  ;;  %v3612_v6 = vrot.slane %v3307_v5, 4  ;;  %v1500_v13 = vrot.slane %v1493_v11, 4 }
  0xf9   : > { %v1445_v8 = vsel %vm325_vm0, %v1439_v55, %v3612_v6 }
  0xfa   : > { %v1446_v9 = vsel %vm3604_vm11, %v1433_v35, %v1445_v8  ;;  %v1555_v10 = vpop.permute.xlu1 %1554  ;;  %v1495_v12 = vpop.permute.xlu0 %1494  ;;  %v2755_v7 = vld [vmem:[#allocation2 + $0xe4] ss:$28 sps:$4 sm:$0xff]   ;;  %vm3607_vm11 = vcmask 367616  }
  0xfb   : > { %v2757_v16 = vld [vmem:[#allocation2 + $0xe0] ss:$28 sps:$4 sm:$0xff]   ;;  %1455 = vst [vmem:[#allocation2 + $0x104] sm:$0xcc] %v1446_v9  ;;  %v1501_v4 = vrot.slane %v1495_v12, 4  ;;  %2234 = vmatprep.subr.bf16.mxu0 %v2755_v7  ;;  %v1562_v51 = vrot.slane %v1555_v10, 4 }
  0xfc   : > { %2235 = vmatpush1.bf16.msra.mxu0 %v2757_v16 }
  0xfd   : > { %v1504_v18 = vsel %vm325_vm0, %v1500_v13, %v1501_v4 }
  0xfe   : > { %v1506_v24 = vsel %vm1505_vm15, %v1493_v11, %v1504_v18  ;;  %v1617_v26 = vpop.permute.xlu1 %1616  ;;  %v1557_v28 = vpop.permute.xlu0 %1556 }
  0xff   : > { %1516 = vst [vmem:[#allocation2 + $0x118] sm:$0x33] %v1506_v24  ;;  %v1563_v35 = vrot.slane %v1557_v28, 4  ;;  %v1624_v62 = vrot.slane %v1617_v26, 4 }
 0x101   : > { %v1566_v55 = vsel %vm325_vm0, %v1562_v51, %v1563_v35 }
 0x102   : > { %v1568_v56 = vsel %vm3606_vm14, %v1555_v10, %v1566_v55  ;;  %v1679_v57 = vpop.permute.xlu1 %1678  ;;  %v1619_v25 = vpop.permute.xlu0 %1618  ;;  %v2758_v22 = vld [vmem:[#allocation2 + $0xec] ss:$28 sps:$4 sm:$0xff]  }
 0x103   : > { %v2760_v2 = vld [vmem:[#allocation2 + $0xe8] ss:$28 sps:$4 sm:$0xff]   ;;  %1578 = vst [vmem:[#allocation2 + $0x118] sm:$0xcc] %v1568_v56  ;;  %v1625_v60 = vrot.slane %v1619_v25, 4  ;;  %2275 = vmatprep.subr.bf16.mxu1 %v2758_v22  ;;  %v1686_v7 = vrot.slane %v1679_v57, 4 }
 0x104   : > { %2276 = vmatpush1.bf16.msra.mxu1 %v2760_v2 }
 0x105   : > { %v1628_v23 = vsel %vm325_vm0, %v1624_v62, %v1625_v60 }
 0x106   : > { %v1630_v11 = vsel %vm3607_vm11, %v1617_v26, %v1628_v23  ;;  %v3320_v8 = vpop.permute.xlu1 %1496  ;;  %v1681_v9 = vpop.permute.xlu0 %1680 }
 0x107   : > { %1640 = vst [vmem:[#allocation2 + $0x134] sm:$0x33] %v1630_v11  ;;  %v1502_v10 = vrot.slane %v3320_v8, 4  ;;  %v1687_v16 = vrot.slane %v1681_v9, 4 }
 0x109   : > { %v1507_v13 = vsel %vm325_vm0, %v1501_v4, %v1502_v10  ;;  %v1690_v18 = vsel %vm325_vm0, %v1686_v7, %v1687_v16 }
 0x10a   : > { %v1508_v24 = vsel %vm1505_vm15, %v1495_v12, %v1507_v13  ;;  %v1692_v51 = vsel %vm3611_vm13, %v1679_v57, %v1690_v18  ;;  %v3329_v26 = vpop.permute.xlu1 %1620  ;;  %v3331_v55 = vpop.permute.xlu0 %1558 }
 0x10b   : > { %1517 = vst [vmem:[#allocation2 + $0x120] sm:$0x33] %v1508_v24  ;;  %1702 = vst [vmem:[#allocation2 + $0x134] sm:$0xcc] %v1692_v51  ;;  %v3610_v56 = vrot.slane %v3329_v26, 4  ;;  %v3609_v22 = vrot.slane %v3331_v55, 4 }
 0x10d   : > { %v1631_v4 = vsel %vm325_vm0, %v1625_v60, %v3610_v56  ;;  %v1569_v12 = vsel %vm325_vm0, %v1563_v35, %v3609_v22 }
 0x10e   : > { %v1632_v57 = vsel %vm3607_vm11, %v1619_v25, %v1631_v4  ;;  %v1570_v2 = vsel %vm3606_vm14, %v1557_v28, %v1569_v12  ;;  %v1741_v62 = vpop.permute.xlu1 %1740  ;;  %v3343_v23 = vpop.permute.xlu0 %1682  ;;  %vm1753_vm14 = vcmask 293888   ;;  %vm1815_vm11 = vcmask 285696  }
 0x10f   : > { %1641 = vst [vmem:[#allocation2 + $0x13c] sm:$0x33] %v1632_v57  ;;  %1579 = vst [vmem:[#allocation2 + $0x120] sm:$0xcc] %v1570_v2  ;;  %v3608_v11 = vrot.slane %v3343_v23, 4  ;;  %v1748_v25 = vrot.slane %v1741_v62, 4 }
 0x111   : > { %v1693_v7 = vsel %vm325_vm0, %v1687_v16, %v3608_v11 }
 0x112   : > { %v1694_v60 = vsel %vm3611_vm13, %v1681_v9, %v1693_v7  ;;  %v1803_v13 = vpop.permute.xlu1 %1802  ;;  %v1743_v18 = vpop.permute.xlu0 %1742  ;;  %v2761_v35 = vld [vmem:[#allocation2 + $0x11c] ss:$28 sps:$4 sm:$0xff]   ;;  %vm1877_vm13 = vcmask 277504  }
 0x113   : > { %v2763_v24 = vld [vmem:[#allocation2 + $0x118] ss:$28 sps:$4 sm:$0xff]   ;;  %1703 = vst [vmem:[#allocation2 + $0x13c] sm:$0xcc] %v1694_v60  ;;  %v1749_v28 = vrot.slane %v1743_v18, 4  ;;  %2236 = vmatprep.subr.bf16.mxu0 %v2761_v35  ;;  %v1810_v2 = vrot.slane %v1803_v13, 4 }
 0x114   : > { %2237 = vmatpush1.bf16.msra.mxu0 %v2763_v24 }
 0x115   : > { %v1752_v51 = vsel %vm325_vm0, %v1748_v25, %v1749_v28 }
 0x116   : > { %v1754_v4 = vsel %vm1753_vm14, %v1741_v62, %v1752_v51  ;;  %v1865_v12 = vpop.permute.xlu1 %1864  ;;  %v1805_v57 = vpop.permute.xlu0 %1804 }
 0x117   : > { %1764 = vst [vmem:[#allocation2 + $0x150] sm:$0x33] %v1754_v4  ;;  %v1811_v9 = vrot.slane %v1805_v57, 4  ;;  %v1872_v35 = vrot.slane %v1865_v12, 4 }
 0x119   : > { %v1814_v16 = vsel %vm325_vm0, %v1810_v2, %v1811_v9 }
 0x11a   : > { %v1816_v7 = vsel %vm1815_vm11, %v1803_v13, %v1814_v16  ;;  %v320_v11 = vpop.permute.xlu1 %319  ;;  %v1867_v60 = vpop.permute.xlu0 %1866  ;;  %v2764_v22 = vld [vmem:[#allocation2 + $0x124] ss:$28 sps:$4 sm:$0xff]  }
 0x11b   : > { %v2766_v56 = vld [vmem:[#allocation2 + $0x120] ss:$28 sps:$4 sm:$0xff]   ;;  %1826 = vst [vmem:[#allocation2 + $0x150] sm:$0xcc] %v1816_v7  ;;  %v324_v25 = vrot.slane %v320_v11, 4  ;;  %v1873_v24 = vrot.slane %v1867_v60, 4  ;;  %2277 = vmatprep.subr.bf16.mxu1 %v2764_v22 }
 0x11c   : > { %2278 = vmatpush1.bf16.msra.mxu1 %v2766_v56 }
 0x11d   : > { %v331_v62 = vsel %vm325_vm0, %v323_v45, %v324_v25  ;;  %v333_v51 = vsel %vm327_vm1, %v320_v11, %v324_v25  ;;  %v1876_v4 = vsel %vm325_vm0, %v1872_v35, %v1873_v24 }
 0x11e   : > { %v332_v13 = vsel %vm327_vm1, %v3059_v41, %v331_v62  ;;  %341 = vst [vmem:[#allocation2 + $0x18] sm:$0xc] %v333_v51  ;;  %v1878_v2 = vsel %vm1877_vm13, %v1865_v12, %v1876_v4  ;;  %v445_v16 = vpop.permute.xlu1 %444  ;;  %v383_v7 = vpop.permute.xlu0 %382  ;;  %vm2204_vm1 = vcmask 1045504  }
 0x11f   : > { %340 = vst [vmem:[#allocation2 + $0x10] sm:$0xcc] %v332_v13  ;;  %1888 = vst [vmem:[#allocation2 + $0x16c] sm:$0x33] %v1878_v2  ;;  %v449_v22 = vrot.slane %v445_v16, 4  ;;  %v387_v6 = vrot.slane %v383_v7, 4 }
 0x121   : > { %v455_v45 = vsel %vm325_vm0, %v448_v54, %v449_v22  ;;  %v457_v11 = vsel %vm451_vm2, %v445_v16, %v449_v22  ;;  %v393_v56 = vsel %vm325_vm0, %v386_v43, %v387_v6  ;;  %v395_v41 = vsel %vm389_vm3, %v383_v7, %v387_v6 }
 0x122   : > { %v456_v12 = vsel %vm451_vm2, %v3077_v53, %v455_v45  ;;  %465 = vst [vmem:[#allocation2 + $0x34] sm:$0xc] %v457_v11  ;;  %v394_v35 = vsel %vm389_vm3, %v3051_v34, %v393_v56  ;;  %403 = vst [vmem:[#allocation2 + $0x34] sm:$0x3] %v395_v41  ;;  %v3374_v25 = vpop.permute.xlu1 %1806  ;;  %v3376_v62 = vpop.permute.xlu0 %1744  ;;  %v3403_v45 = vld [vmem:[%s3590_s1] sm:$0xf] }
 0x123   : > { %464 = vst [vmem:[#allocation2 + $0x2c] sm:$0xcc] %v456_v12  ;;  %402 = vst [vmem:[#allocation2 + $0x2c] sm:$0x33] %v394_v35  ;;  %v1812_v54 = vrot.slane %v3374_v25, 4  ;;  %v1750_v43 = vrot.slane %v3376_v62, 4 }
 0x124   : > { %vm3616_vm2 = vcmask 211968  }
 0x125   : > { %v1817_v6 = vsel %vm325_vm0, %v1811_v9, %v1812_v54  ;;  %v1755_v53 = vsel %vm325_vm0, %v1749_v28, %v1750_v43  ;;  %vm3617_vm3 = vmmov %vm3616_vm2 }
 0x126   : > { %v1818_v34 = vsel %vm1815_vm11, %v1805_v57, %v1817_v6  ;;  %v1756_v51 = vsel %vm1753_vm14, %v1743_v18, %v1755_v53  ;;  %v507_v4 = vpop.permute.xlu1 %506  ;;  %v3388_v13 = vpop.permute.xlu0 %1868  ;;  %v2767_v2 = vld [vmem:[#allocation2 + $0x154] ss:$28 sps:$4 sm:$0x3f]  }
 0x127   : > { %1827 = vst [vmem:[#allocation2 + $0x158] sm:$0xcc] %v1818_v34  ;;  %1765 = vst [vmem:[#allocation2 + $0x158] sm:$0x33] %v1756_v51  ;;  %v511_v16 = vrot.slane %v507_v4, 4  ;;  %v1874_v7 = vrot.slane %v3388_v13, 4  ;;  %2640 = vmatprep.subr.msk.bf16.mxu0 %vm2204_vm1, %v2767_v2 }
 0x128   : > { %v2769_v22 = vld [vmem:[#allocation2 + $0x150] ss:$28 sps:$4 sm:$0x3f]  }
 0x129   : > { %v517_v28 = vsel %vm325_vm0, %v510_v30, %v511_v16  ;;  %v519_v57 = vsel %vm513_vm4, %v507_v4, %v511_v16  ;;  %v1879_v18 = vsel %vm325_vm0, %v1873_v24, %v1874_v7  ;;  %v2206_v9 = vsel %vm2204_vm1, %v2769_v22, 0 }
 0x12a   : > { %v518_v11 = vsel %vm513_vm4, %v3109_v27, %v517_v28  ;;  %527 = vst [vmem:[#allocation2 + $0x50] sm:$0x3] %v519_v57  ;;  %v1880_v56 = vsel %vm1877_vm13, %v1867_v60, %v1879_v18  ;;  %v631_v30 = vpop.permute.xlu1 %630  ;;  %v569_v41 = vpop.permute.xlu0 %568  ;;  %2239 = vmatpush1.bf16.msra.mxu0 %v2206_v9  ;;  %v2771_v12 = vld [vmem:[#allocation2 + $0x10] ss:$28 sps:$4 sm:$0xff]   ;;  %vm2839_vm4 = vmmov 0  }
 0x12b   : > { %v2773_v35 = vld [vmem:[#allocation2 + $0x14] ss:$28 sps:$4 sm:$0xff]   ;;  %526 = vst [vmem:[#allocation2 + $0x48] sm:$0x33] %v518_v11  ;;  %1889 = vst [vmem:[#allocation2 + $0x174] sm:$0x33] %v1880_v56 }
 0x12c   : > { %v635_v24 = vrot.slane %v631_v30, 4  ;;  %v573_v6 = vrot.slane %v569_v41, 4  ;;  %2308 = vmatprep.subr.bf16.mxu0 %v2773_v35 }
 0x12d   : > { %2641 = vmatmul.mubr.msk.bf16.vlgmr.msra.gmra.mrb[0].mxu0 %vm637_vm6, %v3403_v45 }
 0x12e   : > { %v641_v53 = vsel %vm325_vm0, %v634_v21, %v635_v24  ;;  %v643_v34 = vsel %vm637_vm6, %v631_v30, %v635_v24  ;;  %v579_v27 = vsel %vm325_vm0, %v572_v38, %v573_v6  ;;  %v581_v60 = vsel %vm575_vm5, %v569_v41, %v573_v6  ;;  %v755_v21 = vpop.permute.xlu1 %754  ;;  %v693_v2 = vpop.permute.xlu0 %692  ;;  %2309 = vmatpush1.bf16.msra.mxu0 %v2771_v12 }
 0x12f   : > { %v642_v51 = vsel %vm637_vm6, %v3125_v36, %v641_v53  ;;  %651 = vst [vmem:[#allocation2 + $0x6c] sm:$0x3] %v643_v34  ;;  %v580_v4 = vsel %vm575_vm5, %v3127_v37, %v579_v27  ;;  %589 = vst [vmem:[#allocation2 + $0x50] sm:$0xc] %v581_v60  ;;  %2340 = vmatprep.mubr.bf16.mxu0 %v2837_v42  ;;  %v759_v38 = vrot.slane %v755_v21, 4  ;;  %v697_v16 = vrot.slane %v693_v2, 4 }
 0x130   : > { %650 = vst [vmem:[#allocation2 + $0x64] sm:$0x33] %v642_v51  ;;  %588 = vst [vmem:[#allocation2 + $0x48] sm:$0xcc] %v580_v4  ;;  %v2777_v51 = vld [vmem:[#allocation2 + $0x18] ss:$28 sps:$4 sm:$0xff]  }
 0x131   : > { %v765_v22 = vsel %vm325_vm0, %v758_v19, %v759_v38  ;;  %v767_v36 = vsel %vm761_vm8, %v755_v21, %v759_v38  ;;  %v703_v37 = vsel %vm325_vm0, %v696_v49, %v697_v16  ;;  %v705_v28 = vsel %vm699_vm7, %v693_v2, %v697_v16 }
 0x132   : > { %v766_v57 = vsel %vm761_vm8, %v3175_v15, %v765_v22  ;;  %775 = vst [vmem:[#allocation2 + $0x88] sm:$0x3] %v767_v36  ;;  %v704_v42 = vsel %vm699_vm7, %v3145_v48, %v703_v37  ;;  %713 = vst [vmem:[#allocation2 + $0x6c] sm:$0xc] %v705_v28  ;;  %v879_v18 = vpop.permute.xlu1 %878  ;;  %v817_v9 = vpop.permute.xlu0 %816  ;;  %vm3618_vm5 = vcmask 130048   ;;  %vm3619_vm7 = vcmask 138240  }
 0x133   : > { %v2774_v11 = vld [vmem:[#allocation2 + $0x15c] ss:$28 sps:$4 sm:$0x3f]   ;;  %774 = vst [vmem:[#allocation2 + $0x80] sm:$0x33] %v766_v57  ;;  %v883_v19 = vrot.slane %v879_v18, 4  ;;  %vm3620_vm8 = vmmov %vm3618_vm5 }
 0x134   : > { %712 = vst [vmem:[#allocation2 + $0x64] sm:$0xcc] %v704_v42  ;;  %v821_v56 = vrot.slane %v817_v9, 4  ;;  %v2776_v30 = vld [vmem:[#allocation2 + $0x158] ss:$28 sps:$4 sm:$0x3f]   ;;  %2642 = vmatprep.subr.msk.bf16.mxu1 %vm2204_vm1, %v2774_v11 }
 0x135   : > { %v889_v49 = vsel %vm325_vm0, %v882_v32, %v883_v19  ;;  %v891_v15 = vsel %vm885_vm10, %v879_v18, %v883_v19  ;;  %v2212_v32 = vsel %vm2204_vm1, %v2776_v30, 0 }
 0x136   : > { %v827_v48 = vsel %vm325_vm0, %v820_v33, %v821_v56  ;;  %v829_v41 = vsel %vm823_vm9, %v817_v9, %v821_v56  ;;  %v890_v12 = vsel %vm885_vm10, %v3188_v31, %v889_v49  ;;  %899 = vst [vmem:[#allocation2 + $0xa4] sm:$0x3] %v891_v15  ;;  %v1003_v24 = vpop.permute.xlu1 %1002  ;;  %v941_v6 = vpop.permute.xlu0 %940  ;;  %2280 = vmatpush1.bf16.msra.mxu1 %v2212_v32  ;;  %v2838_v33 = vmov 0.0  }
 0x137   : > { %v828_v35 = vsel %vm823_vm9, %v3190_v17, %v827_v48  ;;  %837 = vst [vmem:[#allocation2 + $0x88] sm:$0xc] %v829_v41  ;;  %898 = vst [vmem:[#allocation2 + $0x9c] sm:$0x33] %v890_v12  ;;  %v1007_v53 = vrot.slane %v1003_v24, 4  ;;  %v945_v34 = vrot.slane %v941_v6, 4  ;;  %2665 = vmatprep.subr.bf16.mxu1 %v2838_v33 }
 0x138   : > { %836 = vst [vmem:[#allocation2 + $0x80] sm:$0xcc] %v828_v35  ;;  %vm3621_vm9 = vmmov %vm3619_vm7  ;;  %vm3622_vm10 = vcmask 56320  }
 0x139   : > { %v1013_v31 = vsel %vm325_vm0, %v1006_v20, %v1007_v53  ;;  %v1015_v27 = vsel %vm1009_vm12, %v1003_v24, %v1007_v53  ;;  %v951_v17 = vsel %vm325_vm0, %v944_v50, %v945_v34  ;;  %v953_v60 = vsel %vm3616_vm2, %v941_v6, %v945_v34  ;;  %2643 = vmatmul.mubr.msk.bf16.vlgmr.msra.gmra.mrb[0].mxu1 %vm637_vm6, %v3403_v45  ;;  %v2781_v28 = vld [vmem:[#allocation2 + $0x50] ss:$28 sps:$4 sm:$0xff]   ;;  %vm3624_vm2 = vmmov %vm3622_vm10 }
 0x13a   : > { %v1014_v4 = vsel %vm1009_vm12, %v3236_v14, %v1013_v31  ;;  %1023 = vst [vmem:[#allocation2 + $0xc0] sm:$0x3] %v1015_v27  ;;  %v952_v21 = vsel %vm3617_vm3, %v3206_v47, %v951_v17  ;;  %961 = vst [vmem:[#allocation2 + $0xa4] sm:$0xc] %v953_v60  ;;  %v1127_v2 = vpop.permute.xlu1 %1126  ;;  %v1065_v38 = vpop.permute.xlu0 %1064  ;;  %2666 = vmatpush3.bf16.msra.mxu1 %v2777_v51  ;;  %2679 = vmatprep.mubr.msk.bf16.mxu1 %vm2839_vm4, %v2838_v33  ;;  %vm3623_vm12 = vcmask 64512   ;;  %vm3626_vm4 = vcmask 457728  }
 0x13b   : > { %v2778_v20 = vld [vmem:[#allocation2 + $0x48] ss:$28 sps:$4 sm:$0xff]   ;;  %1022 = vst [vmem:[#allocation2 + $0xb8] sm:$0x33] %v1014_v4  ;;  %960 = vst [vmem:[#allocation2 + $0x9c] sm:$0xcc] %v952_v21  ;;  %2667 = vmatprep.subr.bf16.mxu1 %v2838_v33 }
 0x13c   : > { %v2780_v16 = vld [vmem:[#allocation2 + $0x4c] ss:$28 sps:$4 sm:$0xff]   ;;  %v1131_v50 = vrot.slane %v1127_v2, 4  ;;  %v1069_v22 = vrot.slane %v1065_v38, 4  ;;  %vm3625_vm3 = vmmov %vm3623_vm12  ;;  %v3630_v17 = vrot.slane %v3307_v5, 4 }
 0x13d   : > { %2310 = vmatprep.subr.bf16.mxu0 %v2780_v16 }
 0x13e   : > { %v1137_v47 = vsel %vm325_vm0, %v1130_v44, %v1131_v50  ;;  %v1139_v14 = vsel %vm3618_vm5, %v1127_v2, %v1131_v50  ;;  %v1075_v36 = vsel %vm325_vm0, %v1068_v46, %v1069_v22  ;;  %v1077_v37 = vsel %vm3619_vm7, %v1065_v38, %v1069_v22  ;;  %2311 = vmatpush1.bf16.msra.mxu0 %v2778_v20  ;;  %v1251_v18 = vpop.permute.xlu1 %1250  ;;  %v1189_v44 = vpop.permute.xlu0 %1188  ;;  %vm3628_vm7 = vmmov %vm3626_vm4 }
 0x13f   : > { %v1138_v57 = vsel %vm3620_vm8, %v3248_v39, %v1137_v47  ;;  %1147 = vst [vmem:[#allocation2 + $0xdc] sm:$0x3] %v1139_v14  ;;  %v1076_v42 = vsel %vm3621_vm9, %v3250_v40, %v1075_v36  ;;  %1085 = vst [vmem:[#allocation2 + $0xc0] sm:$0xc] %v1077_v37  ;;  %v1255_v9 = vrot.slane %v1251_v18, 4  ;;  %v1193_v11 = vrot.slane %v1189_v44, 4  ;;  %2668 = vmatpush3.bf16.msra.mxu1 %v2781_v28 }
 0x140   : > { %1146 = vst [vmem:[#allocation2 + $0xd4] sm:$0x33] %v1138_v57  ;;  %1084 = vst [vmem:[#allocation2 + $0xb8] sm:$0xcc] %v1076_v42  ;;  %2669 = vmatprep.subr.bf16.mxu1 %v2838_v33  ;;  %vm3627_vm5 = vcmask 48128   ;;  %vm3631_vm9 = vcmask 449536  }
 0x141   : > { %v1261_v46 = vsel %vm325_vm0, %v1254_v52, %v1255_v9  ;;  %v1263_v39 = vsel %vm3622_vm10, %v1251_v18, %v1255_v9  ;;  %v1199_v40 = vsel %vm325_vm0, %v1192_v59, %v1193_v11  ;;  %v1201_v19 = vsel %vm3623_vm12, %v1189_v44, %v1193_v11  ;;  %v2782_v56 = vld [vmem:[#allocation2 + $0x88] ss:$28 sps:$4 sm:$0xff]   ;;  %vm3629_vm8 = vmmov %vm3627_vm5 }
 0x142   : > { %v1262_v30 = vsel %vm3624_vm2, %v3284_v29, %v1261_v46  ;;  %1271 = vst [vmem:[#allocation2 + $0xf8] sm:$0x3] %v1263_v39  ;;  %v1200_v49 = vsel %vm3625_vm3, %v3265_v58, %v1199_v40  ;;  %1209 = vst [vmem:[#allocation2 + $0xdc] sm:$0xc] %v1201_v19  ;;  %v1375_v15 = vpop.permute.xlu1 %1374  ;;  %v1313_v48 = vpop.permute.xlu0 %1312  ;;  %v2783_v52 = vld [vmem:[#allocation2 + $0x80] ss:$28 sps:$4 sm:$0xff]  }
 0x143   : > { %v2785_v41 = vld [vmem:[#allocation2 + $0x84] ss:$28 sps:$4 sm:$0xff]   ;;  %1270 = vst [vmem:[#allocation2 + $0xf0] sm:$0x33] %v1262_v30  ;;  %1208 = vst [vmem:[#allocation2 + $0xd4] sm:$0xcc] %v1200_v49  ;;  %2670 = vmatpush3.bf16.msra.mxu1 %v2782_v56 }
 0x144   : > { %v1379_v12 = vrot.slane %v1375_v15, 4  ;;  %v1317_v35 = vrot.slane %v1313_v48, 4  ;;  %2312 = vmatprep.subr.bf16.mxu0 %v2785_v41  ;;  %2671 = vmatprep.subr.bf16.mxu1 %v2838_v33  ;;  %vm3632_vm10 = vmmov %vm3631_vm9  ;;  %v3633_v50 = vrot.slane %v3329_v26, 4  ;;  %vm3636_vm12 = vcmask 375808  }
 0x145   : > { %2313 = vmatpush1.bf16.msra.mxu0 %v2783_v52  ;;  %vm3638_vm3 = vmmov %vm3636_vm12  ;;  %v3639_v11 = vrot.slane %v3343_v23, 4 }
 0x146   : > { %v1385_v59 = vsel %vm325_vm0, %v1378_v0, %v1379_v12  ;;  %v1387_v29 = vsel %vm3626_vm4, %v1375_v15, %v1379_v12  ;;  %v1323_v58 = vsel %vm325_vm0, %v1316_v1, %v1317_v35  ;;  %v1325_v24 = vsel %vm3627_vm5, %v1313_v48, %v1317_v35  ;;  %v1499_v53 = vpop.permute.xlu1 %1498  ;;  %v1437_v34 = vpop.permute.xlu0 %1436 }
 0x147   : > { %v1386_v6 = vsel %vm3628_vm7, %v3293_v61, %v1385_v59  ;;  %1395 = vst [vmem:[#allocation2 + $0x114] sm:$0x3] %v1387_v29  ;;  %v1324_v32 = vsel %vm3629_vm8, %v3295_v63, %v1323_v58  ;;  %1333 = vst [vmem:[#allocation2 + $0xf8] sm:$0xc] %v1325_v24  ;;  %v1503_v0 = vrot.slane %v1499_v53, 4  ;;  %v1441_v31 = vrot.slane %v1437_v34, 4 }
 0x148   : > { %1394 = vst [vmem:[#allocation2 + $0x10c] sm:$0x33] %v1386_v6  ;;  %1332 = vst [vmem:[#allocation2 + $0xf0] sm:$0xcc] %v1324_v32  ;;  %vm3640_vm4 = vcmask 359424   ;;  %v2422_v24 = vld [vmem:[%s3592_s3] sm:$0xff] }
 0x149   : > { %v1509_v1 = vsel %vm325_vm0, %v1502_v10, %v1503_v0  ;;  %v1511_v27 = vsel %vm1505_vm15, %v1499_v53, %v1503_v0  ;;  %v1447_v61 = vsel %vm325_vm0, %v3630_v17, %v1441_v31  ;;  %v1449_v60 = vsel %vm3631_vm9, %v1437_v34, %v1441_v31  ;;  %v2786_v63 = vld [vmem:[#allocation2 + $0xc0] ss:$28 sps:$4 sm:$0xff]   ;;  %vm3641_vm5 = vmmov %vm3640_vm4 }
 0x14a   : > { %v1510_v51 = vsel %vm1505_vm15, %v3320_v8, %v1509_v1  ;;  %1519 = vst [vmem:[#allocation2 + $0x130] sm:$0x3] %v1511_v27  ;;  %v1448_v4 = vsel %vm3632_vm10, %v3307_v5, %v1447_v61  ;;  %1457 = vst [vmem:[#allocation2 + $0x114] sm:$0xc] %v1449_v60  ;;  %v1623_v21 = vpop.permute.xlu1 %1622  ;;  %v1561_v2 = vpop.permute.xlu0 %1560  ;;  %v2787_v10 = vld [vmem:[#allocation2 + $0xb8] ss:$28 sps:$4 sm:$0xff]   ;;  %2672 = vmatpush3.bf16.msra.mxu1 %v2786_v63 }
 0x14b   : > { %v2789_v38 = vld [vmem:[#allocation2 + $0xbc] ss:$28 sps:$4 sm:$0xff]   ;;  %1518 = vst [vmem:[#allocation2 + $0x128] sm:$0x33] %v1510_v51  ;;  %1456 = vst [vmem:[#allocation2 + $0x10c] sm:$0xcc] %v1448_v4  ;;  %2673 = vmatprep.subr.bf16.mxu1 %v2838_v33 }
 0x14c   : > { %v1627_v20 = vrot.slane %v1623_v21, 4  ;;  %v1565_v16 = vrot.slane %v1561_v2, 4  ;;  %2314 = vmatprep.subr.bf16.mxu0 %v2789_v38  ;;  %vm3634_vm15 = vcmask 367616   ;;  %v3635_v5 = vrot.slane %v3331_v55, 4 }
 0x14d   : > { %2315 = vmatpush1.bf16.msra.mxu0 %v2787_v10  ;;  %vm3637_vm2 = vmmov %vm3634_vm15  ;;  %v2430_v6 = vsub.s32 1, %v2880_v3  ;;  %v2434_v10 = vsub.s32 2, %v2880_v3  ;;  %v2438_v38 = vsub.s32 3, %v2880_v3 }
 0x14e   : > { %v1633_v8 = vsel %vm325_vm0, %v3633_v50, %v1627_v20  ;;  %v1635_v22 = vsel %vm3634_vm15, %v1623_v21, %v1627_v20  ;;  %v1571_v47 = vsel %vm325_vm0, %v3635_v5, %v1565_v16  ;;  %v1573_v14 = vsel %vm3636_vm12, %v1561_v2, %v1565_v16  ;;  %v1747_v28 = vpop.permute.xlu1 %1746  ;;  %v1685_v57 = vpop.permute.xlu0 %1684 }
 0x14f   : > { %v1634_v36 = vsel %vm3637_vm2, %v3329_v26, %v1633_v8  ;;  %1643 = vst [vmem:[#allocation2 + $0x14c] sm:$0x3] %v1635_v22  ;;  %v1572_v37 = vsel %vm3638_vm3, %v3331_v55, %v1571_v47  ;;  %1581 = vst [vmem:[#allocation2 + $0x130] sm:$0xc] %v1573_v14  ;;  %v1751_v42 = vrot.slane %v1747_v28, 4  ;;  %v1689_v18 = vrot.slane %v1685_v57, 4 }
 0x150   : > { %1642 = vst [vmem:[#allocation2 + $0x144] sm:$0x33] %v1634_v36  ;;  %1580 = vst [vmem:[#allocation2 + $0x128] sm:$0xcc] %v1572_v37  ;;  %v2431_v0 = vrot.slane %v2422_v24, %v2430_v6  ;;  %v2435_v20 = vrot.slane %v2422_v24, %v2434_v10  ;;  %v2439_v50 = vrot.slane %v2422_v24, %v2438_v38 }
 0x151   : > { %v1757_v44 = vsel %vm325_vm0, %v1750_v43, %v1751_v42  ;;  %v1759_v9 = vsel %vm1753_vm14, %v1747_v28, %v1751_v42  ;;  %v1695_v26 = vsel %vm325_vm0, %v3639_v11, %v1689_v18  ;;  %v1697_v46 = vsel %vm3640_vm4, %v1685_v57, %v1689_v18  ;;  %v2790_v55 = vld [vmem:[#allocation2 + $0xf8] ss:$28 sps:$4 sm:$0xff]  }
 0x152   : > { %v1758_v39 = vsel %vm1753_vm14, %v3376_v62, %v1757_v44  ;;  %1767 = vst [vmem:[#allocation2 + $0x168] sm:$0x3] %v1759_v9  ;;  %v1696_v40 = vsel %vm3641_vm5, %v3343_v23, %v1695_v26  ;;  %1705 = vst [vmem:[#allocation2 + $0x14c] sm:$0xc] %v1697_v46  ;;  %v1871_v19 = vpop.permute.xlu1 %1870  ;;  %v1809_v56 = vpop.permute.xlu0 %1808  ;;  %v2791_v43 = vld [vmem:[#allocation2 + $0xf0] ss:$28 sps:$4 sm:$0xff]   ;;  %2674 = vmatpush3.bf16.msra.mxu1 %v2790_v55 }
 0x153   : > { %v2793_v30 = vld [vmem:[#allocation2 + $0xf4] ss:$28 sps:$4 sm:$0xff]   ;;  %1766 = vst [vmem:[#allocation2 + $0x160] sm:$0x33] %v1758_v39  ;;  %1704 = vst [vmem:[#allocation2 + $0x144] sm:$0xcc] %v1696_v40  ;;  %2675 = vmatprep.subr.bf16.mxu1 %v2838_v33 }
 0x154   : > { %v1875_v49 = vrot.slane %v1871_v19, 4  ;;  %v1813_v15 = vrot.slane %v1809_v56, 4  ;;  %2316 = vmatprep.subr.bf16.mxu0 %v2793_v30  ;;  %v2442_v26 = vsub.s32 4, %v2880_v3  ;;  %v2446_v46 = vsub.s32 5, %v2880_v3 }
 0x155   : > { %2317 = vmatpush1.bf16.msra.mxu0 %v2791_v43  ;;  %v2450_v55 = vsub.s32 6, %v2880_v3 }
 0x156   : > { %v1881_v62 = vsel %vm325_vm0, %v1874_v7, %v1875_v49  ;;  %v1883_v48 = vsel %vm1877_vm13, %v1871_v19, %v1875_v49  ;;  %v1819_v23 = vsel %vm325_vm0, %v1812_v54, %v1813_v15  ;;  %v1821_v52 = vsel %vm1815_vm11, %v1809_v56, %v1813_v15 }
 0x157   : > { %v1882_v41 = vsel %vm1877_vm13, %v3388_v13, %v1881_v62  ;;  %1891 = vst [vmem:[#allocation2 + $0x184] sm:$0x3] %v1883_v48  ;;  %v1820_v12 = vsel %vm1815_vm11, %v3374_v25, %v1819_v23  ;;  %1829 = vst [vmem:[#allocation2 + $0x168] sm:$0xc] %v1821_v52  ;;  %v2443_v39 = vrot.slane %v2422_v24, %v2442_v26  ;;  %vm2474_vm0 = vcmask 7168  }
 0x158   : > { %1890 = vst [vmem:[#allocation2 + $0x17c] sm:$0x33] %v1882_v41  ;;  %1828 = vst [vmem:[#allocation2 + $0x160] sm:$0xcc] %v1820_v12  ;;  %v2447_v56 = vrot.slane %v2422_v24, %v2446_v46  ;;  %v2451_v30 = vrot.slane %v2422_v24, %v2450_v55 }
 0x159   : > { %v2794_v7 = vld [vmem:[#allocation2 + $0x130] ss:$28 sps:$4 sm:$0xff]  }
 0x15a   : > { %v2795_v35 = vld [vmem:[#allocation2 + $0x128] ss:$28 sps:$4 sm:$0xff]   ;;  %2676 = vmatpush3.bf16.msra.mxu1 %v2794_v7 }
 0x15b   : > { %v2797_v59 = vld [vmem:[#allocation2 + $0x12c] ss:$28 sps:$4 sm:$0xff]   ;;  %2677 = vmatprep.subr.bf16.mxu1 %v2838_v33  ;;  %v2426_v33 = vsub.s32 0, %v2880_v3 }
 0x15c   : > { %2318 = vmatprep.subr.bf16.mxu0 %v2797_v59 }
 0x15d   : > { %2319 = vmatpush1.bf16.msra.mxu0 %v2795_v35  ;;  %v2427_v53 = vrot.slane %v2422_v24, %v2426_v33 }
 0x15e   : > { %v2800_v29 = vld [vmem:[#allocation2 + $0x168] ss:$28 sps:$4 sm:$0x3f]  }
 0x15f   : > { %v2798_v54 = vld [vmem:[#allocation2 + $0x164] ss:$28 sps:$4 sm:$0x3f]   ;;  %v2224_v13 = vsel %vm2204_vm1, %v2800_v29, 0 }
 0x160   : > { %v2801_v58 = vld [vmem:[#allocation2 + $0x160] ss:$28 sps:$4 sm:$0x3f]   ;;  %2644 = vmatprep.subr.msk.bf16.mxu0 %vm2204_vm1, %v2798_v54  ;;  %2678 = vmatpush3.bf16.msra.mxu1 %v2224_v13 }
 0x161   : > { %v2218_v25 = vsel %vm2204_vm1, %v2801_v58, 0 }
 0x162   : > { %2321 = vmatpush1.bf16.msra.mxu0 %v2218_v25 }
 0x163   : > { %2680 = vmatmul.mubr.msk.bf16.vlgmr.msra.gmra.mrb[4].mxu1 %vm637_vm6, %v3403_v45  ;;  %v1953_v32 = vpop.permute.xlu0 %1952 }
 0x165   : > { %2645 = vmatmul.mubr.msk.bf16.vlgmr.msra.gmra.mrb[4].mxu0 %vm637_vm6, %v3403_v45  ;;  %vm2491_vm6 = vcmask 15368  }
 0x200   : > { %v2260_v34 = vpop.f32.mrb[0].mxu0 }
 0x201   : > { %v2261_v31 = vadd.f32 %v2260_v34, %v1953_v32  ;;  %v2262_v1 = vpop.f32.mrb[1].mxu0 }
 0x202   : > { %v2263_v27 = vadd.f32 %v2262_v1, %v1953_v32  ;;  %v2264_v17 = vpop.f32.mrb[2].mxu0 }
 0x203   : > { %v2459_v45 = vmul.f32 %v2427_v53, %v2261_v31  ;;  %v2265_v61 = vpop.f32.mrb[3].mxu0 }
 0x204   : > { %v2653_v60 = vpack.c.bf16 %v2263_v27, %v2261_v31  ;;  %v2460_v63 = vmul.f32 %v2431_v0, %v2263_v27 }
 0x205   : > { %v2476_v51 = vmul.f32 %v2459_v45, %v2261_v31 }
 0x206   : > { %2418 = vst [vmem:[%s3571_s11] sm:$0xff] %v2653_v60  ;;  %v2466_v4 = vadd.f32 %v2460_v63, %v2459_v45  ;;  %v2477_v21 = vmul.f32 %v2460_v63, %v2263_v27 }
 0x208   : > { %v2483_v2 = vadd.f32 %v2477_v21, %v2476_v51 }
 0x20c   : > { %v2301_v16 = vpop.f32.mrb[0].mxu1 }
 0x20d   : > { %v2302_v8 = vadd.f32 %v2301_v16, %v1953_v32  ;;  %v2303_v22 = vpop.f32.mrb[1].mxu1 }
 0x20e   : > { %v2304_v5 = vadd.f32 %v2303_v22, %v1953_v32  ;;  %v2305_v47 = vpop.f32.mrb[2].mxu1 }
 0x20f   : > { %v2461_v14 = vmul.f32 %v2435_v20, %v2302_v8  ;;  %v2306_v36 = vpop.f32.mrb[3].mxu1 }
 0x210   : > { %v2654_v37 = vpack.c.bf16 %v2304_v5, %v2302_v8  ;;  %v2462_v28 = vmul.f32 %v2439_v50, %v2304_v5 }
 0x211   : > { %v2467_v57 = vadd.f32 %v2466_v4, %v2461_v14  ;;  %v2478_v42 = vmul.f32 %v2461_v14, %v2302_v8 }
 0x212   : > { %2419 = vst [vmem:[%s3571_s11 + $0x8] sm:$0xff] %v2654_v37  ;;  %v2479_v18 = vmul.f32 %v2462_v28, %v2304_v5 }
 0x213   : > { %v2484_v44 = vadd.f32 %v2483_v2, %v2478_v42  ;;  %v2468_v9 = vadd.f32 %v2467_v57, %v2462_v28 }
 0x215   : > { %v2485_v11 = vadd.f32 %v2484_v44, %v2479_v18 }
 0x236   : > { %v2383_v40 = vpop.f32.mrb[4].mxu1 }
 0x237   : > { %v2384_v43 = vadd.f32 %v2383_v40, %v1953_v32  ;;  %v2681_v62 = vpop.f32.mrb[5].mxu1 }
 0x238   : > { %v2342_v19 = vpop.f32.mrb[4].mxu0  ;;  %v2386_v52 = vpop.f32.mrb[6].mxu1 }
 0x239   : > { %v2343_v49 = vadd.f32 %v2342_v19, %v1953_v32  ;;  %v2344_v15 = vpop.f32.mrb[5].mxu0  ;;  %v2656_v41 = vpack.c.bf16 %v2384_v43, %v2384_v43  ;;  %v2682_v35 = vpop.f32.mrb[7].mxu1  ;;  %v2465_v54 = vmul.f32 %v2451_v30, %v2384_v43 }
 0x23a   : > { %v2345_v48 = vadd.f32 %v2344_v15, %v1953_v32  ;;  %v2346_v23 = vpop.f32.mrb[6].mxu0 }
 0x23b   : > { %v2463_v12 = vmul.f32 %v2443_v39, %v2343_v49  ;;  %v2347_v7 = vpop.f32.mrb[7].mxu0  ;;  %2421 = vst [vmem:[%s3571_s11 + $0x18] sm:$0xf] %v2656_v41  ;;  %v2482_v24 = vmul.f32 %v2465_v54, %v2384_v43 }
 0x23c   : > { %v2655_v59 = vpack.c.bf16 %v2345_v48, %v2343_v49  ;;  %v2464_v3 = vmul.f32 %v2447_v56, %v2345_v48 }
 0x23d   : > { %v2469_v29 = vadd.f32 %v2468_v9, %v2463_v12  ;;  %v2480_v58 = vmul.f32 %v2463_v12, %v2343_v49 }
 0x23e   : > { %2420 = vst [vmem:[%s3571_s11 + $0x10] sm:$0xff] %v2655_v59  ;;  %v2481_v13 = vmul.f32 %v2464_v3, %v2345_v48 }
 0x23f   : > { %v2486_v25 = vadd.f32 %v2485_v11, %v2480_v58  ;;  %v2470_v33 = vadd.f32 %v2469_v29, %v2464_v3 }
 0x241   : > { %v2471_v6 = vadd.f32 %v2470_v33, %v2465_v54  ;;  %v2487_v32 = vadd.f32 %v2486_v25, %v2481_v13 }
 0x243   : > { %2472 = vadd.xlane.f32.xlu1 %v2471_v6  ;;  %v2488_v53 = vadd.f32 %v2487_v32, %v2482_v24 }
 0x245   : > { %2489 = vadd.xlane.f32.xlu0 %v2488_v53 }
 0x2d0   : > { %v2473_v34 = vpop.xlane.xlu1 %2472 }
 0x2d1   : > { %2475 = vst.msk [vmem:[%s235_s15] sm:$0xff] %vm2474_vm0, %v2473_v34 }
 0x2d2   : > { %v2490_v0 = vpop.xlane.xlu0 %2489 }
 0x2d3   : > { %2492 = vst.msk [vmem:[%s235_s15] sm:$0xff] %vm2491_vm6, %v2490_v0 }
 0x2d4 PF: > { %s16_s18 = sadd.s32 1, %s2808_s18  }
 0x2d5   : > { %p13_p4 = scmp.ge.s32.totalorder %s16_s18, 4  }
 0x2d7   :  { %15 = sbr.rel (!%p13_p4) target bundleno = 1 (0x1), region = 78 }

// kernel: encoder_conv3d_block.4
= control target key start
LH: loop header
LB: loop body
LE: loop exit
PB: predicated region body
PF: predicated region fallthrough
CT: control target
= control target key end

     0   :  { %s2722_s24 = smov 0   ;;  %s3679_s0 = inlined_call_operand.vmem [shape: bf16[2,8,896], index: 0, kind: input, shape index: {}]   ;;  %s3680_s1 = inlined_call_operand.vmem [shape: f32[8,1], index: 1, kind: input, shape index: {}]   ;;  %s3681_s2 = inlined_call_operand.vmem [shape: f32[8,1], index: 2, kind: input, shape index: {}]   ;;  %s3682_s3 = inlined_call_operand.vmem [shape: bf16[16,216], index: 3, kind: input, shape index: {}]   ;;  %s3683_s4 = inlined_call_operand.vmem [shape: f32[16,1], index: 4, kind: input, shape index: {}]   ;;  %s3684_s5 = inlined_call_operand.vmem [shape: f32[1,896], index: 5, kind: input, shape index: {}]   ;;  %s3685_s6 = inlined_call_operand.vmem [shape: bf16[2,16,896], index: 6, kind: output, shape index: {0}]   ;;  %s3686_s7 = inlined_call_operand.vmem [shape: f32[2,16,2], index: 7, kind: output, shape index: {1}]  }
   0x1 LB: > { %s2445_s25 = sadd.s32 4294967295, %s2652_s24   ;;  %p2449_p0 = scmp.ge.s32.totalorder %s2652_s24, 1  ;;  %s2652_s24 = sphi %s2722_s24, %s18_s24  }
   0x2   : > { %p240_p1 = scmp.lt.s32.totalorder %s2652_s24, 3 }
   0x4   : > { %p241_p2 = pnand %p2449_p0, %p240_p1 }
   0x5   : > { %v309_v0 = vld [vmem:[%s3680_s1] sm:$0xff] (!%p241_p2)  ;;  %v2654_v1 = vmov (!%p241_p2), 0   ;;  %p277_p3 = scmp.lt.s32.totalorder (!%p241_p2), %s2445_s25, 1  ;;  %v344_v3 = vlaneseq (!%p241_p2)  ;;  %s2655_s13 = smov (!%p241_p2), 111   ;;  %vm436_vm0 = vcmask (!%p241_p2), 1044344   ;;  %vm437_vm1 = vcmask (!%p241_p2), 1047556  }
   0x6   : > { %244 = sbr.rel (%p241_p2) target bundleno = 980 (0x3d4), region = 44  ;;  %2626 = vset.pattern.permute.xlu0 (!%p241_p2), %v2654_v1  ;;  %293 = vst [vmem:[#allocation2] sm:$0xff] (!%p241_p2), %v2654_v1  ;;  %296 = vst [vmem:[#allocation2 + $0x18] sm:$0xff] (!%p241_p2), %v2654_v1  ;;  %2627 = vset.pattern.permute.xlu1 (!%p241_p2), %v2654_v1  ;;  %v322_v2 = vld [vmem:[%s3681_s2] sm:$0xff] (!%p241_p2)  ;;  %vm423_vm2 = vcmask (!%p241_p2), 908288   ;;  %vm425_vm4 = vcmask (!%p241_p2), 1043456  }
   0x7   : > { %297 = vst [vmem:[#allocation2 + $0x20] sm:$0xf] (!%p241_p2), %v2654_v1  ;;  %312 = vperm.xlu0 (!%p241_p2), %2626, %v309_v0   ;;  %v2747_v4 = vshrl.u32 (!%p241_p2), %v344_v3, 7  ;;  %v342_v15 = vld [vmem:[%s3684_s5] sm:$0xff] (!%p241_p2)  ;;  %vm438_vm3 = vmor (!%p241_p2), %vm437_vm1, %vm436_vm0  ;;  %vm443_vm5 = vcmask (!%p241_p2), 908292   ;;  %s2656_s14 = smov (!%p241_p2), 126  }
   0x8   : > { %vm444_vm6 = vmor (!%p241_p2), %vm443_vm5, %vm425_vm4  ;;  %s2657_s15 = smov (!%p241_p2), 127   ;;  %s2658_s16 = smov (!%p241_p2), 118   ;;  %vm511_vm7 = vcmask (!%p241_p2), 1031168   ;;  %vm547_vm8 = vcmask (!%p241_p2), 965632   ;;  %vm583_vm9 = vcmask (!%p241_p2), 957440   ;;  %vm619_vm10 = vcmask (!%p241_p2), 949248  }
   0x9   : > { %v3696_v9 = vsub.s32 (!%p241_p2), 4, %v2747_v4  ;;  %v3695_v10 = vsub.s32 (!%p241_p2), 5, %v2747_v4  ;;  %v3700_v11 = vsub.s32 (!%p241_p2), 0, %v2747_v4  ;;  %v3699_v12 = vsub.s32 (!%p241_p2), 1, %v2747_v4  ;;  %s2659_s17 = smov (!%p241_p2), 117   ;;  %s2660_s18 = smov (!%p241_p2), 116  }
   0xa   : > { %v3698_v21 = vsub.s32 (!%p241_p2), 2, %v2747_v4  ;;  %v3697_v23 = vsub.s32 (!%p241_p2), 3, %v2747_v4  ;;  %v3694_v24 = vsub.s32 (!%p241_p2), 6, %v2747_v4  ;;  %s2661_s19 = smov (!%p241_p2), 108   ;;  %s2662_s20 = smov (!%p241_p2), 107   ;;  %vm655_vm11 = vcmask (!%p241_p2), 883712  }
   0xb   : > { %325 = vperm.xlu0 (!%p241_p2), %2626, %v322_v2   ;;  %v363_v25 = vrot.slane (!%p241_p2), %v342_v15, %v3696_v9  ;;  %v367_v26 = vrot.slane (!%p241_p2), %v342_v15, %v3695_v10  ;;  %v347_v27 = vrot.slane (!%p241_p2), %v342_v15, %v3700_v11  ;;  %v351_v28 = vrot.slane (!%p241_p2), %v342_v15, %v3699_v12  ;;  %s2663_s21 = smov (!%p241_p2), 106   ;;  %s2664_s22 = smov (!%p241_p2), 28  }
   0xc   : > { %v355_v36 = vrot.slane (!%p241_p2), %v342_v15, %v3698_v21  ;;  %v359_v44 = vrot.slane (!%p241_p2), %v342_v15, %v3697_v23  ;;  %v371_v57 = vrot.slane (!%p241_p2), %v342_v15, %v3694_v24  ;;  %s2665_s23 = smov (!%p241_p2), 27   ;;  %s2666_s26 = smov (!%p241_p2), 26   ;;  %vm2007_vm12 = vcmask (!%p241_p2), 719872  }
   0xd   : > { %s3768_s25 = smov (!%p277_p3, %s2445_s25), 1  ;;  %s2667_s27 = smov 18   ;;  %vm691_vm13 = vcmask 875520   ;;  %vm727_vm14 = vcmask 867328   ;;  %vm763_vm15 = vcmask 228352   ;;  %vm799_vm0 = vcmask 220160  }
   0xe   : > { %s2588_s30 = smul.u32 28, %s3768_s25  ;;  %s2668_s28 = smov 17   ;;  %vm3702_vm1 = vcmask 211968   ;;  %vm3701_vm5 = vcmask 138240  }
   0xf   : > { %s2669_s29 = smov 16   ;;  %s2671_s8 = smov 7  }
  0x10   : > { %s281_s10 = scalar_lea.vmem %s3679_s0, %s2588_s30  ;;  %s2670_s30 = smov 8  }
  0x11   : > { %v300_v5 = vld [vmem:[%s281_s10 + $0x10] sm:$0xff]  ;;  %v298_v6 = vld [vmem:[%s281_s10] sm:$0xff]  ;;  %v299_v7 = vld [vmem:[%s281_s10 + $0x8] sm:$0xff]  ;;  %s3693_s9 = smov 6   ;;  %s3687_s11 = smov 55  }
  0x12   : > { %v301_v8 = vld [vmem:[%s281_s10 + $0x18] sm:$0xf]  ;;  %v306_v13 = vunpack.c.l.bf16 %v300_v5  ;;  %v307_v14 = vunpack.c.h.bf16 %v300_v5  ;;  %v302_v16 = vunpack.c.l.bf16 %v298_v6  ;;  %v303_v17 = vunpack.c.h.bf16 %v298_v6  ;;  %s2673_s10 = smov 56   ;;  %s3688_s12 = smov 54  }
  0x13   : > { %v304_v19 = vunpack.c.l.bf16 %v299_v7  ;;  %v305_v20 = vunpack.c.h.bf16 %v299_v7  ;;  %v308_v22 = vunpack.c.l.bf16 %v301_v8 }
  0x86   : > { %v313_v18 = vpop.permute.xlu0 %312 }
  0x87   : > { %v319_v29 = vmul.f32 %v313_v18, %v306_v13  ;;  %v320_v30 = vmul.f32 %v313_v18, %v307_v14  ;;  %v315_v31 = vmul.f32 %v313_v18, %v302_v16  ;;  %v316_v32 = vmul.f32 %v313_v18, %v303_v17 }
  0x88   : > { %v317_v34 = vmul.f32 %v313_v18, %v304_v19  ;;  %v318_v35 = vmul.f32 %v313_v18, %v305_v20  ;;  %v321_v37 = vmul.f32 %v313_v18, %v308_v22 }
  0x8a   : > { %v326_v33 = vpop.permute.xlu0 %325 }
  0x8b   : > { %v332_v38 = vadd.f32 %v326_v33, %v319_v29  ;;  %v333_v39 = vadd.f32 %v326_v33, %v320_v30  ;;  %v328_v40 = vadd.f32 %v326_v33, %v315_v31  ;;  %v329_v41 = vadd.f32 %v326_v33, %v316_v32 }
  0x8c   : > { %v330_v42 = vadd.f32 %v326_v33, %v317_v34  ;;  %v331_v43 = vadd.f32 %v326_v33, %v318_v35  ;;  %v334_v45 = vadd.f32 %v326_v33, %v321_v37 }
  0x8d   : > { %v339_v46 = vmax.f32 %v332_v38, 0.0  ;;  %v340_v47 = vmax.f32 %v333_v39, 0.0  ;;  %v335_v48 = vmax.f32 %v328_v40, 0.0  ;;  %v336_v49 = vmax.f32 %v329_v41, 0.0 }
  0x8e   : > { %v337_v50 = vmax.f32 %v330_v42, 0.0  ;;  %v338_v51 = vmax.f32 %v331_v43, 0.0  ;;  %v341_v56 = vmax.f32 %v334_v45, 0.0 }
  0x8f   : > { %v383_v52 = vmul.f32 %v363_v25, %v339_v46  ;;  %v384_v53 = vmul.f32 %v367_v26, %v340_v47  ;;  %v379_v54 = vmul.f32 %v347_v27, %v335_v48  ;;  %v380_v55 = vmul.f32 %v351_v28, %v336_v49 }
  0x90   : > { %v381_v60 = vmul.f32 %v355_v36, %v337_v50  ;;  %v382_v61 = vmul.f32 %v359_v44, %v338_v51  ;;  %v385_v63 = vmul.f32 %v371_v57, %v341_v56 }
  0x91   : > { %v2578_v58 = vpack.c.bf16 %v384_v53, %v383_v52  ;;  %v2576_v59 = vpack.c.bf16 %v380_v55, %v379_v54 }
  0x92   : > { %v2577_v62 = vpack.c.bf16 %v382_v61, %v381_v60  ;;  %v2579_v0 = vpack.c.bf16 %v385_v63, %v385_v63 }
  0x93   : > { %415 = vrot.lane.b32.xlu0 %v2578_v58, %s2655_s13  ;;  %411 = vrot.lane.b32.xlu1 %v2576_v59, %s2655_s13 }
  0x97   : > { %413 = vrot.lane.b32.xlu1 %v2577_v62, %s2655_s13 }
  0x9b   : > { %417 = vrot.lane.b32.xlu1 %v2579_v0, %s2655_s13  ;;  %s3689_s13 = smov 46  }
 0x105   : > { %v412_v2 = vpop.permute.xlu1 %411  ;;  %v416_v5 = vpop.permute.xlu0 %415 }
 0x106   : > { %v419_v3 = vrot.slane %v412_v2, 4  ;;  %v421_v8 = vrot.slane %v416_v5, 4 }
 0x108   : > { %v424_v6 = vsel %vm423_vm2, %v419_v3, %v412_v2 }
 0x109   : > { %439 = vst.msk [vmem:[#allocation2] sm:$0xff] %vm438_vm3, %v424_v6  ;;  %v414_v7 = vpop.permute.xlu1 %413  ;;  %vm871_vm3 = vcmask 146432  }
 0x10a   : > { %v420_v13 = vrot.slane %v414_v7, 4 }
 0x10c   : > { %v426_v14 = vsel %vm425_vm4, %v419_v3, %v420_v13  ;;  %v428_v15 = vsel %vm425_vm4, %v420_v13, %v421_v8 }
 0x10d   : > { %v2777_v16 = vsel %vm423_vm2, %v426_v14, %v414_v7  ;;  %v2780_v17 = vsel %vm423_vm2, %v428_v15, %v416_v5  ;;  %v418_v18 = vpop.permute.xlu1 %417  ;;  %v2999_v15 = vld [vmem:[%s3682_s3 + $0x4] ss:$8 sps:$4 sm:$0xff]  }
 0x10e   : > { %440 = vst [vmem:[#allocation2 + $0x8] sm:$0xff] %v2777_v16  ;;  %441 = vst [vmem:[#allocation2 + $0x10] sm:$0xff] %v2780_v17  ;;  %v422_v19 = vrot.slane %v418_v18, 4  ;;  %2559 = vmatprep.mubr.msk.bf16.mxu0 %vm2007_vm12, %v2999_v15  ;;  %2561 = vmatprep.mubr.msk.bf16.mxu1 %vm2007_vm12, %v2999_v15 }
 0x110   : > { %v430_v20 = vsel %vm425_vm4, %v421_v8, %v422_v19  ;;  %v2786_v22 = vld [vmem:[#allocation2] sm:$0xff] }
 0x111   : > { %v431_v25 = vsel %vm423_vm2, %v430_v20, %v418_v18  ;;  %498 = vrot.lane.b32.xlu1 %v2786_v22, %s2656_s14  ;;  %462 = vrot.lane.b32.xlu0 %v2786_v22, %s2657_s15  ;;  %vm475_vm2 = vcmask 1039360  }
 0x112   : > { %445 = vst.msk [vmem:[#allocation2 + $0x18] sm:$0xff] %vm444_vm6, %v431_v25  ;;  %vm3706_vm6 = vcmask 130048  }
 0x115   : > { %534 = vrot.lane.b32.xlu1 %v2786_v22, %s2658_s16  ;;  %466 = vrot.lane.b32.xlu0 %v2780_v17, %s2657_s15  ;;  %v448_v26 = vld [vmem:[#allocation2 + $0x10] sm:$0xff]  ;;  %v2889_v28 = vld [vmem:[#allocation2 + $0x4] sm:$0xff] }
 0x116   : > { %452 = vst [vmem:[#allocation3 + $0x10] sm:$0xff] %v448_v26  ;;  %v2895_v29 = vld [vmem:[#allocation2 + $0xc] sm:$0xff] }
 0x119   : > { %570 = vrot.lane.b32.xlu1 %v2786_v22, %s2659_s17  ;;  %500 = vrot.lane.b32.xlu0 %v2777_v16, %s2656_s14  ;;  %v449_v27 = vld [vmem:[#allocation2 + $0x18] sm:$0xf] }
 0x11a   : > { %453 = vst [vmem:[#allocation3 + $0x18] sm:$0xf] %v449_v27  ;;  %v2901_v30 = vld [vmem:[#allocation2 + $0x14] sm:$0xff] }
 0x11b   : > { %v3015_v27 = vld [vmem:[#allocation2 + $0x18] sm:$0xff] }
 0x11d   : > { %606 = vrot.lane.b32.xlu1 %v2786_v22, %s2660_s18  ;;  %536 = vrot.lane.b32.xlu0 %v2777_v16, %s2658_s16 }
 0x121   : > { %642 = vrot.lane.b32.xlu1 %v2786_v22, %s2661_s19  ;;  %538 = vrot.lane.b32.xlu0 %v2780_v17, %s2658_s16 }
 0x125   : > { %678 = vrot.lane.b32.xlu1 %v2786_v22, %s2662_s20  ;;  %572 = vrot.lane.b32.xlu0 %v2777_v16, %s2659_s17 }
 0x129   : > { %714 = vrot.lane.b32.xlu1 %v2786_v22, %s2663_s21  ;;  %608 = vrot.lane.b32.xlu0 %v2777_v16, %s2660_s18 }
 0x12d   : > { %750 = vrot.lane.b32.xlu1 %v2786_v22, %s2664_s22  ;;  %610 = vrot.lane.b32.xlu0 %v2780_v17, %s2660_s18 }
 0x131   : > { %786 = vrot.lane.b32.xlu1 %v2786_v22, %s2665_s23  ;;  %644 = vrot.lane.b32.xlu0 %v2777_v16, %s2661_s19 }
 0x135   : > { %822 = vrot.lane.b32.xlu1 %v2786_v22, %s2666_s26  ;;  %680 = vrot.lane.b32.xlu0 %v2777_v16, %s2662_s20 }
 0x139   : > { %858 = vrot.lane.b32.xlu1 %v2786_v22, %s2667_s27  ;;  %682 = vrot.lane.b32.xlu0 %v2780_v17, %s2662_s20 }
 0x13d   : > { %894 = vrot.lane.b32.xlu1 %v2786_v22, %s2668_s28  ;;  %716 = vrot.lane.b32.xlu0 %v2777_v16, %s2663_s21 }
 0x141   : > { %930 = vrot.lane.b32.xlu1 %v2786_v22, %s2669_s29  ;;  %752 = vrot.lane.b32.xlu0 %v2777_v16, %s2664_s22 }
 0x145   : > { %966 = vrot.lane.b32.xlu1 %v2786_v22, %s2670_s30  ;;  %754 = vrot.lane.b32.xlu0 %v2780_v17, %s2664_s22 }
 0x149   : > { %1002 = vrot.lane.b32.xlu1 %v2786_v22, %s2671_s8  ;;  %788 = vrot.lane.b32.xlu0 %v2777_v16, %s2665_s23 }
 0x14d   : > { %1038 = vrot.lane.b32.xlu1 %v2786_v22, %s3693_s9  ;;  %824 = vrot.lane.b32.xlu0 %v2777_v16, %s2666_s26 }
 0x151   : > { %464 = vrot.lane.b32.xlu1 %v2777_v16, %s2657_s15  ;;  %826 = vrot.lane.b32.xlu0 %v2780_v17, %s2666_s26 }
 0x155   : > { %502 = vrot.lane.b32.xlu1 %v2780_v17, %s2656_s14  ;;  %860 = vrot.lane.b32.xlu0 %v2777_v16, %s2667_s27 }
 0x159   : > { %574 = vrot.lane.b32.xlu1 %v2780_v17, %s2659_s17  ;;  %896 = vrot.lane.b32.xlu0 %v2777_v16, %s2668_s28 }
 0x15d   : > { %646 = vrot.lane.b32.xlu1 %v2780_v17, %s2661_s19  ;;  %898 = vrot.lane.b32.xlu0 %v2780_v17, %s2668_s28 }
 0x161   : > { %718 = vrot.lane.b32.xlu1 %v2780_v17, %s2663_s21  ;;  %932 = vrot.lane.b32.xlu0 %v2777_v16, %s2669_s29 }
 0x165   : > { %790 = vrot.lane.b32.xlu1 %v2780_v17, %s2665_s23  ;;  %968 = vrot.lane.b32.xlu0 %v2777_v16, %s2670_s30 }
 0x169   : > { %862 = vrot.lane.b32.xlu1 %v2780_v17, %s2667_s27  ;;  %970 = vrot.lane.b32.xlu0 %v2780_v17, %s2670_s30 }
 0x16d   : > { %934 = vrot.lane.b32.xlu1 %v2780_v17, %s2669_s29  ;;  %1004 = vrot.lane.b32.xlu0 %v2777_v16, %s2671_s8 }
 0x171   : > { %1006 = vrot.lane.b32.xlu1 %v2780_v17, %s2671_s8  ;;  %1040 = vrot.lane.b32.xlu0 %v2777_v16, %s3693_s9 }
 0x175   : > { %1074 = vrot.lane.b32.xlu1 %v2889_v28, %s2673_s10  ;;  %1042 = vrot.lane.b32.xlu0 %v2780_v17, %s3693_s9  ;;  %s2681_s9 = smov 34  }
 0x179   : > { %1110 = vrot.lane.b32.xlu1 %v2889_v28, %s3687_s11  ;;  %1076 = vrot.lane.b32.xlu0 %v2895_v29, %s2673_s10 }
 0x17d   : > { %1078 = vrot.lane.b32.xlu1 %v2901_v30, %s2673_s10  ;;  %1112 = vrot.lane.b32.xlu0 %v2895_v29, %s3687_s11 }
 0x181   : > { %1146 = vrot.lane.b32.xlu1 %v2889_v28, %s3688_s12  ;;  %1114 = vrot.lane.b32.xlu0 %v2901_v30, %s3687_s11  ;;  %s3690_s11 = smov 45  }
 0x183   : > { %v2911_v31 = vpop.permute.xlu0 %462  ;;  %v499_v32 = vpop.permute.xlu1 %498 }
 0x184   : > { %v506_v37 = vrot.slane %v499_v32, 4 }
 0x185   : > { %1182 = vrot.lane.b32.xlu1 %v2889_v28, %s3689_s13  ;;  %1148 = vrot.lane.b32.xlu0 %v2895_v29, %s3688_s12 }
 0x187   : > { %v535_v33 = vpop.permute.xlu1 %534  ;;  %v2917_v34 = vpop.permute.xlu0 %466 }
 0x188   : > { %v542_v43 = vrot.slane %v535_v33, 4 }
 0x189   : > { %1150 = vrot.lane.b32.xlu1 %v2901_v30, %s3688_s12  ;;  %1184 = vrot.lane.b32.xlu0 %v2895_v29, %s3689_s13  ;;  %s3691_s12 = smov 44  }
 0x18b   : > { %v571_v35 = vpop.permute.xlu1 %570  ;;  %v2923_v36 = vpop.permute.xlu0 %500 }
 0x18c   : > { %v507_v38 = vrot.slane %v2923_v36, 4  ;;  %v578_v54 = vrot.slane %v571_v35, 4 }
 0x18d   : > { %1218 = vrot.lane.b32.xlu1 %v2889_v28, %s3690_s11  ;;  %1186 = vrot.lane.b32.xlu0 %v2901_v30, %s3689_s13  ;;  %s3692_s13 = smov 36  }
 0x18e   : > { %v510_v39 = vsel %vm425_vm4, %v506_v37, %v507_v38 }
 0x18f   : > { %v2934_v40 = vsel %vm511_vm7, %v499_v32, %v510_v39  ;;  %v607_v41 = vpop.permute.xlu1 %606  ;;  %v537_v42 = vpop.permute.xlu0 %536 }
 0x190   : > { %v543_v44 = vrot.slane %v537_v42, 4  ;;  %v614_v60 = vrot.slane %v607_v41, 4 }
 0x191   : > { %1254 = vrot.lane.b32.xlu1 %v2889_v28, %s3691_s12  ;;  %1220 = vrot.lane.b32.xlu0 %v2895_v29, %s3690_s11 }
 0x192   : > { %v546_v45 = vsel %vm425_vm4, %v542_v43, %v543_v44 }
 0x193   : > { %v2942_v46 = vsel %vm547_vm8, %v535_v33, %v546_v45  ;;  %v643_v47 = vpop.permute.xlu1 %642  ;;  %v2944_v48 = vpop.permute.xlu0 %538 }
 0x194   : > { %v544_v49 = vrot.slane %v2944_v48, 4  ;;  %v650_v13 = vrot.slane %v643_v47, 4 }
 0x195   : > { %1222 = vrot.lane.b32.xlu1 %v2901_v30, %s3690_s11  ;;  %1256 = vrot.lane.b32.xlu0 %v2895_v29, %s3691_s12  ;;  %s2680_s11 = smov 35  }
 0x196   : > { %v549_v50 = vsel %vm425_vm4, %v543_v44, %v544_v49 }
 0x197   : > { %v2955_v51 = vsel %vm547_vm8, %v537_v42, %v549_v50  ;;  %v679_v52 = vpop.permute.xlu1 %678  ;;  %v2957_v53 = vpop.permute.xlu0 %572 }
 0x198   : > { %v579_v55 = vrot.slane %v2957_v53, 4  ;;  %v686_v25 = vrot.slane %v679_v52, 4 }
 0x199   : > { %1290 = vrot.lane.b32.xlu1 %v2889_v28, %s3692_s13  ;;  %1258 = vrot.lane.b32.xlu0 %v2901_v30, %s3691_s12  ;;  %s2575_s12 = sshll.u32 %s3768_s25, 4 }
 0x19a   : > { %v582_v56 = vsel %vm425_vm4, %v578_v54, %v579_v55 }
 0x19b   : > { %v2968_v57 = vsel %vm583_vm9, %v571_v35, %v582_v56  ;;  %v715_v58 = vpop.permute.xlu1 %714  ;;  %v609_v59 = vpop.permute.xlu0 %608 }
 0x19c   : > { %v615_v61 = vrot.slane %v609_v59, 4  ;;  %v722_v43 = vrot.slane %v715_v58, 4 }
 0x19d   : > { %1326 = vrot.lane.b32.xlu1 %v2889_v28, %s2680_s11  ;;  %1292 = vrot.lane.b32.xlu0 %v2895_v29, %s3692_s13 }
 0x19e   : > { %v618_v62 = vsel %vm425_vm4, %v614_v60, %v615_v61 }
 0x19f   : > { %v2976_v63 = vsel %vm619_vm10, %v607_v41, %v618_v62  ;;  %v751_v0 = vpop.permute.xlu1 %750  ;;  %v2978_v2 = vpop.permute.xlu0 %610 }
 0x1a0   : > { %v616_v3 = vrot.slane %v2978_v2, 4 }
 0x1a1   : > { %1294 = vrot.lane.b32.xlu1 %v2901_v30, %s3692_s13  ;;  %1328 = vrot.lane.b32.xlu0 %v2895_v29, %s2680_s11 }
 0x1a2   : > { %v621_v5 = vsel %vm425_vm4, %v615_v61, %v616_v3 }
 0x1a3   : > { %v2989_v6 = vsel %vm619_vm10, %v609_v59, %v621_v5  ;;  %v2991_v7 = vpop.permute.xlu1 %786  ;;  %v2993_v8 = vpop.permute.xlu0 %644 }
 0x1a4   : > { %v651_v14 = vrot.slane %v2993_v8, 4 }
 0x1a5   : > { %1362 = vrot.lane.b32.xlu1 %v2889_v28, %s2681_s9  ;;  %1330 = vrot.lane.b32.xlu0 %v2901_v30, %s2680_s11 }
 0x1a6   : > { %v654_v17 = vsel %vm425_vm4, %v650_v13, %v651_v14 }
 0x1a7   : > { %v3013_v18 = vsel %vm655_vm11, %v643_v47, %v654_v17  ;;  %v823_v19 = vpop.permute.xlu1 %822  ;;  %v681_v20 = vpop.permute.xlu0 %680  ;;  %v794_v17 = vrot.slane %v2991_v7, 4 }
 0x1a8   : > { %v687_v26 = vrot.slane %v681_v20, 4 }
 0x1a9   : > { %468 = vrot.lane.b32.xlu1 %v3015_v27, %s2657_s15  ;;  %1364 = vrot.lane.b32.xlu0 %v2895_v29, %s2681_s9  ;;  %s3722_s15 = smov 54  }
 0x1aa   : > { %v690_v28 = vsel %vm425_vm4, %v686_v25, %v687_v26 }
 0x1ab   : > { %v3023_v32 = vsel %vm691_vm13, %v679_v52, %v690_v28  ;;  %v3025_v33 = vpop.permute.xlu1 %858  ;;  %v3027_v35 = vpop.permute.xlu0 %682  ;;  %v758_v52 = vrot.slane %v751_v0, 4 }
 0x1ac   : > { %v688_v37 = vrot.slane %v3027_v35, 4  ;;  %v866_v24 = vrot.slane %v3025_v33, 4 }
 0x1ad   : > { %504 = vrot.lane.b32.xlu1 %v3015_v27, %s2656_s14  ;;  %1366 = vrot.lane.b32.xlu0 %v2901_v30, %s2681_s9  ;;  %s3721_s14 = smov 6  }
 0x1ae   : > { %v693_v29 = vsel %vm425_vm4, %v687_v26, %v688_v37 }
 0x1af   : > { %v3038_v39 = vsel %vm691_vm13, %v681_v20, %v693_v29  ;;  %v3040_v41 = vpop.permute.xlu1 %894  ;;  %v3042_v42 = vpop.permute.xlu0 %716 }
 0x1b0   : > { %v723_v44 = vrot.slane %v3042_v42, 4 }
 0x1b1   : > { %576 = vrot.lane.b32.xlu1 %v3015_v27, %s2659_s17  ;;  %540 = vrot.lane.b32.xlu0 %v3015_v27, %s2658_s16  ;;  %s3723_s16 = smov 55   ;;  %s3724_s17 = smov 45  }
 0x1b2   : > { %v726_v30 = vsel %vm425_vm4, %v722_v43, %v723_v44  ;;  %v830_v43 = vrot.slane %v823_v19, 4 }
 0x1b3   : > { %v3053_v45 = vsel %vm727_vm14, %v715_v58, %v726_v30  ;;  %v3055_v47 = vpop.permute.xlu1 %930  ;;  %v753_v50 = vpop.permute.xlu0 %752 }
 0x1b4   : > { %v759_v54 = vrot.slane %v753_v50, 4 }
 0x1b5   : > { %648 = vrot.lane.b32.xlu1 %v3015_v27, %s2661_s19  ;;  %612 = vrot.lane.b32.xlu0 %v3015_v27, %s2660_s18  ;;  %s3725_s18 = smov 46   ;;  %s3726_s19 = smov 36  }
 0x1b6   : > { %v762_v56 = vsel %vm425_vm4, %v758_v52, %v759_v54 }
 0x1b7   : > { %v3063_v59 = vsel %vm763_vm15, %v751_v0, %v762_v56  ;;  %v3065_v60 = vpop.permute.xlu1 %966  ;;  %v3067_v58 = vpop.permute.xlu0 %754  ;;  %v470_v56 = vrot.slane %v2911_v31, 4 }
 0x1b8   : > { %v760_v61 = vrot.slane %v3067_v58, 4 }
 0x1b9   : > { %720 = vrot.lane.b32.xlu1 %v3015_v27, %s2663_s21  ;;  %684 = vrot.lane.b32.xlu0 %v3015_v27, %s2662_s20  ;;  %s3727_s20 = smov 44  }
 0x1ba   : > { %v765_v62 = vsel %vm425_vm4, %v759_v54, %v760_v61 }
 0x1bb   : > { %v3078_v5 = vsel %vm763_vm15, %v753_v50, %v765_v62  ;;  %v3080_v0 = vpop.permute.xlu1 %1002  ;;  %v3082_v13 = vpop.permute.xlu0 %788  ;;  %v472_v62 = vrot.slane %v2917_v34, 4 }
 0x1bc   : > { %v795_v20 = vrot.slane %v3082_v13, 4 }
 0x1bd   : > { %792 = vrot.lane.b32.xlu1 %v3015_v27, %s2665_s23  ;;  %756 = vrot.lane.b32.xlu0 %v3015_v27, %s2664_s22 }
 0x1be   : > { %v798_v25 = vsel %vm425_vm4, %v794_v17, %v795_v20 }
 0x1bf   : > { %v3095_v26 = vsel %vm799_vm0, %v2991_v7, %v798_v25  ;;  %v3097_v28 = vpop.permute.xlu1 %1038  ;;  %v825_v29 = vpop.permute.xlu0 %824 }
 0x1c0   : > { %v831_v30 = vrot.slane %v825_v29, 4 }
 0x1c1   : > { %864 = vrot.lane.b32.xlu1 %v3015_v27, %s2667_s27  ;;  %828 = vrot.lane.b32.xlu0 %v3015_v27, %s2666_s26 }
 0x1c2   : > { %v834_v50 = vsel %vm425_vm4, %v830_v43, %v831_v30 }
 0x1c3   : > { %v3105_v52 = vsel %vm3702_vm1, %v823_v19, %v834_v50  ;;  %v465_v7 = vpop.permute.xlu1 %464  ;;  %v3107_v54 = vpop.permute.xlu0 %826 }
 0x1c4   : > { %v471_v17 = vrot.slane %v465_v7, 4  ;;  %v832_v25 = vrot.slane %v3107_v54, 4 }
 0x1c5   : > { %936 = vrot.lane.b32.xlu1 %v3015_v27, %s2669_s29  ;;  %900 = vrot.lane.b32.xlu0 %v3015_v27, %s2668_s28 }
 0x1c6   : > { %v474_v19 = vsel %vm425_vm4, %v470_v56, %v471_v17  ;;  %v477_v43 = vsel %vm425_vm4, %v471_v17, %v472_v62  ;;  %v837_v50 = vsel %vm425_vm4, %v831_v30, %v832_v25 }
 0x1c7   : > { %v476_v10 = vsel %vm475_vm2, %v2911_v31, %v474_v19  ;;  %v478_v9 = vsel %vm475_vm2, %v465_v7, %v477_v43  ;;  %v3128_v23 = vsel %vm3702_vm1, %v825_v29, %v837_v50  ;;  %v3130_v56 = vpop.permute.xlu1 %502  ;;  %v3132_v21 = vpop.permute.xlu0 %860  ;;  %v2468_v43 = vcombine.high %v2934_v40, %v2942_v46 }
 0x1c8   : > { %v508_v17 = vrot.slane %v3130_v56, 4  ;;  %v867_v12 = vrot.slane %v3132_v21, 4  ;;  %v2461_v30 = vcombine.high %v2786_v22, %v476_v10  ;;  %v2463_v11 = vcombine.high %v2777_v16, %v478_v9 }
 0x1c9   : > { %1008 = vrot.lane.b32.xlu1 %v3015_v27, %s2671_s8  ;;  %972 = vrot.lane.b32.xlu0 %v3015_v27, %s2670_s30  ;;  %v2460_v31 = vcombine.low %v2786_v22, %v476_v10  ;;  %v2462_v29 = vcombine.low %v2777_v16, %v478_v9  ;;  %v902_v50 = vrot.slane %v3040_v41, 4  ;;  %vm3704_vm1 = vcmask 56320   ;;  %s2589_s8 = smul.u32 56, %s3768_s25 }
 0x1ca   : > { %v513_v7 = vsel %vm425_vm4, %v507_v38, %v508_v17  ;;  %v870_v19 = vsel %vm425_vm4, %v866_v24, %v867_v12  ;;  %2032 = vmatprep.subr.bf16.mxu0 %v2461_v30  ;;  %2075 = vmatprep.subr.bf16.mxu1 %v2463_v11  ;;  %v3164_v38 = vld [vmem:[#allocation2 + $0x1c] sm:$0xff] }
 0x1cb   : > { %v514_v9 = vsel %vm511_vm7, %v2923_v36, %v513_v7  ;;  %v3159_v10 = vsel %vm871_vm3, %v3025_v33, %v870_v19  ;;  %v3161_v16 = vpop.permute.xlu1 %574  ;;  %v897_v22 = vpop.permute.xlu0 %896  ;;  %2033 = vmatpush1.bf16.msra.mxu0 %v2460_v31  ;;  %2076 = vmatpush1.bf16.msra.mxu1 %v2462_v29  ;;  %v2467_v33 = vcombine.low %v2934_v40, %v2942_v46 }
 0x1cc   : > { %v580_v11 = vrot.slane %v3161_v16, 4  ;;  %v903_v24 = vrot.slane %v897_v22, 4  ;;  %2034 = vmatprep.subr.bf16.mxu0 %v2468_v43  ;;  %v2470_v30 = vcombine.high %v514_v9, %v2955_v51  ;;  %v2469_v36 = vcombine.low %v514_v9, %v2955_v51 }
 0x1cd   : > { %1080 = vrot.lane.b32.xlu1 %v3164_v38, %s2673_s10  ;;  %1044 = vrot.lane.b32.xlu0 %v3015_v27, %s3721_s14  ;;  %v2475_v51 = vcombine.high %v2968_v57, %v2976_v63 }
 0x1ce   : > { %v585_v31 = vsel %vm425_vm4, %v579_v55, %v580_v11  ;;  %v906_v29 = vsel %vm425_vm4, %v902_v50, %v903_v24  ;;  %2077 = vmatprep.subr.bf16.mxu1 %v2470_v30  ;;  %v938_v30 = vrot.slane %v3055_v47, 4 }
 0x1cf   : > { %v586_v7 = vsel %vm583_vm9, %v2957_v53, %v585_v31  ;;  %v3186_v27 = vsel %vm3701_vm5, %v3040_v41, %v906_v29  ;;  %v3188_v40 = vpop.permute.xlu1 %646  ;;  %v3190_v46 = vpop.permute.xlu0 %898  ;;  %2035 = vmatpush1.bf16.msra.mxu0 %v2467_v33  ;;  %2078 = vmatpush1.bf16.msra.mxu1 %v2469_v36  ;;  %v2474_v53 = vcombine.low %v2968_v57, %v2976_v63 }
 0x1d0   : > { %v652_v55 = vrot.slane %v3188_v40, 4  ;;  %v904_v19 = vrot.slane %v3190_v46, 4  ;;  %2036 = vmatprep.subr.bf16.mxu0 %v2475_v51  ;;  %v2477_v43 = vcombine.high %v586_v7, %v2989_v6  ;;  %v2476_v50 = vcombine.low %v586_v7, %v2989_v6 }
 0x1d1   : > { %1152 = vrot.lane.b32.xlu1 %v3164_v38, %s3722_s15  ;;  %1116 = vrot.lane.b32.xlu0 %v3164_v38, %s3723_s16  ;;  %v2482_v6 = vcombine.high %v3013_v18, %v3023_v32  ;;  %v974_v7 = vrot.slane %v3065_v60, 4  ;;  %s291_s15 = scalar_lea.vmem %s3686_s7, %s2575_s12 }
 0x1d2   : > { %v657_v41 = vsel %vm425_vm4, %v651_v14, %v652_v55  ;;  %v909_v9 = vsel %vm425_vm4, %v903_v24, %v904_v19  ;;  %2079 = vmatprep.subr.bf16.mxu1 %v2477_v43 }
 0x1d3   : > { %v658_v36 = vsel %vm655_vm11, %v2993_v8, %v657_v41  ;;  %v3216_v57 = vsel %vm3701_vm5, %v897_v22, %v909_v9  ;;  %v3218_v63 = vpop.permute.xlu1 %718  ;;  %v3220_v14 = vpop.permute.xlu0 %932  ;;  %2037 = vmatpush1.bf16.msra.mxu0 %v2474_v53  ;;  %2080 = vmatpush1.bf16.msra.mxu1 %v2476_v50  ;;  %v2481_v8 = vcombine.low %v3013_v18, %v3023_v32  ;;  %vm3703_vm5 = vcmask 64512  }
 0x1d4   : > { %v724_v24 = vrot.slane %v3218_v63, 4  ;;  %v939_v33 = vrot.slane %v3220_v14, 4  ;;  %2038 = vmatprep.subr.bf16.mxu0 %v2482_v6  ;;  %v2484_v31 = vcombine.high %v658_v36, %v3038_v39  ;;  %v2483_v29 = vcombine.low %v658_v36, %v3038_v39 }
 0x1d5   : > { %1224 = vrot.lane.b32.xlu1 %v3164_v38, %s3724_s17  ;;  %1188 = vrot.lane.b32.xlu0 %v3164_v38, %s3725_s18  ;;  %v2489_v39 = vcombine.high %v3053_v45, %v3063_v59 }
 0x1d6   : > { %v729_v22 = vsel %vm425_vm4, %v723_v44, %v724_v24  ;;  %v942_v51 = vsel %vm425_vm4, %v938_v30, %v939_v33  ;;  %2081 = vmatprep.subr.bf16.mxu1 %v2484_v31 }
 0x1d7   : > { %v730_v43 = vsel %vm727_vm14, %v3042_v42, %v729_v22  ;;  %v3247_v18 = vsel %vm3706_vm6, %v3055_v47, %v942_v51  ;;  %v3249_v32 = vpop.permute.xlu1 %790  ;;  %v969_v44 = vpop.permute.xlu0 %968  ;;  %2039 = vmatpush1.bf16.msra.mxu0 %v2481_v8  ;;  %2082 = vmatpush1.bf16.msra.mxu1 %v2483_v29  ;;  %v2488_v42 = vcombine.low %v3053_v45, %v3063_v59 }
 0x1d8   : > { %v796_v50 = vrot.slane %v3249_v32, 4  ;;  %v975_v53 = vrot.slane %v969_v44, 4  ;;  %2040 = vmatprep.subr.bf16.mxu0 %v2489_v39  ;;  %v2491_v41 = vcombine.high %v730_v43, %v3078_v5  ;;  %v2490_v9 = vcombine.low %v730_v43, %v3078_v5 }
 0x1d9   : > { %1296 = vrot.lane.b32.xlu1 %v3164_v38, %s3726_s19  ;;  %1260 = vrot.lane.b32.xlu0 %v3164_v38, %s3727_s20  ;;  %v2496_v5 = vcombine.high %v3095_v26, %v3105_v52 }
 0x1da   : > { %v801_v47 = vsel %vm425_vm4, %v795_v20, %v796_v50  ;;  %v978_v6 = vsel %vm425_vm4, %v974_v7, %v975_v53  ;;  %2083 = vmatprep.subr.bf16.mxu1 %v2491_v41 }
 0x1db   : > { %v802_v30 = vsel %vm799_vm0, %v3082_v13, %v801_v47  ;;  %v980_v36 = vsel %vm3703_vm5, %v3065_v60, %v978_v6  ;;  %v3272_v31 = vpop.permute.xlu1 %862  ;;  %v3274_v45 = vpop.permute.xlu0 %970  ;;  %2041 = vmatpush1.bf16.msra.mxu0 %v2488_v42  ;;  %2084 = vmatpush1.bf16.msra.mxu1 %v2490_v9  ;;  %v2495_v60 = vcombine.low %v3095_v26, %v3105_v52  ;;  %v1010_v26 = vrot.slane %v3080_v0, 4 }
 0x1dc   : > { %v868_v59 = vrot.slane %v3272_v31, 4  ;;  %v976_v20 = vrot.slane %v3274_v45, 4  ;;  %2042 = vmatprep.subr.bf16.mxu0 %v2496_v5  ;;  %v2498_v29 = vcombine.high %v802_v30, %v3128_v23  ;;  %v2497_v8 = vcombine.low %v802_v30, %v3128_v23  ;;  %v1500_v23 = vld [vmem:[%s3683_s4] sm:$0xff] }
 0x1dd   : > { %1368 = vrot.lane.b32.xlu1 %v3164_v38, %s2681_s9  ;;  %1332 = vrot.lane.b32.xlu0 %v3164_v38, %s2680_s11  ;;  %v2503_v38 = vcombine.high %v3159_v10, %v3186_v27  ;;  %v2510_v42 = vcombine.high %v3247_v18, %v980_v36  ;;  %v1046_v47 = vrot.slane %v3097_v28, 4  ;;  %s3635_s11 = scalar_lea.vmem %s3685_s6, %s2589_s8 }
 0x1de   : > { %v873_v13 = vsel %vm425_vm4, %v867_v12, %v868_v59  ;;  %v981_v22 = vsel %vm425_vm4, %v975_v53, %v976_v20  ;;  %2085 = vmatprep.subr.bf16.mxu1 %v2498_v29 }
 0x1df   : > { %v874_v52 = vsel %vm871_vm3, %v3132_v21, %v873_v13  ;;  %v982_v51 = vsel %vm3703_vm5, %v969_v44, %v981_v22  ;;  %v3303_v12 = vpop.permute.xlu1 %934  ;;  %v1005_v39 = vpop.permute.xlu0 %1004  ;;  %2043 = vmatpush1.bf16.msra.mxu0 %v2495_v60  ;;  %2086 = vmatpush1.bf16.msra.mxu1 %v2497_v8  ;;  %v2502_v21 = vcombine.low %v3159_v10, %v3186_v27  ;;  %vm3705_vm5 = vcmask 48128  }
 0x1e0   : > { %v940_v7 = vrot.slane %v3303_v12, 4  ;;  %v1011_v43 = vrot.slane %v1005_v39, 4  ;;  %2044 = vmatprep.subr.bf16.mxu0 %v2503_v38  ;;  %v2505_v53 = vcombine.high %v874_v52, %v3216_v57  ;;  %v2504_v41 = vcombine.low %v874_v52, %v3216_v57 }
 0x1e1   : > { %1504 = vperm.xlu0 %2626, %v1500_v23  }
 0x1e2   : > { %v945_v44 = vsel %vm425_vm4, %v939_v33, %v940_v7  ;;  %v1014_v9 = vsel %vm425_vm4, %v1010_v26, %v1011_v43  ;;  %2087 = vmatprep.subr.bf16.mxu1 %v2505_v53  ;;  %v1501_v33 = vld [vmem:[%s3683_s4 + $0x8] sm:$0xff] }
 0x1e3   : > { %v946_v57 = vsel %vm3706_vm6, %v3220_v14, %v945_v44  ;;  %v1016_v6 = vsel %vm3704_vm1, %v3080_v0, %v1014_v9  ;;  %v3322_v10 = vpop.permute.xlu1 %1006  ;;  %v1041_v27 = vpop.permute.xlu0 %1040  ;;  %2045 = vmatpush1.bf16.msra.mxu0 %v2502_v21  ;;  %2088 = vmatpush1.bf16.msra.mxu1 %v2504_v41  ;;  %v2509_v14 = vcombine.low %v3247_v18, %v980_v36  ;;  %vm3711_vm6 = vcmask 441344  }
 0x1e4   : > { %v1012_v5 = vrot.slane %v3322_v10, 4  ;;  %v1047_v30 = vrot.slane %v1041_v27, 4  ;;  %2046 = vmatprep.subr.bf16.mxu0 %v2510_v42  ;;  %v2512_v29 = vcombine.high %v946_v57, %v982_v51  ;;  %v2511_v8 = vcombine.low %v946_v57, %v982_v51  ;;  %1509 = vperm.xlu1 %2627, %v1501_v33  }
 0x1e6   : > { %v1017_v0 = vsel %vm425_vm4, %v1011_v43, %v1012_v5  ;;  %v1050_v60 = vsel %vm425_vm4, %v1046_v47, %v1047_v30  ;;  %2089 = vmatprep.subr.bf16.mxu1 %v2512_v29 }
 0x1e7   : > { %v1018_v13 = vsel %vm3704_vm1, %v1005_v39, %v1017_v0  ;;  %v1052_v22 = vsel %vm3705_vm5, %v3097_v28, %v1050_v60  ;;  %v1075_v23 = vpop.permute.xlu1 %1074  ;;  %v3336_v38 = vpop.permute.xlu0 %1042  ;;  %2047 = vmatpush1.bf16.msra.mxu0 %v2509_v14  ;;  %2090 = vmatpush1.bf16.msra.mxu1 %v2511_v8  ;;  %vm3708_vm1 = vcmask 457728  }
 0x1e8   : > { %v3720_v26 = vrot.slane %v3336_v38, 4  ;;  %v2517_v18 = vcombine.high %v1016_v6, %v1052_v22  ;;  %v2516_v36 = vcombine.low %v1016_v6, %v1052_v22  ;;  %v1082_v28 = vrot.slane %v1075_v23, 4 }
 0x1ea   : > { %v1053_v52 = vsel %vm425_vm4, %v1047_v30, %v3720_v26  ;;  %2048 = vmatprep.subr.bf16.mxu0 %v2517_v18  ;;  %v2645_v26 = vld [vmem:[#allocation3 + $0x10] sm:$0xff] }
 0x1eb   : > { %v1054_v51 = vsel %vm3705_vm5, %v1041_v27, %v1053_v52  ;;  %v1111_v39 = vpop.permute.xlu1 %1110  ;;  %v1077_v43 = vpop.permute.xlu0 %1076  ;;  %2049 = vmatpush1.bf16.msra.mxu0 %v2516_v36  ;;  %vm3707_vm5 = vcmask 449536  }
 0x1ec   : > { %v1083_v53 = vrot.slane %v1077_v43, 4  ;;  %v2519_v41 = vcombine.high %v1018_v13, %v1054_v51  ;;  %v2518_v21 = vcombine.low %v1018_v13, %v1054_v51  ;;  %v1118_v57 = vrot.slane %v1111_v39, 4 }
 0x1ee   : > { %v1086_v44 = vsel %vm425_vm4, %v1082_v28, %v1083_v53  ;;  %2091 = vmatprep.subr.bf16.mxu1 %v2519_v41 }
 0x1ef   : > { %v1088_v9 = vsel %vm3708_vm1, %v1075_v23, %v1086_v44  ;;  %v3345_v42 = vpop.permute.xlu1 %1078  ;;  %v1113_v47 = vpop.permute.xlu0 %1112  ;;  %2092 = vmatpush1.bf16.msra.mxu1 %v2518_v21 }
 0x1f0   : > { %v1084_v6 = vrot.slane %v3345_v42, 4  ;;  %v1119_v27 = vrot.slane %v1113_v47, 4 }
 0x1f2   : > { %v1089_v33 = vsel %vm425_vm4, %v1083_v53, %v1084_v6  ;;  %v1122_v30 = vsel %vm425_vm4, %v1118_v57, %v1119_v27 }
 0x1f3   : > { %v1090_v29 = vsel %vm3708_vm1, %v1077_v43, %v1089_v33  ;;  %v1124_v8 = vsel %vm3707_vm5, %v1111_v39, %v1122_v30  ;;  %v1147_v14 = vpop.permute.xlu1 %1146  ;;  %v3354_v0 = vpop.permute.xlu0 %1114  ;;  %vm3717_vm1 = vcmask 367616  }
 0x1f4   : > { %v3713_v60 = vrot.slane %v3354_v0, 4  ;;  %v2524_v13 = vcombine.high %v1088_v9, %v1124_v8  ;;  %v2523_v22 = vcombine.low %v1088_v9, %v1124_v8  ;;  %v1154_v51 = vrot.slane %v1147_v14, 4 }
 0x1f6   : > { %v1125_v23 = vsel %vm425_vm4, %v1119_v27, %v3713_v60  ;;  %2050 = vmatprep.subr.bf16.mxu0 %v2524_v13 }
 0x1f7   : > { %v1126_v18 = vsel %vm3707_vm5, %v1113_v47, %v1125_v23  ;;  %v1183_v36 = vpop.permute.xlu1 %1182  ;;  %v1149_v52 = vpop.permute.xlu0 %1148  ;;  %2051 = vmatpush1.bf16.msra.mxu0 %v2523_v22  ;;  %vm3709_vm5 = vcmask 375808  }
 0x1f8   : > { %v1155_v39 = vrot.slane %v1149_v52, 4  ;;  %v2526_v43 = vcombine.high %v1090_v29, %v1126_v18  ;;  %v2525_v28 = vcombine.low %v1090_v29, %v1126_v18  ;;  %v1190_v9 = vrot.slane %v1183_v36, 4 }
 0x1fa   : > { %v1158_v53 = vsel %vm425_vm4, %v1154_v51, %v1155_v39  ;;  %2093 = vmatprep.subr.bf16.mxu1 %v2526_v43 }
 0x1fb   : > { %v1160_v41 = vsel %vm3711_vm6, %v1147_v14, %v1158_v53  ;;  %v3363_v21 = vpop.permute.xlu1 %1150  ;;  %v1185_v44 = vpop.permute.xlu0 %1184  ;;  %2094 = vmatpush1.bf16.msra.mxu1 %v2525_v28 }
 0x1fc   : > { %v3716_v47 = vrot.slane %v3363_v21, 4  ;;  %v1191_v57 = vrot.slane %v1185_v44, 4 }
 0x1fe   : > { %v1161_v27 = vsel %vm425_vm4, %v1155_v39, %v3716_v47  ;;  %v1194_v33 = vsel %vm425_vm4, %v1190_v9, %v1191_v57 }
 0x1ff   : > { %v1162_v30 = vsel %vm3711_vm6, %v1149_v52, %v1161_v27  ;;  %v1196_v29 = vsel %vm3709_vm5, %v1183_v36, %v1194_v33  ;;  %v1219_v8 = vpop.permute.xlu1 %1218  ;;  %v3372_v14 = vpop.permute.xlu0 %1186  ;;  %vm1303_vm6 = vcmask 293888  }
 0x200   : > { %v3710_v13 = vrot.slane %v3372_v14, 4  ;;  %v2531_v22 = vcombine.high %v1160_v41, %v1196_v29  ;;  %v2530_v23 = vcombine.low %v1160_v41, %v1196_v29  ;;  %v1226_v52 = vrot.slane %v1219_v8, 4 }
 0x202   : > { %v1197_v18 = vsel %vm425_vm4, %v1191_v57, %v3710_v13  ;;  %2052 = vmatprep.subr.bf16.mxu0 %v2531_v22 }
 0x203   : > { %v1198_v51 = vsel %vm3709_vm5, %v1185_v44, %v1197_v18  ;;  %v1255_v39 = vpop.permute.xlu1 %1254  ;;  %v1221_v43 = vpop.permute.xlu0 %1220  ;;  %2053 = vmatpush1.bf16.msra.mxu0 %v2530_v23  ;;  %vm3714_vm5 = vcmask 359424  }
 0x204   : > { %v1227_v36 = vrot.slane %v1221_v43, 4  ;;  %v2533_v28 = vcombine.high %v1162_v30, %v1198_v51  ;;  %v2532_v53 = vcombine.low %v1162_v30, %v1198_v51  ;;  %v1262_v57 = vrot.slane %v1255_v39, 4 }
 0x206   : > { %v1230_v9 = vsel %vm425_vm4, %v1226_v52, %v1227_v36  ;;  %2095 = vmatprep.subr.bf16.mxu1 %v2533_v28 }
 0x207   : > { %v1232_v41 = vsel %vm3717_vm1, %v1219_v8, %v1230_v9  ;;  %v3381_v27 = vpop.permute.xlu1 %1222  ;;  %v1257_v33 = vpop.permute.xlu0 %1256  ;;  %2096 = vmatpush1.bf16.msra.mxu1 %v2532_v53 }
 0x208   : > { %v3712_v44 = vrot.slane %v3381_v27, 4  ;;  %v1263_v29 = vrot.slane %v1257_v33, 4 }
 0x20a   : > { %v1233_v22 = vsel %vm425_vm4, %v1227_v36, %v3712_v44  ;;  %v1266_v30 = vsel %vm425_vm4, %v1262_v57, %v1263_v29 }
 0x20b   : > { %v1234_v23 = vsel %vm3717_vm1, %v1221_v43, %v1233_v22  ;;  %v1268_v18 = vsel %vm3714_vm5, %v1255_v39, %v1266_v30  ;;  %v1291_v8 = vpop.permute.xlu1 %1290  ;;  %v3390_v51 = vpop.permute.xlu0 %1258  ;;  %vm1375_vm1 = vcmask 277504  }
 0x20c   : > { %v3715_v52 = vrot.slane %v3390_v51, 4  ;;  %v2538_v28 = vcombine.high %v1232_v41, %v1268_v18  ;;  %v2537_v53 = vcombine.low %v1232_v41, %v1268_v18  ;;  %v1298_v43 = vrot.slane %v1291_v8, 4 }
 0x20e   : > { %v1269_v9 = vsel %vm425_vm4, %v1263_v29, %v3715_v52  ;;  %2054 = vmatprep.subr.bf16.mxu0 %v2538_v28 }
 0x20f   : > { %v1270_v36 = vsel %vm3714_vm5, %v1257_v33, %v1269_v9  ;;  %v1327_v13 = vpop.permute.xlu1 %1326  ;;  %v1293_v57 = vpop.permute.xlu0 %1292  ;;  %2055 = vmatpush1.bf16.msra.mxu0 %v2537_v53  ;;  %vm1339_vm5 = vcmask 285696  }
 0x210   : > { %v1299_v39 = vrot.slane %v1293_v57, 4  ;;  %v2540_v22 = vcombine.high %v1234_v23, %v1270_v36  ;;  %v2539_v30 = vcombine.low %v1234_v23, %v1270_v36  ;;  %v1334_v29 = vrot.slane %v1327_v13, 4 }
 0x212   : > { %v1302_v44 = vsel %vm425_vm4, %v1298_v43, %v1299_v39  ;;  %2097 = vmatprep.subr.bf16.mxu1 %v2540_v22 }
 0x213   : > { %v1304_v41 = vsel %vm1303_vm6, %v1291_v8, %v1302_v44  ;;  %v3399_v18 = vpop.permute.xlu1 %1294  ;;  %v1329_v60 = vpop.permute.xlu0 %1328  ;;  %2098 = vmatpush1.bf16.msra.mxu1 %v2539_v30 }
 0x214   : > { %v3718_v33 = vrot.slane %v3399_v18, 4  ;;  %v1335_v28 = vrot.slane %v1329_v60, 4 }
 0x216   : > { %v1305_v53 = vsel %vm425_vm4, %v1299_v39, %v3718_v33  ;;  %v1338_v23 = vsel %vm425_vm4, %v1334_v29, %v1335_v28 }
 0x217   : > { %v1306_v9 = vsel %vm1303_vm6, %v1293_v57, %v1305_v53  ;;  %v1340_v36 = vsel %vm1339_vm5, %v1327_v13, %v1338_v23  ;;  %v1363_v44 = vpop.permute.xlu1 %1362  ;;  %v3408_v8 = vpop.permute.xlu0 %1330 }
 0x218   : > { %v3719_v43 = vrot.slane %v3408_v8, 4  ;;  %v2545_v22 = vcombine.high %v1304_v41, %v1340_v36  ;;  %v2544_v30 = vcombine.low %v1304_v41, %v1340_v36  ;;  %v1370_v47 = vrot.slane %v1363_v44, 4 }
 0x21a   : > { %v1341_v52 = vsel %vm425_vm4, %v1335_v28, %v3719_v43  ;;  %2056 = vmatprep.subr.bf16.mxu0 %v2545_v22 }
 0x21b   : > { %v1342_v39 = vsel %vm1339_vm5, %v1329_v60, %v1341_v52  ;;  %v469_v29 = vpop.permute.xlu1 %468  ;;  %v1365_v57 = vpop.permute.xlu0 %1364  ;;  %2057 = vmatpush1.bf16.msra.mxu0 %v2544_v30 }
 0x21c   : > { %v473_v13 = vrot.slane %v469_v29, 4  ;;  %v1371_v53 = vrot.slane %v1365_v57, 4  ;;  %v2547_v23 = vcombine.high %v1306_v9, %v1342_v39  ;;  %v2546_v33 = vcombine.low %v1306_v9, %v1342_v39 }
 0x21e   : > { %v479_v41 = vsel %vm425_vm4, %v472_v62, %v473_v13  ;;  %v481_v36 = vsel %vm475_vm2, %v469_v29, %v473_v13  ;;  %v1374_v28 = vsel %vm425_vm4, %v1370_v47, %v1371_v53  ;;  %2099 = vmatprep.subr.bf16.mxu1 %v2547_v23  ;;  %v3438_v13 = vld [vmem:[%s3682_s3] ss:$8 sps:$4 sm:$0xff]  }
 0x21f   : > { %v480_v60 = vsel %vm475_vm2, %v2917_v34, %v479_v41  ;;  %489 = vst [vmem:[#allocation3 + $0x34] sm:$0xf] %v481_v36  ;;  %v1376_v52 = vsel %vm1375_vm1, %v1363_v44, %v1374_v28  ;;  %v505_v22 = vpop.permute.xlu1 %504  ;;  %v3423_v30 = vpop.permute.xlu0 %1366  ;;  %2100 = vmatpush1.bf16.msra.mxu1 %v2546_v33  ;;  %vm3738_vm2 = vcmask 457728  }
 0x220   : > { %v509_v9 = vrot.slane %v505_v22, 4  ;;  %v1372_v39 = vrot.slane %v3423_v30, 4  ;;  %v2552_v43 = vcombine.high %v1376_v52, %v1376_v52  ;;  %v2551_v62 = vcombine.low %v1376_v52, %v1376_v52 }
 0x221   : > { %v2465_v29 = vcombine.high %v2645_v26, %v480_v60 }
 0x222   : > { %v515_v47 = vsel %vm425_vm4, %v508_v17, %v509_v9  ;;  %v517_v34 = vsel %vm511_vm7, %v505_v22, %v509_v9  ;;  %v1377_v44 = vsel %vm425_vm4, %v1371_v53, %v1372_v39  ;;  %2558 = vmatprep.subr.msk.bf16.mxu0 %vm425_vm4, %v2552_v43  ;;  %v2012_v33 = vsel %vm425_vm4, %v2551_v62, 0 }
 0x223   : > { %v516_v23 = vsel %vm511_vm7, %v3130_v56, %v515_v47  ;;  %525 = vst [vmem:[#allocation3 + $0x50] sm:$0xf] %v517_v34  ;;  %v1378_v17 = vsel %vm1375_vm1, %v1365_v57, %v1377_v44  ;;  %v577_v41 = vpop.permute.xlu1 %576  ;;  %v541_v36 = vpop.permute.xlu0 %540  ;;  %2059 = vmatpush1.bf16.msra.mxu0 %v2012_v33  ;;  %v2464_v22 = vcombine.low %v2645_v26, %v480_v60  ;;  %vm3728_vm7 = vcmask 211968  }
 0x224   : > { %v581_v28 = vrot.slane %v577_v41, 4  ;;  %v545_v53 = vrot.slane %v541_v36, 4  ;;  %2118 = vmatprep.subr.bf16.mxu0 %v2465_v29  ;;  %v2554_v43 = vcombine.high %v1378_v17, %v1378_v17  ;;  %v2553_v52 = vcombine.low %v1378_v17, %v1378_v17 }
 0x226   : > { %v587_v9 = vsel %vm425_vm4, %v580_v11, %v581_v28  ;;  %v589_v62 = vsel %vm583_vm9, %v577_v41, %v581_v28  ;;  %v551_v56 = vsel %vm425_vm4, %v544_v49, %v545_v53  ;;  %v553_v57 = vsel %vm547_vm8, %v541_v36, %v545_v53  ;;  %2065 = vmatmul.mubr.bf16.vlgmr.msra.gmra.mrb[0].mxu0 %v3438_v13  ;;  %v2631_v36 = vld [vmem:[#allocation3 + $0x18] ss:$28 sps:$4 sm:$0xff]  }
 0x227   : > { %v588_v29 = vsel %vm583_vm9, %v3161_v16, %v587_v9  ;;  %597 = vst [vmem:[#allocation3 + $0x88] sm:$0xf] %v589_v62  ;;  %v552_v26 = vsel %vm547_vm8, %v2944_v48, %v551_v56  ;;  %561 = vst [vmem:[#allocation3 + $0x6c] sm:$0xf] %v553_v57  ;;  %v649_v60 = vpop.permute.xlu1 %648  ;;  %v613_v11 = vpop.permute.xlu0 %612  ;;  %2560 = vmatprep.subr.msk.bf16.mxu1 %vm425_vm4, %v2554_v43  ;;  %v2018_v47 = vsel %vm425_vm4, %v2553_v52, 0  ;;  %2119 = vmatpush1.bf16.msra.mxu0 %v2464_v22  ;;  %vm3730_vm9 = vcmask 130048  }
 0x228   : > { %v653_v49 = vrot.slane %v649_v60, 4  ;;  %v617_v34 = vrot.slane %v613_v11, 4  ;;  %2102 = vmatpush1.bf16.msra.mxu1 %v2018_v47  ;;  %v2471_v44 = vcombine.low %v516_v23, %v552_v26  ;;  %v2472_v33 = vcombine.high %v516_v23, %v552_v26  ;;  %2563 = vmatprep.mubr.msk.bf16.mxu0 %vm2007_vm12, %v2999_v15  ;;  %vm3729_vm8 = vmmov %vm3728_vm7 }
 0x229   : > { %2161 = vmatprep.subr.bf16.mxu1 %v2654_v1 }
 0x22a   : > { %v659_v48 = vsel %vm425_vm4, %v652_v55, %v653_v49  ;;  %v661_v16 = vsel %vm655_vm11, %v649_v60, %v653_v49  ;;  %v623_v17 = vsel %vm425_vm4, %v616_v3, %v617_v34  ;;  %v625_v41 = vsel %vm619_vm10, %v613_v11, %v617_v34  ;;  %2120 = vmatprep.subr.bf16.mxu0 %v2472_v33 }
 0x22b   : > { %v660_v23 = vsel %vm655_vm11, %v3188_v40, %v659_v48  ;;  %669 = vst [vmem:[#allocation3 + $0xc0] sm:$0xf] %v661_v16  ;;  %v624_v28 = vsel %vm619_vm10, %v2978_v2, %v623_v17  ;;  %633 = vst [vmem:[#allocation3 + $0xa4] sm:$0xf] %v625_v41  ;;  %v721_v53 = vpop.permute.xlu1 %720  ;;  %v685_v55 = vpop.permute.xlu0 %684  ;;  %2108 = vmatmul.mubr.bf16.vlgmr.msra.gmra.mrb[0].mxu1 %v3438_v13  ;;  %2121 = vmatpush1.bf16.msra.mxu0 %v2471_v44  ;;  %vm3731_vm10 = vcmask 138240  }
 0x22c   : > { %v725_v43 = vrot.slane %v721_v53, 4  ;;  %v689_v52 = vrot.slane %v685_v55, 4  ;;  %2162 = vmatpush1.bf16.msra.mxu1 %v2631_v36  ;;  %v2478_v3 = vcombine.low %v588_v29, %v624_v28  ;;  %v2479_v22 = vcombine.high %v588_v29, %v624_v28  ;;  %2564 = vmatprep.mubr.msk.bf16.mxu1 %vm2007_vm12, %v2999_v15  ;;  %vm3732_vm11 = vmmov %vm3730_vm9 }
 0x22d   : > { %2163 = vmatprep.subr.bf16.mxu1 %v2654_v1  ;;  %vm3733_vm12 = vmmov %vm3731_vm10 }
 0x22e   : > { %v731_v2 = vsel %vm425_vm4, %v724_v24, %v725_v43  ;;  %v733_v40 = vsel %vm727_vm14, %v721_v53, %v725_v43  ;;  %v695_v9 = vsel %vm425_vm4, %v688_v37, %v689_v52  ;;  %v697_v62 = vsel %vm691_vm13, %v685_v55, %v689_v52  ;;  %2122 = vmatprep.subr.bf16.mxu0 %v2479_v22  ;;  %v2632_v56 = vld [vmem:[#allocation3 + $0x50] ss:$28 sps:$4 sm:$0xff]  }
 0x22f   : > { %v732_v57 = vsel %vm727_vm14, %v3218_v63, %v731_v2  ;;  %741 = vst [vmem:[#allocation3 + $0xf8] sm:$0xf] %v733_v40  ;;  %v696_v15 = vsel %vm691_vm13, %v3027_v35, %v695_v9  ;;  %705 = vst [vmem:[#allocation3 + $0xdc] sm:$0xf] %v697_v62  ;;  %v793_v29 = vpop.permute.xlu1 %792  ;;  %v757_v24 = vpop.permute.xlu0 %756  ;;  %2123 = vmatpush1.bf16.msra.mxu0 %v2478_v3  ;;  %vm3734_vm13 = vcmask 56320   ;;  %vm3735_vm14 = vcmask 64512  }
 0x230   : > { %v797_v26 = vrot.slane %v793_v29, 4  ;;  %v761_v60 = vrot.slane %v757_v24, 4  ;;  %2164 = vmatpush1.bf16.msra.mxu1 %v2632_v56  ;;  %v2485_v11 = vcombine.low %v660_v23, %v696_v15  ;;  %v2486_v37 = vcombine.high %v660_v23, %v696_v15 }
 0x231   : > { %2165 = vmatprep.subr.bf16.mxu1 %v2654_v1 }
 0x232   : > { %v803_v47 = vsel %vm425_vm4, %v796_v50, %v797_v26  ;;  %v805_v63 = vsel %vm799_vm0, %v793_v29, %v797_v26  ;;  %v767_v35 = vsel %vm425_vm4, %v760_v61, %v761_v60  ;;  %v769_v49 = vsel %vm763_vm15, %v757_v24, %v761_v60  ;;  %2124 = vmatprep.subr.bf16.mxu0 %v2486_v37  ;;  %v2633_v34 = vld [vmem:[#allocation3 + $0x88] ss:$28 sps:$4 sm:$0xff]  }
 0x233   : > { %v804_v44 = vsel %vm799_vm0, %v3249_v32, %v803_v47  ;;  %813 = vst [vmem:[#allocation3 + $0x130] sm:$0xf] %v805_v63  ;;  %v768_v33 = vsel %vm763_vm15, %v3067_v58, %v767_v35  ;;  %777 = vst [vmem:[#allocation3 + $0x114] sm:$0xf] %v769_v49  ;;  %v865_v48 = vpop.permute.xlu1 %864  ;;  %v829_v50 = vpop.permute.xlu0 %828  ;;  %2125 = vmatpush1.bf16.msra.mxu0 %v2485_v11 }
 0x234   : > { %v869_v16 = vrot.slane %v865_v48, 4  ;;  %v833_v17 = vrot.slane %v829_v50, 4  ;;  %2166 = vmatpush1.bf16.msra.mxu1 %v2633_v34  ;;  %v2492_v41 = vcombine.low %v732_v57, %v768_v33  ;;  %v2493_v61 = vcombine.high %v732_v57, %v768_v33  ;;  %vm3736_vm15 = vmmov %vm3734_vm13 }
 0x235   : > { %2167 = vmatprep.subr.bf16.mxu1 %v2654_v1  ;;  %vm3737_vm0 = vmmov %vm3735_vm14  ;;  %v3739_v33 = vrot.slane %v3336_v38, 4 }
 0x236   : > { %v875_v36 = vsel %vm425_vm4, %v868_v59, %v869_v16  ;;  %v877_v32 = vsel %vm871_vm3, %v865_v48, %v869_v16  ;;  %v839_v58 = vsel %vm425_vm4, %v832_v25, %v833_v17  ;;  %v841_v23 = vsel %vm3728_vm7, %v829_v50, %v833_v17  ;;  %2126 = vmatprep.subr.bf16.mxu0 %v2493_v61  ;;  %v2634_v28 = vld [vmem:[#allocation3 + $0xc0] ss:$28 sps:$4 sm:$0xff]   ;;  %vm3741_vm7 = vmmov %vm3738_vm2 }
 0x237   : > { %v876_v53 = vsel %vm871_vm3, %v3272_v31, %v875_v36  ;;  %885 = vst [vmem:[#allocation3 + $0x168] sm:$0xf] %v877_v32  ;;  %v840_v55 = vsel %vm3729_vm8, %v3107_v54, %v839_v58  ;;  %849 = vst [vmem:[#allocation3 + $0x14c] sm:$0xf] %v841_v23  ;;  %v937_v43 = vpop.permute.xlu1 %936  ;;  %v901_v59 = vpop.permute.xlu0 %900  ;;  %2127 = vmatpush1.bf16.msra.mxu0 %v2492_v41  ;;  %vm3740_vm3 = vcmask 48128   ;;  %v3743_v23 = vrot.slane %v3363_v21, 4 }
 0x238   : > { %v941_v52 = vrot.slane %v937_v43, 4  ;;  %v905_v3 = vrot.slane %v901_v59, 4  ;;  %2168 = vmatpush1.bf16.msra.mxu1 %v2634_v28  ;;  %v2499_v22 = vcombine.low %v804_v44, %v840_v55  ;;  %v2500_v25 = vcombine.high %v804_v44, %v840_v55  ;;  %vm3742_vm8 = vmmov %vm3740_vm3 }
 0x239   : > { %2169 = vmatprep.subr.bf16.mxu1 %v2654_v1 }
 0x23a   : > { %v947_v2 = vsel %vm425_vm4, %v940_v7, %v941_v52  ;;  %v949_v31 = vsel %vm3730_vm9, %v937_v43, %v941_v52  ;;  %v911_v54 = vsel %vm425_vm4, %v904_v19, %v905_v3  ;;  %v913_v40 = vsel %vm3731_vm10, %v901_v59, %v905_v3  ;;  %2128 = vmatprep.subr.bf16.mxu0 %v2500_v25  ;;  %v2635_v9 = vld [vmem:[#allocation3 + $0xf8] ss:$28 sps:$4 sm:$0xff]  }
 0x23b   : > { %v948_v62 = vsel %vm3732_vm11, %v3303_v12, %v947_v2  ;;  %957 = vst [vmem:[#allocation3 + $0x1a0] sm:$0xf] %v949_v31  ;;  %v912_v56 = vsel %vm3733_vm12, %v3190_v46, %v911_v54  ;;  %921 = vst [vmem:[#allocation3 + $0x184] sm:$0xf] %v913_v40  ;;  %v1009_v57 = vpop.permute.xlu1 %1008  ;;  %v973_v7 = vpop.permute.xlu0 %972  ;;  %2129 = vmatpush1.bf16.msra.mxu0 %v2499_v22  ;;  %vm3744_vm9 = vcmask 441344   ;;  %vm3746_vm10 = vcmask 449536  }
 0x23c   : > { %v1013_v15 = vrot.slane %v1009_v57, 4  ;;  %v977_v29 = vrot.slane %v973_v7, 4  ;;  %2170 = vmatpush1.bf16.msra.mxu1 %v2635_v9  ;;  %v2506_v24 = vcombine.low %v876_v53, %v912_v56  ;;  %v2507_v19 = vcombine.high %v876_v53, %v912_v56  ;;  %vm3747_vm11 = vmmov %vm3744_vm9 }
 0x23d   : > { %2171 = vmatprep.subr.bf16.mxu1 %v2654_v1  ;;  %v3745_v53 = vrot.slane %v3354_v0, 4  ;;  %vm3748_vm12 = vmmov %vm3746_vm10  ;;  %v3749_v40 = vrot.slane %v3381_v27, 4 }
 0x23e   : > { %v1019_v26 = vsel %vm425_vm4, %v1012_v5, %v1013_v15  ;;  %v1021_v12 = vsel %vm3734_vm13, %v1009_v57, %v1013_v15  ;;  %v983_v46 = vsel %vm425_vm4, %v976_v20, %v977_v29  ;;  %v985_v60 = vsel %vm3735_vm14, %v973_v7, %v977_v29  ;;  %2130 = vmatprep.subr.bf16.mxu0 %v2507_v19  ;;  %v2636_v11 = vld [vmem:[#allocation3 + $0x130] ss:$28 sps:$4 sm:$0xff]  }
 0x23f   : > { %v1020_v37 = vsel %vm3736_vm15, %v3322_v10, %v1019_v26  ;;  %1029 = vst [vmem:[#allocation3 + $0x1d8] sm:$0xf] %v1021_v12  ;;  %v984_v47 = vsel %vm3737_vm0, %v3274_v45, %v983_v46  ;;  %993 = vst [vmem:[#allocation3 + $0x1bc] sm:$0xf] %v985_v60  ;;  %v1081_v63 = vpop.permute.xlu1 %1080  ;;  %v1045_v5 = vpop.permute.xlu0 %1044  ;;  %2131 = vmatpush1.bf16.msra.mxu0 %v2506_v24  ;;  %vm3750_vm13 = vcmask 367616   ;;  %vm3752_vm14 = vcmask 375808  }
 0x240   : > { %v1085_v35 = vrot.slane %v1081_v63, 4  ;;  %v1049_v49 = vrot.slane %v1045_v5, 4  ;;  %2172 = vmatpush1.bf16.msra.mxu1 %v2636_v11  ;;  %v2513_v34 = vcombine.low %v948_v62, %v984_v47  ;;  %v2514_v20 = vcombine.high %v948_v62, %v984_v47  ;;  %vm3753_vm15 = vmmov %vm3750_vm13 }
 0x241   : > { %2173 = vmatprep.subr.bf16.mxu1 %v2654_v1  ;;  %v3751_v62 = vrot.slane %v3372_v14, 4  ;;  %vm3754_vm0 = vmmov %vm3752_vm14  ;;  %v3755_v60 = vrot.slane %v3399_v18, 4 }
 0x242   : > { %v1091_v44 = vsel %vm425_vm4, %v1084_v6, %v1085_v35  ;;  %v1093_v10 = vsel %vm3738_vm2, %v1081_v63, %v1085_v35  ;;  %v1055_v45 = vsel %vm425_vm4, %v3739_v33, %v1049_v49  ;;  %v1057_v48 = vsel %vm3740_vm3, %v1045_v5, %v1049_v49  ;;  %2132 = vmatprep.subr.bf16.mxu0 %v2514_v20  ;;  %v2637_v50 = vld [vmem:[#allocation3 + $0x168] ss:$28 sps:$4 sm:$0xff]  }
 0x243   : > { %v1092_v16 = vsel %vm3741_vm7, %v3345_v42, %v1091_v44  ;;  %1101 = vst [vmem:[#allocation3 + $0x210] sm:$0xf] %v1093_v10  ;;  %v1056_v17 = vsel %vm3742_vm8, %v3336_v38, %v1055_v45  ;;  %1065 = vst [vmem:[#allocation3 + $0x1f4] sm:$0xf] %v1057_v48  ;;  %v1153_v41 = vpop.permute.xlu1 %1152  ;;  %v1117_v6 = vpop.permute.xlu0 %1116  ;;  %2133 = vmatpush1.bf16.msra.mxu0 %v2513_v34  ;;  %vm3757_vm2 = vcmask 359424   ;;  %v3759_v48 = vrot.slane %v3408_v8, 4 }
 0x244   : > { %v1157_v61 = vrot.slane %v1153_v41, 4  ;;  %v1121_v36 = vrot.slane %v1117_v6, 4  ;;  %2174 = vmatpush1.bf16.msra.mxu1 %v2637_v50  ;;  %v2520_v32 = vcombine.low %v1020_v37, %v1056_v17  ;;  %v2521_v58 = vcombine.high %v1020_v37, %v1056_v17  ;;  %vm3758_vm3 = vmmov %vm3757_vm2 }
 0x245   : > { %2175 = vmatprep.subr.bf16.mxu1 %v2654_v1  ;;  %v3756_v37 = vrot.slane %v3390_v51, 4 }
 0x246   : > { %v1163_v28 = vsel %vm425_vm4, %v3743_v23, %v1157_v61  ;;  %v1165_v42 = vsel %vm3744_vm9, %v1153_v41, %v1157_v61  ;;  %v1127_v38 = vsel %vm425_vm4, %v3745_v53, %v1121_v36  ;;  %v1129_v55 = vsel %vm3746_vm10, %v1117_v6, %v1121_v36  ;;  %2134 = vmatprep.subr.bf16.mxu0 %v2521_v58  ;;  %v2638_v43 = vld [vmem:[#allocation3 + $0x1a0] ss:$28 sps:$4 sm:$0xff]  }
 0x247   : > { %v1164_v59 = vsel %vm3747_vm11, %v3363_v21, %v1163_v28  ;;  %1173 = vst [vmem:[#allocation3 + $0x248] sm:$0xf] %v1165_v42  ;;  %v1128_v52 = vsel %vm3748_vm12, %v3354_v0, %v1127_v38  ;;  %1137 = vst [vmem:[#allocation3 + $0x22c] sm:$0xf] %v1129_v55  ;;  %v1225_v3 = vpop.permute.xlu1 %1224  ;;  %v1189_v22 = vpop.permute.xlu0 %1188  ;;  %2135 = vmatpush1.bf16.msra.mxu0 %v2520_v32  ;;  %v3617_v28 = vld [vmem:[%s3684_s5] sm:$0xff]  ;;  %v3760_v53 = vsub.s32 0, %v2747_v4 }
 0x248   : > { %v1229_v25 = vrot.slane %v1225_v3, 4  ;;  %v1193_v2 = vrot.slane %v1189_v22, 4  ;;  %2176 = vmatpush1.bf16.msra.mxu1 %v2638_v43  ;;  %v2527_v31 = vcombine.low %v1092_v16, %v1128_v52  ;;  %v2528_v54 = vcombine.high %v1092_v16, %v1128_v52 }
 0x249   : > { %2177 = vmatprep.subr.bf16.mxu1 %v2654_v1  ;;  %v2259_v38 = vrot.slane %v3617_v28, %v3760_v53  ;;  %v3761_v55 = vsub.s32 1, %v2747_v4 }
 0x24a   : > { %v1235_v9 = vsel %vm425_vm4, %v3749_v40, %v1229_v25  ;;  %v1237_v21 = vsel %vm3750_vm13, %v1225_v3, %v1229_v25  ;;  %v1199_v0 = vsel %vm425_vm4, %v3751_v62, %v1193_v2  ;;  %v1201_v56 = vsel %vm3752_vm14, %v1189_v22, %v1193_v2  ;;  %2136 = vmatprep.subr.bf16.mxu0 %v2528_v54  ;;  %v2639_v57 = vld [vmem:[#allocation3 + $0x1d8] ss:$28 sps:$4 sm:$0xff]  }
 0x24b   : > { %v1236_v7 = vsel %vm3753_vm15, %v3381_v27, %v1235_v9  ;;  %1245 = vst [vmem:[#allocation3 + $0x280] sm:$0xf] %v1237_v21  ;;  %v1200_v15 = vsel %vm3754_vm0, %v3372_v14, %v1199_v0  ;;  %1209 = vst [vmem:[#allocation3 + $0x264] sm:$0xf] %v1201_v56  ;;  %v1297_v29 = vpop.permute.xlu1 %1296  ;;  %v1261_v24 = vpop.permute.xlu0 %1260  ;;  %2137 = vmatpush1.bf16.msra.mxu0 %v2527_v31  ;;  %v2263_v43 = vrot.slane %v3617_v28, %v3761_v55 }
 0x24c   : > { %v1301_v19 = vrot.slane %v1297_v29, 4  ;;  %v1265_v26 = vrot.slane %v1261_v24, 4  ;;  %2178 = vmatpush1.bf16.msra.mxu1 %v2639_v57  ;;  %v2534_v12 = vcombine.low %v1164_v59, %v1200_v15  ;;  %v2535_v46 = vcombine.high %v1164_v59, %v1200_v15 }
 0x24d   : > { %2179 = vmatprep.subr.bf16.mxu1 %v2654_v1  ;;  %v3762_v56 = vsub.s32 2, %v2747_v4 }
 0x24e   : > { %v1307_v11 = vsel %vm425_vm4, %v3755_v60, %v1301_v19  ;;  %v1309_v27 = vsel %vm1303_vm6, %v1297_v29, %v1301_v19  ;;  %v1271_v14 = vsel %vm425_vm4, %v3756_v37, %v1265_v26  ;;  %v1273_v47 = vsel %vm3757_vm2, %v1261_v24, %v1265_v26  ;;  %2138 = vmatprep.subr.bf16.mxu0 %v2535_v46  ;;  %v2640_v63 = vld [vmem:[#allocation3 + $0x210] ss:$28 sps:$4 sm:$0xff]  }
 0x24f   : > { %v1308_v5 = vsel %vm1303_vm6, %v3399_v18, %v1307_v11  ;;  %1317 = vst [vmem:[#allocation3 + $0x2b8] sm:$0xf] %v1309_v27  ;;  %v1272_v35 = vsel %vm3758_vm3, %v3390_v51, %v1271_v14  ;;  %1281 = vst [vmem:[#allocation3 + $0x29c] sm:$0xf] %v1273_v47  ;;  %v1369_v49 = vpop.permute.xlu1 %1368  ;;  %v1333_v34 = vpop.permute.xlu0 %1332  ;;  %2139 = vmatpush1.bf16.msra.mxu0 %v2534_v12  ;;  %v2267_v57 = vrot.slane %v3617_v28, %v3762_v56 }
 0x250   : > { %v1373_v20 = vrot.slane %v1369_v49, 4  ;;  %v1337_v44 = vrot.slane %v1333_v34, 4  ;;  %2180 = vmatpush1.bf16.msra.mxu1 %v2640_v63  ;;  %v2541_v10 = vcombine.low %v1236_v7, %v1272_v35  ;;  %v2542_v33 = vcombine.high %v1236_v7, %v1272_v35 }
 0x251   : > { %2181 = vmatprep.subr.bf16.mxu1 %v2654_v1  ;;  %v3763_v7 = vsub.s32 3, %v2747_v4 }
 0x252   : > { %v1379_v45 = vsel %vm425_vm4, %v1372_v39, %v1373_v20  ;;  %v1381_v18 = vsel %vm1375_vm1, %v1369_v49, %v1373_v20  ;;  %v1343_v51 = vsel %vm425_vm4, %v3759_v48, %v1337_v44  ;;  %v1345_v50 = vsel %vm1339_vm5, %v1333_v34, %v1337_v44  ;;  %2140 = vmatprep.subr.bf16.mxu0 %v2542_v33  ;;  %v2641_v16 = vld [vmem:[#allocation3 + $0x248] ss:$28 sps:$4 sm:$0xff]  }
 0x253   : > { %v1380_v17 = vsel %vm1375_vm1, %v3423_v30, %v1379_v45  ;;  %1389 = vst [vmem:[#allocation3 + $0x2f0] sm:$0xf] %v1381_v18  ;;  %v1344_v41 = vsel %vm1339_vm5, %v3408_v8, %v1343_v51  ;;  %1353 = vst [vmem:[#allocation3 + $0x2d4] sm:$0xf] %v1345_v50  ;;  %2141 = vmatpush1.bf16.msra.mxu0 %v2541_v10  ;;  %v2271_v15 = vrot.slane %v3617_v28, %v3763_v7  ;;  %vm2354_vm1 = vcmask 15368  }
 0x254   : > { %2182 = vmatpush1.bf16.msra.mxu1 %v2641_v16  ;;  %v2548_v39 = vcombine.low %v1308_v5, %v1344_v41  ;;  %v2549_v6 = vcombine.high %v1308_v5, %v1344_v41  ;;  %v2555_v61 = vcombine.low %v1380_v17, %v1380_v17  ;;  %v2556_v32 = vcombine.high %v1380_v17, %v1380_v17 }
 0x255   : > { %2183 = vmatprep.subr.bf16.mxu1 %v2654_v1 }
 0x256   : > { %2142 = vmatprep.subr.bf16.mxu0 %v2549_v6  ;;  %v2642_v36 = vld [vmem:[#allocation3 + $0x280] ss:$28 sps:$4 sm:$0xff]   ;;  %v2024_v8 = vsel %vm425_vm4, %v2555_v61, 0 }
 0x257   : > { %2143 = vmatpush1.bf16.msra.mxu0 %v2548_v39 }
 0x258   : > { %2184 = vmatpush1.bf16.msra.mxu1 %v2642_v36  ;;  %2562 = vmatprep.subr.msk.bf16.mxu0 %vm425_vm4, %v2556_v32 }
 0x259   : > { %2185 = vmatprep.subr.bf16.mxu1 %v2654_v1 }
 0x25a   : > { %v2643_v30 = vld [vmem:[#allocation3 + $0x2b8] ss:$28 sps:$4 sm:$0xff]   ;;  %v2644_v58 = vld [vmem:[#allocation3 + $0x2f0] ss:$0 sps:$4 sm:$0xff]  }
 0x25b   : > { %2145 = vmatpush1.bf16.msra.mxu0 %v2024_v8  ;;  %v2030_v23 = vsel %vm425_vm4, %v2644_v58, 0  ;;  %v3764_v8 = vsub.s32 4, %v2747_v4  ;;  %vm2321_vm4 = vcmask 7168  }
 0x25c   : > { %2186 = vmatpush1.bf16.msra.mxu1 %v2643_v30 }
 0x25d   : > { %2187 = vmatprep.subr.bf16.mxu1 %v2654_v1  ;;  %v2275_v30 = vrot.slane %v3617_v28, %v3764_v8 }
 0x25e   : > { %2151 = vmatmul.mubr.bf16.vlgmr.msra.gmra.mrb[4].mxu0 %v3438_v13 }
 0x260   : > { %2188 = vmatpush1.bf16.msra.mxu1 %v2030_v23  ;;  %v3619_v42 = vpop.permute.xlu0 %1504  ;;  %v3765_v23 = vsub.s32 5, %v2747_v4 }
 0x262   : > { %v2279_v53 = vrot.slane %v3617_v28, %v3765_v23 }
 0x263   : > { %2194 = vmatmul.mubr.bf16.vlgmr.msra.gmra.mrb[4].mxu1 %v3438_v13  ;;  %v3628_v59 = vpop.permute.xlu1 %1509 }
 0x2f9   : > { %v2066_v1 = vpop.f32.mrb[0].mxu0 }
 0x2fa   : > { %v2067_v13 = vadd.f32 %v2066_v1, %v3619_v42  ;;  %v2068_v52 = vpop.f32.mrb[1].mxu0 }
 0x2fb   : > { %v2069_v3 = vadd.f32 %v2068_v52, %v3619_v42  ;;  %v2070_v22 = vpop.f32.mrb[2].mxu0 }
 0x2fc   : > { %v2291_v25 = vmul.f32 %v2259_v38, %v2067_v13  ;;  %v2071_v2 = vadd.f32 %v2070_v22, %v3628_v59  ;;  %v2072_v31 = vpop.f32.mrb[3].mxu0 }
 0x2fd   : > { %v2580_v54 = vpack.c.bf16 %v2069_v3, %v2067_v13  ;;  %v2292_v40 = vmul.f32 %v2263_v43, %v2069_v3  ;;  %v2073_v9 = vadd.f32 %v2072_v31, %v3628_v59  ;;  %v3766_v31 = vsub.s32 6, %v2747_v4 }
 0x2fe   : > { %v2324_v21 = vmul.f32 %v2291_v25, %v2067_v13  ;;  %v2298_v62 = vmul.f32 %v2259_v38, %v2071_v2  ;;  %v2109_v0 = vpop.f32.mrb[0].mxu1 }
 0x2ff   : > { %2246 = vst [vmem:[%s3635_s11] sm:$0xff] %v2580_v54  ;;  %v2305_v29 = vadd.f32 %v2292_v40, %v2291_v25  ;;  %v2325_v24 = vmul.f32 %v2292_v40, %v2069_v3  ;;  %v2584_v19 = vpack.c.bf16 %v2073_v9, %v2071_v2  ;;  %v2299_v26 = vmul.f32 %v2263_v43, %v2073_v9  ;;  %v2111_v12 = vpop.f32.mrb[1].mxu1 }
 0x300   : > { %v2331_v46 = vmul.f32 %v2298_v62, %v2071_v2  ;;  %v2110_v60 = vadd.f32 %v2109_v0, %v3619_v42  ;;  %v2112_v11 = vadd.f32 %v2111_v12, %v3619_v42  ;;  %v2113_v27 = vpop.f32.mrb[2].mxu1  ;;  %v2283_v54 = vrot.slane %v3617_v28, %v3766_v31 }
 0x301   : > { %v2338_v37 = vadd.f32 %v2325_v24, %v2324_v21  ;;  %2250 = vst [vmem:[%s3635_s11 + $0x1c] sm:$0xff] %v2584_v19  ;;  %v2313_v14 = vadd.f32 %v2299_v26, %v2298_v62  ;;  %v2332_v47 = vmul.f32 %v2299_v26, %v2073_v9  ;;  %v2114_v63 = vadd.f32 %v2113_v27, %v3628_v59  ;;  %v2115_v5 = vpop.f32.mrb[3].mxu1 }
 0x302   : > { %v2293_v35 = vmul.f32 %v2267_v57, %v2110_v60  ;;  %v2581_v49 = vpack.c.bf16 %v2112_v11, %v2110_v60  ;;  %v2294_v34 = vmul.f32 %v2271_v15, %v2112_v11  ;;  %v2116_v20 = vadd.f32 %v2115_v5, %v3628_v59 }
 0x303   : > { %v2346_v44 = vadd.f32 %v2332_v47, %v2331_v46  ;;  %v2300_v10 = vmul.f32 %v2267_v57, %v2114_v63 }
 0x304   : > { %v2306_v33 = vadd.f32 %v2305_v29, %v2293_v35  ;;  %v2326_v45 = vmul.f32 %v2293_v35, %v2110_v60  ;;  %2247 = vst [vmem:[%s3635_s11 + $0x8] sm:$0xff] %v2581_v49  ;;  %v2327_v18 = vmul.f32 %v2294_v34, %v2112_v11  ;;  %v2585_v48 = vpack.c.bf16 %v2116_v20, %v2114_v63 }
 0x305   : > { %v2314_v51 = vadd.f32 %v2313_v14, %v2300_v10  ;;  %v2333_v50 = vmul.f32 %v2300_v10, %v2114_v63  ;;  %v2301_v16 = vmul.f32 %v2271_v15, %v2116_v20 }
 0x306   : > { %v2339_v17 = vadd.f32 %v2338_v37, %v2326_v45  ;;  %v2307_v41 = vadd.f32 %v2306_v33, %v2294_v34  ;;  %2251 = vst [vmem:[%s3635_s11 + $0x24] sm:$0xff] %v2585_v48 }
 0x307   : > { %v2347_v39 = vadd.f32 %v2346_v44, %v2333_v50  ;;  %v2315_v6 = vadd.f32 %v2314_v51, %v2301_v16  ;;  %v2334_v61 = vmul.f32 %v2301_v16, %v2116_v20 }
 0x308   : > { %v2340_v36 = vadd.f32 %v2339_v17, %v2327_v18 }
 0x309   : > { %v2348_v32 = vadd.f32 %v2347_v39, %v2334_v61 }
 0x331   : > { %v2152_v58 = vpop.f32.mrb[4].mxu0 }
 0x332   : > { %v2153_v38 = vadd.f32 %v2152_v58, %v3619_v42  ;;  %v2154_v1 = vpop.f32.mrb[5].mxu0 }
 0x333   : > { %v2155_v55 = vadd.f32 %v2154_v1, %v3619_v42  ;;  %v2156_v43 = vpop.f32.mrb[6].mxu0 }
 0x334   : > { %v2295_v13 = vmul.f32 %v2275_v30, %v2153_v38  ;;  %v2157_v52 = vadd.f32 %v2156_v43, %v3628_v59  ;;  %v2158_v3 = vpop.f32.mrb[7].mxu0 }
 0x335   : > { %v2582_v22 = vpack.c.bf16 %v2155_v55, %v2153_v38  ;;  %v2296_v25 = vmul.f32 %v2279_v53, %v2155_v55  ;;  %v2159_v2 = vadd.f32 %v2158_v3, %v3628_v59 }
 0x336   : > { %v2308_v40 = vadd.f32 %v2307_v41, %v2295_v13  ;;  %v2328_v9 = vmul.f32 %v2295_v13, %v2153_v38  ;;  %v2302_v21 = vmul.f32 %v2275_v30, %v2157_v52  ;;  %v2195_v62 = vpop.f32.mrb[4].mxu1 }
 0x337   : > { %2248 = vst [vmem:[%s3635_s11 + $0x10] sm:$0xff] %v2582_v22  ;;  %v2329_v0 = vmul.f32 %v2296_v25, %v2155_v55  ;;  %v2586_v56 = vpack.c.bf16 %v2159_v2, %v2157_v52  ;;  %v2303_v57 = vmul.f32 %v2279_v53, %v2159_v2  ;;  %v2196_v7 = vadd.f32 %v2195_v62, %v3619_v42  ;;  %v2197_v15 = vpop.f32.mrb[5].mxu1 }
 0x338   : > { %v2341_v29 = vadd.f32 %v2340_v36, %v2328_v9  ;;  %v2316_v24 = vadd.f32 %v2315_v6, %v2302_v21  ;;  %v2335_v19 = vmul.f32 %v2302_v21, %v2157_v52  ;;  %v2198_v26 = vpop.f32.mrb[6].mxu1  ;;  %v2309_v4 = vadd.f32 %v2308_v40, %v2296_v25 }
 0x339   : > { %2252 = vst [vmem:[%s3635_s11 + $0x2c] sm:$0xff] %v2586_v56  ;;  %v2336_v28 = vmul.f32 %v2303_v57, %v2159_v2  ;;  %v2583_v12 = vpack.c.bf16 %v2196_v7, %v2196_v7  ;;  %v2297_v46 = vmul.f32 %v2283_v54, %v2196_v7  ;;  %v2199_v60 = vadd.f32 %v2198_v26, %v3628_v59  ;;  %v2200_v11 = vpop.f32.mrb[7].mxu1 }
 0x33a   : > { %v2349_v27 = vadd.f32 %v2348_v32, %v2335_v19  ;;  %v2317_v37 = vadd.f32 %v2316_v24, %v2303_v57  ;;  %v2342_v14 = vadd.f32 %v2341_v29, %v2329_v0 }
 0x33b   : > { %2249 = vst [vmem:[%s3635_s11 + $0x18] sm:$0xf] %v2583_v12  ;;  %v2330_v42 = vmul.f32 %v2297_v46, %v2196_v7  ;;  %v2587_v47 = vpack.c.bf16 %v2199_v60, %v2199_v60  ;;  %v2304_v63 = vmul.f32 %v2283_v54, %v2199_v60  ;;  %v2310_v5 = vadd.f32 %v2309_v4, %v2297_v46 }
 0x33c   : > { %v2350_v35 = vadd.f32 %v2349_v27, %v2336_v28 }
 0x33d   : > { %2253 = vst [vmem:[%s3635_s11 + $0x34] sm:$0xf] %v2587_v47  ;;  %v2337_v49 = vmul.f32 %v2304_v63, %v2199_v60  ;;  %2311 = vadd.xlane.f32.xlu0 %v2310_v5  ;;  %v2318_v34 = vadd.f32 %v2317_v37, %v2304_v63  ;;  %v2343_v20 = vadd.f32 %v2342_v14, %v2330_v42 }
 0x33f   : > { %2319 = vadd.xlane.f32.xlu1 %v2318_v34  ;;  %v2351_v44 = vadd.f32 %v2350_v35, %v2337_v49 }
 0x341   : > { %2344 = vadd.xlane.f32.xlu0 %v2343_v20 }
 0x345   : > { %2352 = vadd.xlane.f32.xlu0 %v2351_v44 }
 0x3ca   : > { %v2312_v59 = vpop.xlane.xlu0 %2311 }
 0x3cb   : > { %2322 = vst.msk [vmem:[%s291_s15] sm:$0xff] %vm2321_vm4, %v2312_v59 }
 0x3cc   : > { %v2320_v10 = vpop.xlane.xlu1 %2319 }
 0x3cd   : > { %2323 = vst.msk [vmem:[%s291_s15 + $0x8] sm:$0xff] %vm2321_vm4, %v2320_v10 }
 0x3ce   : > { %v2345_v33 = vpop.xlane.xlu0 %2344 }
 0x3cf   : > { %2355 = vst.msk [vmem:[%s291_s15] sm:$0xff] %vm2354_vm1, %v2345_v33 }
 0x3d2   : > { %v2353_v45 = vpop.xlane.xlu0 %2352 }
 0x3d3   : > { %2356 = vst.msk [vmem:[%s291_s15 + $0x8] sm:$0xff] %vm2354_vm1, %v2353_v45 }
 0x3d4 PF: > { %s18_s24 = sadd.s32 1, %s2652_s24  }
 0x3d5   : > { %p15_p4 = scmp.ge.s32.totalorder %s18_s24, 4  }
 0x3d7   :  { %17 = sbr.rel (!%p15_p4) target bundleno = 1 (0x1), region = 86 }

</bundles_post_ra>
